<compile_context>
chip_gen: v7x
topology: tpu7x:2x2x1
jax: 0.10.0
libtpu: 0.0.40
codegen_flags: <defaults>
</compile_context>

<pallas_src>
from functools import partial

import jax
import jax.numpy as jnp
from jax import lax
from jax.experimental import pallas as pl
from jax.experimental.pallas import tpu as pltpu

EPS = 1e-5                     # PyTorch BatchNorm2d default eps
MXU_DTYPE = jnp.bfloat16       # MXU operand dtype (accumulation stays f32)


# ------------------------------- Pallas kernel ------------------------------ #

def _resblock_kernel(xs_ref, w1c_ref, w1b_ref, w2a_ref, w2b_ref, b_ref,
                     y_ref, pad_ref, *, NB, HO, WO, CO):
    """One batch-tile of the ResBlock forward, fully VMEM-resident.

    xs_ref  : (NB, HO+1, WO+1, 4*Cin) bf16  space-to-depth of pad(x, 1)
    w1c_ref : (16*Cin, 2*CO)          bf16  [conv1a (4x4 s2 p1) | shortcut (2x2 s2 p0)]
                                             rewritten as fused-tap 2x2/s1 weights
    w1b/w2a/w2b_ref : (9*CO, CO)      bf16  3x3 s1 p1 convs, taps fused along K
    b_ref   : (5, CO)                 f32   per-stage BN bias (scale already folded)
    y_ref   : (NB, HO, WO, CO)        f32   output tile (natural NHWC layout)
    pad_ref : (NB, HO+2, WO+2, CO)    bf16  zero-bordered scratch for the 3x3 convs
    """
    M = NB * HO * WO

    def tap_slab(src_ref, kh, kw):
        # Concatenate the kh*kw shifted slices along the contraction axis so
        # the conv becomes a single wide-K (M, kh*kw*cin) @ (kh*kw*cin, CO)
        # MXU matmul (tap fusion).
        cin = src_ref.shape[-1]
        slabs = []
        for ki in range(kh):
            for kj in range(kw):
                sl = src_ref[:, pl.ds(ki, HO), pl.ds(kj, WO), :]   # (NB,HO,WO,cin)
                slabs.append(sl.reshape(M, cin))
        return jnp.concatenate(slabs, axis=-1)                     # (M, kh*kw*cin)

    def bias(i):                                                   # (1, CO) f32
        return b_ref[pl.ds(i, 1), :]

    def store_padded(v_f32):                                       # (M, CO) f32
        pad_ref[:, pl.ds(1, HO), pl.ds(1, WO), :] = (
            v_f32.reshape(NB, HO, WO, CO).astype(pad_ref.dtype))

    # Border-only zeroing of the padded scratch: the interior is fully
    # overwritten before every 3x3 conv, so only the 1-pixel frame needs zeros.
    z_row = jnp.zeros((NB, 1, WO + 2, CO), pad_ref.dtype)
    z_col = jnp.zeros((NB, HO, 1, CO), pad_ref.dtype)
    pad_ref[:, pl.ds(0, 1), :, :] = z_row
    pad_ref[:, pl.ds(HO + 1, 1), :, :] = z_row
    pad_ref[:, pl.ds(1, HO), pl.ds(0, 1), :] = z_col
    pad_ref[:, pl.ds(1, HO), pl.ds(WO + 1, 1), :] = z_col

    # Stage 1: conv1a (4x4/s2/p1, rewritten as 2x2/s1 on the s2d input) and the
    # shortcut conv (2x2/s2/p0, same rewrite) share one tap slab and run as a
    # single matmul producing both results side by side.
    xs_slab = tap_slab(xs_ref, 2, 2)                               # (M, 16*Cin)
    hc = jnp.dot(xs_slab, w1c_ref[...], preferred_element_type=jnp.float32)
    h = jnp.maximum(hc[:, :CO] + bias(0), 0.0)      # block1 conv1 + BN + ReLU
    cut = hc[:, CO:] + bias(1)                      # shortcut conv + BN

    # block1: Conv(3,s1,p1) + BN, then residual add with the shortcut.
    store_padded(h)
    out = (jnp.dot(tap_slab(pad_ref, 3, 3), w1b_ref[...],
                   preferred_element_type=jnp.float32) + bias(2) + cut)

    # block2: Conv(3,s1,p1) + BN + ReLU
    store_padded(out)
    g = jnp.maximum(jnp.dot(tap_slab(pad_ref, 3, 3), w2a_ref[...],
                            preferred_element_type=jnp.float32) + bias(3), 0.0)

    # block2: Conv(3,s1,p1) + BN, residual add, final ReLU.
    store_padded(g)
    y = jnp.maximum(jnp.dot(tap_slab(pad_ref, 3, 3), w2b_ref[...],
                            preferred_element_type=jnp.float32) + bias(4) + out,
                    0.0)

    # f32 store in the final NHWC layout (no transpose pass, no bf16 round trip).
    y_ref[...] = y.reshape(NB, HO, WO, CO).astype(y_ref.dtype)


# --------------------------- host-side preprocessing ------------------------ #

def _fold_bn(bn_params):
    gamma, beta, mean, var = bn_params
    inv_std = 1.0 / jnp.sqrt(var + EPS)
    scale = gamma * inv_std
    return scale, beta - mean * scale


def _w_3x3_fused(w_oihw, scale):
    # (Cout, Cin, 3, 3) -> (9*Cin, Cout) with K ordered (ki, kj, c); BN folded.
    cout, cin, kh, kw = w_oihw.shape
    w = jnp.transpose(w_oihw, (2, 3, 1, 0)).reshape(kh * kw * cin, cout)
    return (w * scale[None, :]).astype(MXU_DTYPE)


def _w_s2d_4x4_fused(w_oihw, scale):
    # 4x4 stride-2 pad-1 conv == 2x2 stride-1 conv on space-to-depth(2) of the
    # padded input.  s2d channel index = (dr*2 + dc)*Cin + c; taps fused along K.
    taps = []
    for kip in range(2):
        for kjp in range(2):
            blocks = [w_oihw[:, :, 2 * kip + dr, 2 * kjp + dc].T   # (Cin, Cout)
                      for dr in range(2) for dc in range(2)]
            taps.append(jnp.concatenate(blocks, axis=0))           # (4*Cin, Cout)
    w = jnp.concatenate(taps, axis=0)                              # (16*Cin, Cout)
    return (w * scale[None, :]).astype(MXU_DTYPE)


def _w_s2d_cut_fused(w_oihw, scale):
    # 2x2 stride-2 pad-0 conv on x == 2x2 stride-1 conv on s2d(pad(x, 1)) whose
    # tap (ki', kj') only reads the (dr, dc) = (1-ki', 1-kj') sub-channels.
    cout, cin = w_oihw.shape[0], w_oihw.shape[1]
    zero = jnp.zeros((cin, cout), w_oihw.dtype)
    taps = []
    for kip in range(2):
        for kjp in range(2):
            blocks = [w_oihw[:, :, kip, kjp].T
                      if (dr == 1 - kip and dc == 1 - kjp) else zero
                      for dr in range(2) for dc in range(2)]
            taps.append(jnp.concatenate(blocks, axis=0))
    w = jnp.concatenate(taps, axis=0)                              # (16*Cin, Cout)
    return (w * scale[None, :]).astype(MXU_DTYPE)


def resblock_forward(x_nhwc, p, *, nb=1):
    """nb = batch images per grid step (per-step rows = nb*HO*WO; raise toward
    256-512 rows for tiny spatial dims, keep 1 for large images)."""
    N, H, W, Cin = x_nhwc.shape
    Cout = p["w1a"].shape[0]
    assert H % 2 == 0 and W % 2 == 0 and N % nb == 0
    HO, WO = H // 2, W // 2

    # Single bijective relayout of the input: pad once + space-to-depth(2).
    xp = jnp.pad(x_nhwc, ((0, 0), (1, 1), (1, 1), (0, 0)))
    xs = (xp.reshape(N, HO + 1, 2, WO + 1, 2, Cin)
            .transpose(0, 1, 3, 2, 4, 5)
            .reshape(N, HO + 1, WO + 1, 4 * Cin)).astype(MXU_DTYPE)

    # Fold BN scale into the conv weights; fuse kernel taps along K.
    s1a, b1a = _fold_bn(p["bn1a"])
    sc,  bc  = _fold_bn(p["bnc"])
    s1b, b1b = _fold_bn(p["bn1b"])
    s2a, b2a = _fold_bn(p["bn2a"])
    s2b, b2b = _fold_bn(p["bn2b"])
    w1  = _w_s2d_4x4_fused(p["w1a"], s1a)          # (16*Cin, CO)
    wc  = _w_s2d_cut_fused(p["wc"],  sc)           # (16*Cin, CO)
    w1c = jnp.concatenate([w1, wc], axis=1)        # (16*Cin, 2*CO): one matmul
    w1b = _w_3x3_fused(p["w1b"], s1b)
    w2a = _w_3x3_fused(p["w2a"], s2a)
    w2b = _w_3x3_fused(p["w2b"], s2b)
    biases = jnp.stack([b1a, bc, b1b, b2a, b2b], 0).astype(jnp.float32)

    def resident(shape):
        zeros = (0,) * len(shape)
        return pl.BlockSpec(shape, lambda b: zeros)   # stays VMEM-resident

    kern = partial(_resblock_kernel, NB=nb, HO=HO, WO=WO, CO=Cout)
    y = pl.pallas_call(
        kern,
        grid=(N // nb,),
        in_specs=[
            pl.BlockSpec((nb, HO + 1, WO + 1, 4 * Cin), lambda b: (b, 0, 0, 0)),
            resident(w1c.shape),
            resident(w1b.shape),
            resident(w2a.shape),
            resident(w2b.shape),
            resident(biases.shape),
        ],
        out_specs=pl.BlockSpec((nb, HO, WO, Cout), lambda b: (b, 0, 0, 0)),
        out_shape=jax.ShapeDtypeStruct((N, HO, WO, Cout), jnp.float32),
        scratch_shapes=[pltpu.VMEM((nb, HO + 2, WO + 2, Cout), MXU_DTYPE)],
        compiler_params=pltpu.CompilerParams(
            dimension_semantics=("parallel",),      # megacore / v7x dual-TC
            vmem_limit_bytes=32 * 1024 * 1024,      # fits v7x 64 MiB physical
        ),
    )(xs, w1c, w1b, w2a, w2b, biases)
    return y                                        # (N, HO, WO, Cout) f32


# ------------------------------ ResBlock params ----------------------------- #

def init_params(key, in_channels, out_channels):
    ks = jax.random.split(key, 15)
    def w(k, shape):
        return jax.random.normal(k, shape, jnp.float32) * 0.1
    def bn(k1, k2, k3, c):
        gamma = jax.random.uniform(k1, (c,), jnp.float32, 0.5, 1.5)
        beta = jax.random.normal(k2, (c,), jnp.float32) * 0.1
        mean = jax.random.normal(k3, (c,), jnp.float32) * 0.1
        var = jnp.ones((c,), jnp.float32)
        return (gamma, beta, mean, var)
    p = {
        "w1a": w(ks[0], (out_channels, in_channels, 4, 4)),
        "bn1a": bn(ks[1], ks[2], ks[3], out_channels),
        "w1b": w(ks[4], (out_channels, out_channels, 3, 3)),
        "bn1b": bn(ks[5], ks[6], ks[7], out_channels),
        "wc": w(ks[8], (out_channels, in_channels, 2, 2)),
        "bnc": bn(ks[9], ks[10], ks[11], out_channels),
        "w2a": w(ks[12], (out_channels, out_channels, 3, 3)),
        "bn2a": bn(ks[13], ks[14], ks[0], out_channels),
        "w2b": w(ks[1], (out_channels, out_channels, 3, 3)),
        "bn2b": bn(ks[2], ks[3], ks[4], out_channels),
    }
    return p


# ------------------------------ pure-JAX reference ------------------------- #

def _ref_conv(x, w_oihw, stride, pad):
    w = jnp.transpose(w_oihw, (2, 3, 1, 0))  # HWIO
    return lax.conv_general_dilated(
        x, w, (stride, stride), [(pad, pad), (pad, pad)],
        dimension_numbers=("NHWC", "HWIO", "NHWC"))


def _ref_bn(x, bnp):
    gamma, beta, mean, var = bnp
    return (x - mean) / jnp.sqrt(var + EPS) * gamma + beta


def resblock_ref(x, p):
    h = jax.nn.relu(_ref_bn(_ref_conv(x, p["w1a"], 2, 1), p["bn1a"]))
    b1 = _ref_bn(_ref_conv(h, p["w1b"], 1, 1), p["bn1b"])
    cut = _ref_bn(_ref_conv(x, p["wc"], 2, 0), p["bnc"])
    out = b1 + cut
    g = jax.nn.relu(_ref_bn(_ref_conv(out, p["w2a"], 1, 1), p["bn2a"]))
    b2 = _ref_bn(_ref_conv(g, p["w2b"], 1, 1), p["bn2b"])
    return jax.nn.relu(out + b2)


# ----------------------------------- main ----------------------------------- #

if __name__ == "__main__":
    key = jax.random.PRNGKey(0)
    k_x, k_p = jax.random.split(key)

    N, Cin, H, W = 2, 4, 16, 16          # PyTorch-style NCHW input shape
    Cout = 8

    x_nchw = jax.random.normal(k_x, (N, Cin, H, W), jnp.float32)
    x_nhwc = jnp.transpose(x_nchw, (0, 2, 3, 1))   # kernel layout (NHWC)

    params = init_params(k_p, Cin, Cout)

    y = jax.block_until_ready(resblock_forward(x_nhwc, params))
    y_ref = jax.block_until_ready(resblock_ref(x_nhwc, params))

    assert y.shape == (N, H // 2, W // 2, Cout)
    # bf16 MXU operands (f32 accumulation & epilogue): compare against the
    # all-f32 XLA reference with a correspondingly relaxed tolerance.
    assert jnp.allclose(y, y_ref, rtol=5e-2, atol=5e-2), "mismatch vs JAX reference"

    print("KERNEL_OK")
</pallas_src>

<mosaic_0001>
module attributes {stable_mosaic.version = 11 : i64} {
  func.func @_resblock_kernel(%arg0: i32, %arg1: memref<1x9x9x16xbf16, #tpu.memory_space<vmem>>, %arg2: memref<64x16xbf16, #tpu.memory_space<vmem>>, %arg3: memref<72x8xbf16, #tpu.memory_space<vmem>>, %arg4: memref<72x8xbf16, #tpu.memory_space<vmem>>, %arg5: memref<72x8xbf16, #tpu.memory_space<vmem>>, %arg6: memref<5x8xf32, #tpu.memory_space<vmem>>, %arg7: memref<1x8x8x8xf32, #tpu.memory_space<vmem>>, %arg8: memref<1x10x10x8xbf16, #tpu.memory_space<vmem>>) attributes {dimension_semantics = [#tpu.dimension_semantics<parallel>], iteration_bounds = array<i64: 2>, scalar_prefetch = 0 : i64, scratch_operands = 1 : i64, tpu.core_type = #tpu.core_type<tc>, window_params = [{transform_indices = @transform_0, window_bounds = array<i64: 1, 9, 9, 16>}, {pipeline_mode = #tpu.pipeline_mode<synchronous>, transform_indices = @transform_1, window_bounds = array<i64: 64, 16>}, {pipeline_mode = #tpu.pipeline_mode<synchronous>, transform_indices = @transform_2, window_bounds = array<i64: 72, 8>}, {pipeline_mode = #tpu.pipeline_mode<synchronous>, transform_indices = @transform_3, window_bounds = array<i64: 72, 8>}, {pipeline_mode = #tpu.pipeline_mode<synchronous>, transform_indices = @transform_4, window_bounds = array<i64: 72, 8>}, {pipeline_mode = #tpu.pipeline_mode<synchronous>, transform_indices = @transform_5, window_bounds = array<i64: 5, 8>}, {transform_indices = @transform_6, window_bounds = array<i64: 1, 8, 8, 8>}]} {
    %cst = arith.constant 0.000000e+00 : bf16
    %0 = vector.broadcast %cst : bf16 to vector<1x1x10x8xbf16>
    %cst_0 = arith.constant 0.000000e+00 : bf16
    %1 = vector.broadcast %cst_0 : bf16 to vector<1x8x1x8xbf16>
    %c0 = arith.constant 0 : index
    %c0_1 = arith.constant 0 : index
    %c0_2 = arith.constant 0 : index
    %c0_3 = arith.constant 0 : index
    %2 = vector.load %arg8[%c0, %c0_1, %c0_2, %c0_3] : memref<1x10x10x8xbf16, #tpu.memory_space<vmem>>, vector<1x1x10x8xbf16>
    tpu.vector_store %arg8[%c0, %c0_1, %c0_2, %c0_3], %0 {strides = array<i32>} : memref<1x10x10x8xbf16, #tpu.memory_space<vmem>>, vector<1x1x10x8xbf16>,
    %c0_4 = arith.constant 0 : index
    %c9 = arith.constant 9 : index
    %c0_5 = arith.constant 0 : index
    %c0_6 = arith.constant 0 : index
    %3 = vector.load %arg8[%c0_4, %c9, %c0_5, %c0_6] : memref<1x10x10x8xbf16, #tpu.memory_space<vmem>>, vector<1x1x10x8xbf16>
    tpu.vector_store %arg8[%c0_4, %c9, %c0_5, %c0_6], %0 {strides = array<i32>} : memref<1x10x10x8xbf16, #tpu.memory_space<vmem>>, vector<1x1x10x8xbf16>,
    %c0_7 = arith.constant 0 : index
    %c1 = arith.constant 1 : index
    %c0_8 = arith.constant 0 : index
    %c0_9 = arith.constant 0 : index
    %4 = vector.load %arg8[%c0_7, %c1, %c0_8, %c0_9] : memref<1x10x10x8xbf16, #tpu.memory_space<vmem>>, vector<1x8x1x8xbf16>
    tpu.vector_store %arg8[%c0_7, %c1, %c0_8, %c0_9], %1 {strides = array<i32>} : memref<1x10x10x8xbf16, #tpu.memory_space<vmem>>, vector<1x8x1x8xbf16>,
    %c0_10 = arith.constant 0 : index
    %c1_11 = arith.constant 1 : index
    %c9_12 = arith.constant 9 : index
    %c0_13 = arith.constant 0 : index
    %5 = vector.load %arg8[%c0_10, %c1_11, %c9_12, %c0_13] : memref<1x10x10x8xbf16, #tpu.memory_space<vmem>>, vector<1x8x1x8xbf16>
    tpu.vector_store %arg8[%c0_10, %c1_11, %c9_12, %c0_13], %1 {strides = array<i32>} : memref<1x10x10x8xbf16, #tpu.memory_space<vmem>>, vector<1x8x1x8xbf16>,
    %c0_14 = arith.constant 0 : index
    %c0_15 = arith.constant 0 : index
    %c0_16 = arith.constant 0 : index
    %c0_17 = arith.constant 0 : index
    %6 = vector.load %arg1[%c0_14, %c0_15, %c0_16, %c0_17] : memref<1x9x9x16xbf16, #tpu.memory_space<vmem>>, vector<1x8x8x16xbf16>
    %7 = vector.shape_cast %6 : vector<1x8x8x16xbf16> to vector<64x16xbf16>
    %c0_18 = arith.constant 0 : index
    %c0_19 = arith.constant 0 : index
    %c1_20 = arith.constant 1 : index
    %c0_21 = arith.constant 0 : index
    %8 = vector.load %arg1[%c0_18, %c0_19, %c1_20, %c0_21] : memref<1x9x9x16xbf16, #tpu.memory_space<vmem>>, vector<1x8x8x16xbf16>
    %9 = vector.shape_cast %8 : vector<1x8x8x16xbf16> to vector<64x16xbf16>
    %c0_22 = arith.constant 0 : index
    %c1_23 = arith.constant 1 : index
    %c0_24 = arith.constant 0 : index
    %c0_25 = arith.constant 0 : index
    %10 = vector.load %arg1[%c0_22, %c1_23, %c0_24, %c0_25] : memref<1x9x9x16xbf16, #tpu.memory_space<vmem>>, vector<1x8x8x16xbf16>
    %11 = vector.shape_cast %10 : vector<1x8x8x16xbf16> to vector<64x16xbf16>
    %c0_26 = arith.constant 0 : index
    %c1_27 = arith.constant 1 : index
    %c1_28 = arith.constant 1 : index
    %c0_29 = arith.constant 0 : index
    %12 = vector.load %arg1[%c0_26, %c1_27, %c1_28, %c0_29] : memref<1x9x9x16xbf16, #tpu.memory_space<vmem>>, vector<1x8x8x16xbf16>
    %13 = vector.shape_cast %12 : vector<1x8x8x16xbf16> to vector<64x16xbf16>
    %14 = tpu.concatenate %7, %9, %11, %13 in 1 : vector<64x16xbf16>, vector<64x16xbf16>, vector<64x16xbf16>, vector<64x16xbf16> -> vector<64x64xbf16>
    %c0_30 = arith.constant 0 : index
    %c0_31 = arith.constant 0 : index
    %15 = vector.load %arg2[%c0_30, %c0_31] : memref<64x16xbf16, #tpu.memory_space<vmem>>, vector<64x16xbf16>
    %cst_32 = arith.constant dense<0.000000e+00> : vector<64x16xf32>
    %16 = tpu.matmul %14, %15, %cst_32 {dimension_numbers = #tpu.dot_dimension_numbers<[1], [0], [0], [1], [0, 0, 1, 1], [], []>} : vector<64x64xbf16>, vector<64x16xbf16>, vector<64x16xf32> -> vector<64x16xf32>
    %17 = vector.extract_strided_slice %16 {offsets = [0, 0], sizes = [64, 8], strides = [1, 1]} : vector<64x16xf32> to vector<64x8xf32>
    %c0_33 = arith.constant 0 : index
    %c0_34 = arith.constant 0 : index
    %18 = vector.load %arg6[%c0_33, %c0_34] : memref<5x8xf32, #tpu.memory_space<vmem>>, vector<1x8xf32>
    %19 = vector.broadcast %18 : vector<1x8xf32> to vector<64x8xf32>
    %20 = arith.addf %17, %19 : vector<64x8xf32>
    %cst_35 = arith.constant 0.000000e+00 : f32
    %21 = vector.broadcast %cst_35 : f32 to vector<64x8xf32>
    %22 = arith.maximumf %20, %21 : vector<64x8xf32>
    %23 = vector.extract_strided_slice %16 {offsets = [0, 8], sizes = [64, 8], strides = [1, 1]} : vector<64x16xf32> to vector<64x8xf32>
    %c1_36 = arith.constant 1 : index
    %c0_37 = arith.constant 0 : index
    %24 = vector.load %arg6[%c1_36, %c0_37] : memref<5x8xf32, #tpu.memory_space<vmem>>, vector<1x8xf32>
    %25 = vector.broadcast %24 : vector<1x8xf32> to vector<64x8xf32>
    %26 = arith.addf %23, %25 : vector<64x8xf32>
    %27 = vector.shape_cast %22 : vector<64x8xf32> to vector<1x8x8x8xf32>
    %28 = arith.truncf %27 : vector<1x8x8x8xf32> to vector<1x8x8x8xbf16>
    %c0_38 = arith.constant 0 : index
    %c1_39 = arith.constant 1 : index
    %c1_40 = arith.constant 1 : index
    %c0_41 = arith.constant 0 : index
    %29 = vector.load %arg8[%c0_38, %c1_39, %c1_40, %c0_41] : memref<1x10x10x8xbf16, #tpu.memory_space<vmem>>, vector<1x8x8x8xbf16>
    tpu.vector_store %arg8[%c0_38, %c1_39, %c1_40, %c0_41], %28 {strides = array<i32>} : memref<1x10x10x8xbf16, #tpu.memory_space<vmem>>, vector<1x8x8x8xbf16>,
    %c0_42 = arith.constant 0 : index
    %c0_43 = arith.constant 0 : index
    %c0_44 = arith.constant 0 : index
    %c0_45 = arith.constant 0 : index
    %30 = vector.load %arg8[%c0_42, %c0_43, %c0_44, %c0_45] : memref<1x10x10x8xbf16, #tpu.memory_space<vmem>>, vector<1x8x8x8xbf16>
    %31 = vector.shape_cast %30 : vector<1x8x8x8xbf16> to vector<64x8xbf16>
    %c0_46 = arith.constant 0 : index
    %c0_47 = arith.constant 0 : index
    %c1_48 = arith.constant 1 : index
    %c0_49 = arith.constant 0 : index
    %32 = vector.load %arg8[%c0_46, %c0_47, %c1_48, %c0_49] : memref<1x10x10x8xbf16, #tpu.memory_space<vmem>>, vector<1x8x8x8xbf16>
    %33 = vector.shape_cast %32 : vector<1x8x8x8xbf16> to vector<64x8xbf16>
    %c0_50 = arith.constant 0 : index
    %c0_51 = arith.constant 0 : index
    %c2 = arith.constant 2 : index
    %c0_52 = arith.constant 0 : index
    %34 = vector.load %arg8[%c0_50, %c0_51, %c2, %c0_52] : memref<1x10x10x8xbf16, #tpu.memory_space<vmem>>, vector<1x8x8x8xbf16>
    %35 = vector.shape_cast %34 : vector<1x8x8x8xbf16> to vector<64x8xbf16>
    %c0_53 = arith.constant 0 : index
    %c1_54 = arith.constant 1 : index
    %c0_55 = arith.constant 0 : index
    %c0_56 = arith.constant 0 : index
    %36 = vector.load %arg8[%c0_53, %c1_54, %c0_55, %c0_56] : memref<1x10x10x8xbf16, #tpu.memory_space<vmem>>, vector<1x8x8x8xbf16>
    %37 = vector.shape_cast %36 : vector<1x8x8x8xbf16> to vector<64x8xbf16>
    %c0_57 = arith.constant 0 : index
    %c1_58 = arith.constant 1 : index
    %c1_59 = arith.constant 1 : index
    %c0_60 = arith.constant 0 : index
    %38 = vector.load %arg8[%c0_57, %c1_58, %c1_59, %c0_60] : memref<1x10x10x8xbf16, #tpu.memory_space<vmem>>, vector<1x8x8x8xbf16>
    %39 = vector.shape_cast %38 : vector<1x8x8x8xbf16> to vector<64x8xbf16>
    %c0_61 = arith.constant 0 : index
    %c1_62 = arith.constant 1 : index
    %c2_63 = arith.constant 2 : index
    %c0_64 = arith.constant 0 : index
    %40 = vector.load %arg8[%c0_61, %c1_62, %c2_63, %c0_64] : memref<1x10x10x8xbf16, #tpu.memory_space<vmem>>, vector<1x8x8x8xbf16>
    %41 = vector.shape_cast %40 : vector<1x8x8x8xbf16> to vector<64x8xbf16>
    %c0_65 = arith.constant 0 : index
    %c2_66 = arith.constant 2 : index
    %c0_67 = arith.constant 0 : index
    %c0_68 = arith.constant 0 : index
    %42 = vector.load %arg8[%c0_65, %c2_66, %c0_67, %c0_68] : memref<1x10x10x8xbf16, #tpu.memory_space<vmem>>, vector<1x8x8x8xbf16>
    %43 = vector.shape_cast %42 : vector<1x8x8x8xbf16> to vector<64x8xbf16>
    %c0_69 = arith.constant 0 : index
    %c2_70 = arith.constant 2 : index
    %c1_71 = arith.constant 1 : index
    %c0_72 = arith.constant 0 : index
    %44 = vector.load %arg8[%c0_69, %c2_70, %c1_71, %c0_72] : memref<1x10x10x8xbf16, #tpu.memory_space<vmem>>, vector<1x8x8x8xbf16>
    %45 = vector.shape_cast %44 : vector<1x8x8x8xbf16> to vector<64x8xbf16>
    %c0_73 = arith.constant 0 : index
    %c2_74 = arith.constant 2 : index
    %c2_75 = arith.constant 2 : index
    %c0_76 = arith.constant 0 : index
    %46 = vector.load %arg8[%c0_73, %c2_74, %c2_75, %c0_76] : memref<1x10x10x8xbf16, #tpu.memory_space<vmem>>, vector<1x8x8x8xbf16>
    %47 = vector.shape_cast %46 : vector<1x8x8x8xbf16> to vector<64x8xbf16>
    %48 = tpu.concatenate %31, %33, %35, %37, %39, %41, %43, %45, %47 in 1 : vector<64x8xbf16>, vector<64x8xbf16>, vector<64x8xbf16>, vector<64x8xbf16>, vector<64x8xbf16>, vector<64x8xbf16>, vector<64x8xbf16>, vector<64x8xbf16>, vector<64x8xbf16> -> vector<64x72xbf16>
    %c0_77 = arith.constant 0 : index
    %c0_78 = arith.constant 0 : index
    %49 = vector.load %arg3[%c0_77, %c0_78] : memref<72x8xbf16, #tpu.memory_space<vmem>>, vector<72x8xbf16>
    %cst_79 = arith.constant dense<0.000000e+00> : vector<64x8xf32>
    %50 = tpu.matmul %48, %49, %cst_79 {dimension_numbers = #tpu.dot_dimension_numbers<[1], [0], [0], [1], [0, 0, 1, 1], [], []>} : vector<64x72xbf16>, vector<72x8xbf16>, vector<64x8xf32> -> vector<64x8xf32>
    %c2_80 = arith.constant 2 : index
    %c0_81 = arith.constant 0 : index
    %51 = vector.load %arg6[%c2_80, %c0_81] : memref<5x8xf32, #tpu.memory_space<vmem>>, vector<1x8xf32>
    %52 = vector.broadcast %51 : vector<1x8xf32> to vector<64x8xf32>
    %53 = arith.addf %50, %52 : vector<64x8xf32>
    %54 = arith.addf %53, %26 : vector<64x8xf32>
    %55 = vector.shape_cast %54 : vector<64x8xf32> to vector<1x8x8x8xf32>
    %56 = arith.truncf %55 : vector<1x8x8x8xf32> to vector<1x8x8x8xbf16>
    %c0_82 = arith.constant 0 : index
    %c1_83 = arith.constant 1 : index
    %c1_84 = arith.constant 1 : index
    %c0_85 = arith.constant 0 : index
    %57 = vector.load %arg8[%c0_82, %c1_83, %c1_84, %c0_85] : memref<1x10x10x8xbf16, #tpu.memory_space<vmem>>, vector<1x8x8x8xbf16>
    tpu.vector_store %arg8[%c0_82, %c1_83, %c1_84, %c0_85], %56 {strides = array<i32>} : memref<1x10x10x8xbf16, #tpu.memory_space<vmem>>, vector<1x8x8x8xbf16>,
    %c0_86 = arith.constant 0 : index
    %c0_87 = arith.constant 0 : index
    %c0_88 = arith.constant 0 : index
    %c0_89 = arith.constant 0 : index
    %58 = vector.load %arg8[%c0_86, %c0_87, %c0_88, %c0_89] : memref<1x10x10x8xbf16, #tpu.memory_space<vmem>>, vector<1x8x8x8xbf16>
    %59 = vector.shape_cast %58 : vector<1x8x8x8xbf16> to vector<64x8xbf16>
    %c0_90 = arith.constant 0 : index
    %c0_91 = arith.constant 0 : index
    %c1_92 = arith.constant 1 : index
    %c0_93 = arith.constant 0 : index
    %60 = vector.load %arg8[%c0_90, %c0_91, %c1_92, %c0_93] : memref<1x10x10x8xbf16, #tpu.memory_space<vmem>>, vector<1x8x8x8xbf16>
    %61 = vector.shape_cast %60 : vector<1x8x8x8xbf16> to vector<64x8xbf16>
    %c0_94 = arith.constant 0 : index
    %c0_95 = arith.constant 0 : index
    %c2_96 = arith.constant 2 : index
    %c0_97 = arith.constant 0 : index
    %62 = vector.load %arg8[%c0_94, %c0_95, %c2_96, %c0_97] : memref<1x10x10x8xbf16, #tpu.memory_space<vmem>>, vector<1x8x8x8xbf16>
    %63 = vector.shape_cast %62 : vector<1x8x8x8xbf16> to vector<64x8xbf16>
    %c0_98 = arith.constant 0 : index
    %c1_99 = arith.constant 1 : index
    %c0_100 = arith.constant 0 : index
    %c0_101 = arith.constant 0 : index
    %64 = vector.load %arg8[%c0_98, %c1_99, %c0_100, %c0_101] : memref<1x10x10x8xbf16, #tpu.memory_space<vmem>>, vector<1x8x8x8xbf16>
    %65 = vector.shape_cast %64 : vector<1x8x8x8xbf16> to vector<64x8xbf16>
    %c0_102 = arith.constant 0 : index
    %c1_103 = arith.constant 1 : index
    %c1_104 = arith.constant 1 : index
    %c0_105 = arith.constant 0 : index
    %66 = vector.load %arg8[%c0_102, %c1_103, %c1_104, %c0_105] : memref<1x10x10x8xbf16, #tpu.memory_space<vmem>>, vector<1x8x8x8xbf16>
    %67 = vector.shape_cast %66 : vector<1x8x8x8xbf16> to vector<64x8xbf16>
    %c0_106 = arith.constant 0 : index
    %c1_107 = arith.constant 1 : index
    %c2_108 = arith.constant 2 : index
    %c0_109 = arith.constant 0 : index
    %68 = vector.load %arg8[%c0_106, %c1_107, %c2_108, %c0_109] : memref<1x10x10x8xbf16, #tpu.memory_space<vmem>>, vector<1x8x8x8xbf16>
    %69 = vector.shape_cast %68 : vector<1x8x8x8xbf16> to vector<64x8xbf16>
    %c0_110 = arith.constant 0 : index
    %c2_111 = arith.constant 2 : index
    %c0_112 = arith.constant 0 : index
    %c0_113 = arith.constant 0 : index
    %70 = vector.load %arg8[%c0_110, %c2_111, %c0_112, %c0_113] : memref<1x10x10x8xbf16, #tpu.memory_space<vmem>>, vector<1x8x8x8xbf16>
    %71 = vector.shape_cast %70 : vector<1x8x8x8xbf16> to vector<64x8xbf16>
    %c0_114 = arith.constant 0 : index
    %c2_115 = arith.constant 2 : index
    %c1_116 = arith.constant 1 : index
    %c0_117 = arith.constant 0 : index
    %72 = vector.load %arg8[%c0_114, %c2_115, %c1_116, %c0_117] : memref<1x10x10x8xbf16, #tpu.memory_space<vmem>>, vector<1x8x8x8xbf16>
    %73 = vector.shape_cast %72 : vector<1x8x8x8xbf16> to vector<64x8xbf16>
    %c0_118 = arith.constant 0 : index
    %c2_119 = arith.constant 2 : index
    %c2_120 = arith.constant 2 : index
    %c0_121 = arith.constant 0 : index
    %74 = vector.load %arg8[%c0_118, %c2_119, %c2_120, %c0_121] : memref<1x10x10x8xbf16, #tpu.memory_space<vmem>>, vector<1x8x8x8xbf16>
    %75 = vector.shape_cast %74 : vector<1x8x8x8xbf16> to vector<64x8xbf16>
    %76 = tpu.concatenate %59, %61, %63, %65, %67, %69, %71, %73, %75 in 1 : vector<64x8xbf16>, vector<64x8xbf16>, vector<64x8xbf16>, vector<64x8xbf16>, vector<64x8xbf16>, vector<64x8xbf16>, vector<64x8xbf16>, vector<64x8xbf16>, vector<64x8xbf16> -> vector<64x72xbf16>
    %c0_122 = arith.constant 0 : index
    %c0_123 = arith.constant 0 : index
    %77 = vector.load %arg4[%c0_122, %c0_123] : memref<72x8xbf16, #tpu.memory_space<vmem>>, vector<72x8xbf16>
    %cst_124 = arith.constant dense<0.000000e+00> : vector<64x8xf32>
    %78 = tpu.matmul %76, %77, %cst_124 {dimension_numbers = #tpu.dot_dimension_numbers<[1], [0], [0], [1], [0, 0, 1, 1], [], []>} : vector<64x72xbf16>, vector<72x8xbf16>, vector<64x8xf32> -> vector<64x8xf32>
    %c3 = arith.constant 3 : index
    %c0_125 = arith.constant 0 : index
    %79 = vector.load %arg6[%c3, %c0_125] : memref<5x8xf32, #tpu.memory_space<vmem>>, vector<1x8xf32>
    %80 = vector.broadcast %79 : vector<1x8xf32> to vector<64x8xf32>
    %81 = arith.addf %78, %80 : vector<64x8xf32>
    %cst_126 = arith.constant 0.000000e+00 : f32
    %82 = vector.broadcast %cst_126 : f32 to vector<64x8xf32>
    %83 = arith.maximumf %81, %82 : vector<64x8xf32>
    %84 = vector.shape_cast %83 : vector<64x8xf32> to vector<1x8x8x8xf32>
    %85 = arith.truncf %84 : vector<1x8x8x8xf32> to vector<1x8x8x8xbf16>
    %c0_127 = arith.constant 0 : index
    %c1_128 = arith.constant 1 : index
    %c1_129 = arith.constant 1 : index
    %c0_130 = arith.constant 0 : index
    %86 = vector.load %arg8[%c0_127, %c1_128, %c1_129, %c0_130] : memref<1x10x10x8xbf16, #tpu.memory_space<vmem>>, vector<1x8x8x8xbf16>
    tpu.vector_store %arg8[%c0_127, %c1_128, %c1_129, %c0_130], %85 {strides = array<i32>} : memref<1x10x10x8xbf16, #tpu.memory_space<vmem>>, vector<1x8x8x8xbf16>,
    %c0_131 = arith.constant 0 : index
    %c0_132 = arith.constant 0 : index
    %c0_133 = arith.constant 0 : index
    %c0_134 = arith.constant 0 : index
    %87 = vector.load %arg8[%c0_131, %c0_132, %c0_133, %c0_134] : memref<1x10x10x8xbf16, #tpu.memory_space<vmem>>, vector<1x8x8x8xbf16>
    %88 = vector.shape_cast %87 : vector<1x8x8x8xbf16> to vector<64x8xbf16>
    %c0_135 = arith.constant 0 : index
    %c0_136 = arith.constant 0 : index
    %c1_137 = arith.constant 1 : index
    %c0_138 = arith.constant 0 : index
    %89 = vector.load %arg8[%c0_135, %c0_136, %c1_137, %c0_138] : memref<1x10x10x8xbf16, #tpu.memory_space<vmem>>, vector<1x8x8x8xbf16>
    %90 = vector.shape_cast %89 : vector<1x8x8x8xbf16> to vector<64x8xbf16>
    %c0_139 = arith.constant 0 : index
    %c0_140 = arith.constant 0 : index
    %c2_141 = arith.constant 2 : index
    %c0_142 = arith.constant 0 : index
    %91 = vector.load %arg8[%c0_139, %c0_140, %c2_141, %c0_142] : memref<1x10x10x8xbf16, #tpu.memory_space<vmem>>, vector<1x8x8x8xbf16>
    %92 = vector.shape_cast %91 : vector<1x8x8x8xbf16> to vector<64x8xbf16>
    %c0_143 = arith.constant 0 : index
    %c1_144 = arith.constant 1 : index
    %c0_145 = arith.constant 0 : index
    %c0_146 = arith.constant 0 : index
    %93 = vector.load %arg8[%c0_143, %c1_144, %c0_145, %c0_146] : memref<1x10x10x8xbf16, #tpu.memory_space<vmem>>, vector<1x8x8x8xbf16>
    %94 = vector.shape_cast %93 : vector<1x8x8x8xbf16> to vector<64x8xbf16>
    %c0_147 = arith.constant 0 : index
    %c1_148 = arith.constant 1 : index
    %c1_149 = arith.constant 1 : index
    %c0_150 = arith.constant 0 : index
    %95 = vector.load %arg8[%c0_147, %c1_148, %c1_149, %c0_150] : memref<1x10x10x8xbf16, #tpu.memory_space<vmem>>, vector<1x8x8x8xbf16>
    %96 = vector.shape_cast %95 : vector<1x8x8x8xbf16> to vector<64x8xbf16>
    %c0_151 = arith.constant 0 : index
    %c1_152 = arith.constant 1 : index
    %c2_153 = arith.constant 2 : index
    %c0_154 = arith.constant 0 : index
    %97 = vector.load %arg8[%c0_151, %c1_152, %c2_153, %c0_154] : memref<1x10x10x8xbf16, #tpu.memory_space<vmem>>, vector<1x8x8x8xbf16>
    %98 = vector.shape_cast %97 : vector<1x8x8x8xbf16> to vector<64x8xbf16>
    %c0_155 = arith.constant 0 : index
    %c2_156 = arith.constant 2 : index
    %c0_157 = arith.constant 0 : index
    %c0_158 = arith.constant 0 : index
    %99 = vector.load %arg8[%c0_155, %c2_156, %c0_157, %c0_158] : memref<1x10x10x8xbf16, #tpu.memory_space<vmem>>, vector<1x8x8x8xbf16>
    %100 = vector.shape_cast %99 : vector<1x8x8x8xbf16> to vector<64x8xbf16>
    %c0_159 = arith.constant 0 : index
    %c2_160 = arith.constant 2 : index
    %c1_161 = arith.constant 1 : index
    %c0_162 = arith.constant 0 : index
    %101 = vector.load %arg8[%c0_159, %c2_160, %c1_161, %c0_162] : memref<1x10x10x8xbf16, #tpu.memory_space<vmem>>, vector<1x8x8x8xbf16>
    %102 = vector.shape_cast %101 : vector<1x8x8x8xbf16> to vector<64x8xbf16>
    %c0_163 = arith.constant 0 : index
    %c2_164 = arith.constant 2 : index
    %c2_165 = arith.constant 2 : index
    %c0_166 = arith.constant 0 : index
    %103 = vector.load %arg8[%c0_163, %c2_164, %c2_165, %c0_166] : memref<1x10x10x8xbf16, #tpu.memory_space<vmem>>, vector<1x8x8x8xbf16>
    %104 = vector.shape_cast %103 : vector<1x8x8x8xbf16> to vector<64x8xbf16>
    %105 = tpu.concatenate %88, %90, %92, %94, %96, %98, %100, %102, %104 in 1 : vector<64x8xbf16>, vector<64x8xbf16>, vector<64x8xbf16>, vector<64x8xbf16>, vector<64x8xbf16>, vector<64x8xbf16>, vector<64x8xbf16>, vector<64x8xbf16>, vector<64x8xbf16> -> vector<64x72xbf16>
    %c0_167 = arith.constant 0 : index
    %c0_168 = arith.constant 0 : index
    %106 = vector.load %arg5[%c0_167, %c0_168] : memref<72x8xbf16, #tpu.memory_space<vmem>>, vector<72x8xbf16>
    %cst_169 = arith.constant dense<0.000000e+00> : vector<64x8xf32>
    %107 = tpu.matmul %105, %106, %cst_169 {dimension_numbers = #tpu.dot_dimension_numbers<[1], [0], [0], [1], [0, 0, 1, 1], [], []>} : vector<64x72xbf16>, vector<72x8xbf16>, vector<64x8xf32> -> vector<64x8xf32>
    %c4 = arith.constant 4 : index
    %c0_170 = arith.constant 0 : index
    %108 = vector.load %arg6[%c4, %c0_170] : memref<5x8xf32, #tpu.memory_space<vmem>>, vector<1x8xf32>
    %109 = vector.broadcast %108 : vector<1x8xf32> to vector<64x8xf32>
    %110 = arith.addf %107, %109 : vector<64x8xf32>
    %111 = arith.addf %110, %54 : vector<64x8xf32>
    %cst_171 = arith.constant 0.000000e+00 : f32
    %112 = vector.broadcast %cst_171 : f32 to vector<64x8xf32>
    %113 = arith.maximumf %111, %112 : vector<64x8xf32>
    %114 = vector.shape_cast %113 : vector<64x8xf32> to vector<1x8x8x8xf32>
    %c0_172 = arith.constant 0 : index
    %c0_173 = arith.constant 0 : index
    %c0_174 = arith.constant 0 : index
    %c0_175 = arith.constant 0 : index
    %115 = vector.load %arg7[%c0_172, %c0_173, %c0_174, %c0_175] : memref<1x8x8x8xf32, #tpu.memory_space<vmem>>, vector<1x8x8x8xf32>
    tpu.vector_store %arg7[%c0_172, %c0_173, %c0_174, %c0_175], %114 {strides = array<i32>} : memref<1x8x8x8xf32, #tpu.memory_space<vmem>>, vector<1x8x8x8xf32>,
    return
  }
  func.func @transform_0(%arg0: i32) -> (i32, i32, i32, i32) {
    %c0_i32 = arith.constant 0 : i32
    %c0_i32_0 = arith.constant 0 : i32
    %c0_i32_1 = arith.constant 0 : i32
    %c0_i32_2 = arith.constant 0 : i32
    return %arg0, %c0_i32, %c0_i32_0, %c0_i32_1 : i32, i32, i32, i32
  }
  func.func @transform_1(%arg0: i32) -> (i32, i32) {
    %c0_i32 = arith.constant 0 : i32
    %c0_i32_0 = arith.constant 0 : i32
    %c0_i32_1 = arith.constant 0 : i32
    return %c0_i32, %c0_i32_0 : i32, i32
  }
  func.func @transform_2(%arg0: i32) -> (i32, i32) {
    %c0_i32 = arith.constant 0 : i32
    %c0_i32_0 = arith.constant 0 : i32
    %c0_i32_1 = arith.constant 0 : i32
    return %c0_i32, %c0_i32_0 : i32, i32
  }
  func.func @transform_3(%arg0: i32) -> (i32, i32) {
    %c0_i32 = arith.constant 0 : i32
    %c0_i32_0 = arith.constant 0 : i32
    %c0_i32_1 = arith.constant 0 : i32
    return %c0_i32, %c0_i32_0 : i32, i32
  }
  func.func @transform_4(%arg0: i32) -> (i32, i32) {
    %c0_i32 = arith.constant 0 : i32
    %c0_i32_0 = arith.constant 0 : i32
    %c0_i32_1 = arith.constant 0 : i32
    return %c0_i32, %c0_i32_0 : i32, i32
  }
  func.func @transform_5(%arg0: i32) -> (i32, i32) {
    %c0_i32 = arith.constant 0 : i32
    %c0_i32_0 = arith.constant 0 : i32
    %c0_i32_1 = arith.constant 0 : i32
    return %c0_i32, %c0_i32_0 : i32, i32
  }
  func.func @transform_6(%arg0: i32) -> (i32, i32, i32, i32) {
    %c0_i32 = arith.constant 0 : i32
    %c0_i32_0 = arith.constant 0 : i32
    %c0_i32_1 = arith.constant 0 : i32
    %c0_i32_2 = arith.constant 0 : i32
    return %arg0, %c0_i32, %c0_i32_0, %c0_i32_1 : i32, i32, i32, i32
  }
}

</mosaic_0001>

<bundles_post_ra>
// kernel: tpu_custom_call.1
= control target key start
LH: loop header
LB: loop body
LE: loop exit
PB: predicated region body
PF: predicated region fallthrough
CT: control target
= control target key end

     0   :  { %11 = vsyncpa [#allocation4], 0  ;;  %s6793_s0 = inlined_call_operand.vmem [shape: bf16[2,9,9,16], index: 0, kind: input, shape index: {}]   ;;  %s6794_s1 = inlined_call_operand.vmem [shape: bf16[64,16], index: 1, kind: input, shape index: {}]   ;;  %s6795_s2 = inlined_call_operand.vmem [shape: bf16[72,8], index: 2, kind: input, shape index: {}]   ;;  %s6796_s3 = inlined_call_operand.vmem [shape: bf16[72,8], index: 3, kind: input, shape index: {}]   ;;  %s6797_s4 = inlined_call_operand.vmem [shape: bf16[72,8], index: 4, kind: input, shape index: {}]   ;;  %s6798_s5 = inlined_call_operand.vmem [shape: f32[5,8], index: 5, kind: input, shape index: {}]   ;;  %s6799_s6 = inlined_call_operand.hbm [shape: f32[2,8,8,8], index: 6, kind: output, shape index: {}]  }
   0x1   :  { %13 = vsyncpa [#allocation4 + $0x1], 0  ;;  %s4922_s21 = smov 0   ;;  %s4924_s22 = smov 0  }
   0x2   :  { %s4926_s23 = smov 0   ;;  %s4928_s24 = smov 0  }
   0x3 LB: > { %s4943_s25 = sadd.s32 4294967295, %s4873_s24   ;;  %s4272_s26 = sadd.s32 4294967294, %s4873_s24   ;;  %s4873_s24 = sphi %s4928_s24, %s6839_s24   ;;  %s4869_s23 = sphi %s4926_s23, %s6838_s23   ;;  %s4865_s22 = sphi %s4924_s22, %s6837_s22   ;;  %s4861_s21 = sphi %s4922_s21, %s6836_s21  }
   0x4   : > { %s4947_s27 = sadd.s32 1, %s4873_s24   ;;  %s157_s28 = sadd.s32 1, %s4869_s23 }
   0x5   : > { %s154_s29 = ssub.s32 %s4873_s24, %s4947_s27  ;;  %p167_p0 = scmp.ne.s32.totalorder %s4869_s23, %s4865_s22 }
   0x6   : > { %p155_p1 = scmp.eq.s32.totalorder %s154_s29, 0  ;;  %p168_p2 = scmp.eq.s32.totalorder %s4943_s25, 1 }
   0x7   : > { %p173_p3 = scmp.ne.s32.totalorder %s4865_s22, %s4861_s21  ;;  %p174_p4 = scmp.eq.s32.totalorder %s4272_s26, 1 }
   0x8   : > { %s4958_s30 = scalar_select %p155_p1, %s4869_s23, %s157_s28  }
   0x9   : > { %p4960_p5 = por %p168_p2, %p167_p0  ;;  %p4964_p6 = por %p174_p4, %p173_p3 }
   0xa   : > { %p4275_p7 = scmp.ge.s32.totalorder %s4873_s24, 1  ;;  %p215_p8 = scmp.lt.s32.totalorder %s4873_s24, 3 }
   0xc   : > { %p216_p9 = pnand %p4275_p7, %p215_p8 }
   0xe   : > { %219 = sbr.rel (%p216_p9) target bundleno = 1685 (0x695), region = 44 }
  0x15   : > { %p245_p10 = scmp.lt.s32.totalorder %s4943_s25, 1  ;;  %v4747_v0 = vld [vmem:[%s6794_s1] sm:$0xff]   ;;  %v4748_v1 = vld [vmem:[%s6794_s1 + $0x8] sm:$0xff]   ;;  %s4875_s18 = smov 32   ;;  %vm328_vm0 = vsmask.f32 3328 }
  0x16   : > { %4619 = vmatprep.subr.bf16.mxu0 %v4747_v0  ;;  %vm329_vm1 = vsmask.f32 7440  ;;  %v4750_v58 = vld [vmem:[%s6794_s1 + $0x10] sm:$0xff]   ;;  %s4876_s29 = smov 48   ;;  %vm253_vm3 = vcmask 57344   ;;  %vm660_vm8 = vcmask 130048  }
  0x17   : > { %s246_s9 = scalar_select %p245_p10, %s4943_s25, 1  ;;  %4620 = vmatpush3.bf16.msra.mxu0 %v4747_v0  ;;  %vm5047_vm2 = vmor %vm328_vm0, %vm329_vm1  ;;  %vm260_vm4 = vsmask.f32 256  ;;  %vm286_vm6 = vsmask.f32 7938  ;;  %vm673_vm9 = vcmask 261120  }
  0x18   : > { %4621 = vmatprep.subr.bf16.mxu0 %v4748_v1  ;;  %vm5149_vm5 = vmand %vm253_vm3, %vm260_vm4  ;;  %vm682_vm10 = vcmask 392192   ;;  %vm723_vm11 = vcmask 523264   ;;  %vm251_vm12 = vcmask 60416   ;;  %vm1149_vm13 = vcmask 1042432   ;;  %s4879_s12 = smov 24   ;;  %s4880_s13 = smov 40  }
  0x19   : > { %s4692_s14 = smul.u32 72, %s246_s9  ;;  %s4877_s9 = smov 16   ;;  %vm5157_vm7 = vmand %vm253_vm3, %vm286_vm6  ;;  %vm1150_vm14 = vcmask 1046532   ;;  %vm1871_vm1 = vcmask 1043456   ;;  %vm1770_vm4 = vcmask 195584  }
  0x1a   : > { %vm5248_vm15 = vmand %vm251_vm12, %vm286_vm6  ;;  %s4881_s16 = smov 64   ;;  %s4882_s28 = smov 8   ;;  %vm1787_vm6 = vcmask 326656  }
  0x1b   : > { %s4981_s17 = scalar_lea.vmem %s6793_s0, %s4692_s14  ;;  %4622 = vmatpush3.bf16.msra.mxu0 %v4748_v1  ;;  %vm5287_vm0 = vmor %vm1149_vm13, %vm1150_vm14  ;;  %s4883_s14 = smov 56  }
  0x1c   : > { %v4278_v2 = vld [vmem:[%s4981_s17 + $0x8] sm:$0xf]  ;;  %v4279_v3 = vld [vmem:[%s4981_s17 + $0x10] sm:$0xf]  ;;  %v4280_v4 = vld [vmem:[%s4981_s17 + $0x18] sm:$0xf]  ;;  %4623 = vmatprep.subr.bf16.mxu0 %v4750_v58 }
  0x1d   : > { %v475_v5 = vshrl.u32 %v4279_v3, 16  ;;  %v478_v6 = vshll.u32 %v4279_v3, 16  ;;  %v4302_v7 = vcombine.low %v4278_v2, %v4279_v3  ;;  %v461_v8 = vshrl.u32 %v4278_v2, 16  ;;  %v4281_v9 = vld [vmem:[%s4981_s17 + $0x20] sm:$0xf]  ;;  %s4884_s26 = smov 120  }
  0x1e   : > { %v464_v10 = vshll.u32 %v4278_v2, 16  ;;  %v489_v11 = vshrl.u32 %v4280_v4, 16  ;;  %v492_v12 = vshll.u32 %v4280_v4, 16  ;;  %v503_v13 = vshrl.u32 %v4281_v9, 16  ;;  %v4282_v14 = vld [vmem:[%s4981_s17 + $0x28] sm:$0xf] }
  0x1f   : > { %v477_v15 = vrot.slane %v475_v5, 4  ;;  %v480_v16 = vrot.slane %v478_v6, 5  ;;  %632 = vrot.lane.b32.xlu1 %v4302_v7, %s4875_s18  ;;  %v463_v17 = vrot.slane %v461_v8, 4  ;;  %v506_v18 = vshll.u32 %v4281_v9, 16  ;;  %v4283_v19 = vld [vmem:[%s4981_s17 + $0x30] sm:$0xf]  ;;  %4624 = vmatpush3.bf16.msra.mxu0 %v4750_v58 }
  0x20   : > { %v466_v20 = vrot.slane %v464_v10, 5  ;;  %v4990_v21 = vrot.slane %v489_v11, 4  ;;  %v4992_v22 = vrot.slane %v492_v12, 5  ;;  %v4994_v24 = vrot.slane %v503_v13, 4  ;;  %v4284_v31 = vld [vmem:[%s4981_s17 + $0x38] sm:$0xf] }
  0x21   : > { %v481_v23 = vor.u32 %v480_v16, %v477_v15  ;;  %v4303_v25 = vcombine.low %v4280_v4, %v4281_v9  ;;  %v531_v26 = vshrl.u32 %v4283_v19, 16  ;;  %v534_v28 = vshll.u32 %v4283_v19, 16  ;;  %v4285_v32 = vld [vmem:[%s4981_s17 + $0x40] sm:$0xf]  ;;  %v5008_v42 = vld [vmem:[%s4981_s17 + $0x8] sm:$0xf] }
  0x22   : > { %v467_v27 = vor.u32 %v466_v20, %v463_v17  ;;  %v4304_v29 = vcombine.low %v4282_v14, %v4283_v19  ;;  %v517_v30 = vshrl.u32 %v4282_v14, 16  ;;  %v508_v33 = vrot.slane %v506_v18, 5  ;;  %v5000_v37 = vld [vmem:[%s4981_s17] sm:$0xf]  ;;  %v320_v47 = vld [vmem:[%s4981_s17 + $0x4] sm:$0x1] }
  0x23   : > { %634 = vrot.lane.b32.xlu1 %v4303_v25, %s4875_s18  ;;  %v533_v34 = vrot.slane %v531_v26, 4  ;;  %v520_v35 = vshll.u32 %v4282_v14, 16  ;;  %v545_v36 = vshrl.u32 %v4284_v31, 16  ;;  %v5002_v38 = vrot.slane %v481_v23, 4  ;;  %v321_v51 = vld [vmem:[%s4981_s17 + $0xc] sm:$0x1] }
  0x24   : > { %v536_v39 = vrot.slane %v534_v28, 5  ;;  %636 = vrot.lane.b32.xlu0 %v4304_v29, %s4875_s18  ;;  %v5005_v40 = vrot.slane %v517_v30, 4  ;;  %v548_v41 = vshll.u32 %v4284_v31, 16  ;;  %v5010_v43 = vrot.slane %v467_v27, 4  ;;  %v4288_v57 = vld [vmem:[%s4981_s17 + $0x1c] sm:$0x1] }
  0x25   : > { %v5012_v44 = vrot.slane %v520_v35, 5  ;;  %v559_v45 = vshrl.u32 %v4285_v32, 16  ;;  %v562_v46 = vshll.u32 %v4285_v32, 16  ;;  %v5015_v49 = vrot.slane %v545_v36, 4  ;;  %v4289_v63 = vld [vmem:[%s4981_s17 + $0x24] sm:$0x1] }
  0x26   : > { %v537_v48 = vor.u32 %v536_v39, %v533_v34  ;;  %v4305_v50 = vcombine.low %v4284_v31, %v4285_v32  ;;  %v332_v52 = vshrl.u32 %v5000_v37, 16  ;;  %v5021_v54 = vrot.slane %v548_v41, 5  ;;  %v5039_v4 = vld [vmem:[%s4981_s17 + $0x10] sm:$0xf]  ;;  %v322_v13 = vld [vmem:[%s4981_s17 + $0x14] sm:$0x1] }
  0x27   : > { %v523_v53 = vor.u32 %v5012_v44, %v5005_v40  ;;  %v5023_v55 = vrot.slane %v559_v45, 4  ;;  %v335_v56 = vshll.u32 %v5000_v37, 16  ;;  %v5030_v59 = vrot.slane %v562_v46, 5  ;;  %v5052_v18 = vld [vmem:[%s4981_s17 + $0x18] sm:$0xf]  ;;  %s4583_s11 = sshll.u32 %s4943_s25, 10 }
  0x28   : > { %638 = vrot.lane.b32.xlu1 %v4305_v50, %s4875_s18  ;;  %v334_v60 = vrot.slane %v332_v52, 4  ;;  %v341_v61 = vshll.u32 %v320_v47, 16  ;;  %v346_v62 = vshrl.u32 %v5008_v42, 16  ;;  %v5035_v0 = vrot.slane %v537_v48, 4  ;;  %v323_v23 = vld [vmem:[%s4981_s17 + $0x1c] sm:$0x1]  ;;  %s6742_s19 = scalar_lea.hbm %s6799_s6, %s4583_s11 }
  0x29   : > { %v337_v1 = vrot.slane %v335_v56, 5  ;;  %v349_v2 = vshll.u32 %v5008_v42, 16  ;;  %v355_v3 = vshll.u32 %v321_v51, 16  ;;  %v495_v7 = vor.u32 %v4992_v22, %v4990_v21  ;;  %v5060_v29 = vld [vmem:[%s4981_s17 + $0x30] sm:$0xf]  ;;  %v4752_v35 = vld [vmem:[%s6794_s1 + $0x18] sm:$0xff]  }
  0x2a   : > { %v343_v5 = vrot.slane %v341_v61, 5  ;;  %v348_v6 = vrot.slane %v346_v62, 4  ;;  %v498_v8 = vshll.u32 %v4288_v57, 16  ;;  %v509_v12 = vor.u32 %v508_v33, %v4994_v24  ;;  %v5066_v34 = vld [vmem:[%s4981_s17 + $0x38] sm:$0xf]  ;;  %4625 = vmatprep.subr.bf16.mxu0 %v4752_v35 }
  0x2b   : > { %v338_v9 = vor.u32 %v337_v1, %v334_v60  ;;  %v351_v10 = vrot.slane %v349_v2, 5  ;;  %v357_v11 = vrot.slane %v355_v3, 5  ;;  %v496_v15 = vrot.slane %v495_v7, 4  ;;  %v326_v46 = vld [vmem:[%s4981_s17 + $0x34] sm:$0x1]  ;;  %4626 = vmatpush3.bf16.msra.mxu0 %v4752_v35 }
  0x2c   : > { %v500_v16 = vrot.slane %v498_v8, 5  ;;  %v512_v17 = vshll.u32 %v4289_v63, 16  ;;  %v360_v19 = vshrl.u32 %v5039_v4, 16  ;;  %v510_v22 = vrot.slane %v509_v12, 4  ;;  %v327_v52 = vld [vmem:[%s4981_s17 + $0x3c] sm:$0x1] }
  0x2d   : > { %v339_v20 = vrot.slane %v338_v9, 4  ;;  %v352_v21 = vor.u32 %v351_v10, %v348_v6  ;;  %v363_v24 = vshll.u32 %v5039_v4, 16  ;;  %v369_v28 = vshll.u32 %v322_v13, 16  ;;  %v4286_v61 = vld [vmem:[%s4981_s17 + $0xc] sm:$0x1] }
  0x2e   : > { %v501_v25 = vsel %vm5047_vm2, %v496_v15, %v500_v16  ;;  %v514_v26 = vrot.slane %v512_v17, 5  ;;  %v362_v27 = vrot.slane %v360_v19, 4  ;;  %v374_v33 = vshrl.u32 %v5052_v18, 16  ;;  %v4287_v3 = vld [vmem:[%s4981_s17 + $0x14] sm:$0x1] }
  0x2f   : > { %v344_v30 = vsel %vm5047_vm2, %v339_v20, %v343_v5  ;;  %v353_v31 = vrot.slane %v352_v21, 4  ;;  %v365_v32 = vrot.slane %v363_v24, 5  ;;  %v371_v39 = vrot.slane %v369_v28, 5  ;;  %v4292_v9 = vld [vmem:[%s4981_s17 + $0x3c] sm:$0x1] }
  0x30   : > { %v515_v36 = vsel %vm5047_vm2, %v510_v22, %v514_v26  ;;  %v377_v41 = vshll.u32 %v5052_v18, 16  ;;  %v383_v45 = vshll.u32 %v323_v23, 16  ;;  %v376_v51 = vrot.slane %v374_v33, 4  ;;  %v4293_v20 = vld [vmem:[%s4981_s17 + $0x44] sm:$0x1] }
  0x31   : > { %v358_v47 = vsel %vm5047_vm2, %v353_v31, %v357_v11  ;;  %v4307_v48 = vcombine.low %v501_v25, %v515_v36  ;;  %v366_v50 = vor.u32 %v365_v32, %v362_v27  ;;  %v416_v60 = vshrl.u32 %v5060_v29, 16  ;;  %v5091_v21 = vld [vmem:[%s4981_s17 + $0x20] sm:$0xf]  ;;  %v324_v31 = vld [vmem:[%s4981_s17 + $0x24] sm:$0x1] }
  0x32   : > { %v4298_v56 = vcombine.low %v344_v30, %v358_v47  ;;  %v379_v57 = vrot.slane %v377_v41, 5  ;;  %v385_v58 = vrot.slane %v383_v45, 5  ;;  %v419_v63 = vshll.u32 %v5060_v29, 16  ;;  %v325_v41 = vld [vmem:[%s4981_s17 + $0x2c] sm:$0x1] }
  0x33   : > { %654 = vrot.lane.b32.xlu1 %v4307_v48, %s4876_s29  ;;  %v367_v62 = vrot.slane %v366_v50, 4  ;;  %v425_v1 = vshll.u32 %v326_v46, 16  ;;  %v430_v2 = vshrl.u32 %v5066_v34, 16  ;;  %v418_v6 = vrot.slane %v416_v60, 4  ;;  %v4290_v47 = vld [vmem:[%s4981_s17 + $0x2c] sm:$0x1] }
  0x34   : > { %604 = vrot.lane.b32.xlu0 %v4298_v56, %s4877_s9  ;;  %v380_v5 = vor.u32 %v379_v57, %v376_v51  ;;  %v433_v7 = vshll.u32 %v5066_v34, 16  ;;  %v439_v8 = vshll.u32 %v327_v52, 16  ;;  %v421_v11 = vrot.slane %v419_v63, 5  ;;  %v4291_v48 = vld [vmem:[%s4981_s17 + $0x34] sm:$0x1] }
  0x35   : > { %v372_v10 = vsel %vm5047_vm2, %v367_v62, %v371_v39  ;;  %v427_v12 = vrot.slane %v425_v1, 5  ;;  %v432_v13 = vrot.slane %v430_v2, 4  ;;  %v470_v19 = vshll.u32 %v4286_v61, 16  ;;  %v5101_v39 = vld [vmem:[%s4981_s17 + $0x28] sm:$0xf] }
  0x36   : > { %v381_v15 = vrot.slane %v380_v5, 4  ;;  %v435_v16 = vrot.slane %v433_v7, 5  ;;  %v441_v17 = vrot.slane %v439_v8, 5  ;;  %v422_v22 = vor.u32 %v421_v11, %v418_v6 }
  0x37   : > { %v484_v23 = vshll.u32 %v4287_v3, 16  ;;  %v551_v24 = vor.u32 %v5021_v54, %v5015_v49  ;;  %v554_v25 = vshll.u32 %v4292_v9, 16  ;;  %v472_v28 = vrot.slane %v470_v19, 5 }
  0x38   : > { %v386_v26 = vsel %vm5047_vm2, %v381_v15, %v385_v58  ;;  %v436_v27 = vor.u32 %v435_v16, %v432_v13  ;;  %v565_v30 = vor.u32 %v5030_v59, %v5023_v55  ;;  %v423_v33 = vrot.slane %v422_v22, 4 }
  0x39   : > { %v4299_v32 = vcombine.low %v372_v10, %v386_v26  ;;  %v486_v35 = vrot.slane %v484_v23, 5  ;;  %v552_v36 = vrot.slane %v551_v24, 4  ;;  %v473_v54 = vsel %vm5047_vm2, %v5010_v43, %v472_v28  ;;  %v268_v24 = vld [vmem:[#allocation2 + $0x18] sm:$0x1] }
  0x3a   : > { %v437_v49 = vrot.slane %v436_v27, 4  ;;  %v556_v45 = vrot.slane %v554_v25, 5  ;;  %v566_v46 = vrot.slane %v565_v30, 4  ;;  %v428_v55 = vsel %vm5047_vm2, %v423_v33, %v427_v12 }
  0x3b   : > { %606 = vrot.lane.b32.xlu0 %v4299_v32, %s4877_s9  ;;  %v487_v59 = vsel %vm5047_vm2, %v5002_v38, %v486_v35  ;;  %v568_v50 = vshll.u32 %v4293_v20, 16  ;;  %v388_v51 = vshrl.u32 %v5091_v21, 16  ;;  %v391_v57 = vshll.u32 %v5091_v21, 16 }
  0x3c   : > { %v442_v52 = vsel %vm5047_vm2, %v437_v49, %v441_v17  ;;  %v4306_v43 = vcombine.low %v473_v54, %v487_v59  ;;  %v557_v56 = vsel %vm5047_vm2, %v552_v36, %v556_v45  ;;  %v397_v62 = vshll.u32 %v324_v31, 16 }
  0x3d   : > { %v4301_v58 = vcombine.low %v428_v55, %v442_v52  ;;  %v570_v60 = vrot.slane %v568_v50, 5  ;;  %v390_v61 = vrot.slane %v388_v51, 4  ;;  %v393_v63 = vrot.slane %v391_v57, 5 }
  0x3e   : > { %v402_v1 = vshrl.u32 %v5101_v39, 16  ;;  %v405_v38 = vshll.u32 %v5101_v39, 16  ;;  %v411_v2 = vshll.u32 %v325_v41, 16  ;;  %v399_v5 = vrot.slane %v397_v62, 5 }
  0x3f   : > { %610 = vrot.lane.b32.xlu1 %v4301_v58, %s4877_s9  ;;  %652 = vrot.lane.b32.xlu0 %v4306_v43, %s4876_s29  ;;  %v571_v3 = vsel %vm5047_vm2, %v566_v46, %v570_v60  ;;  %v526_v6 = vshll.u32 %v4290_v47, 16  ;;  %v540_v7 = vshll.u32 %v4291_v48, 16  ;;  %v394_v9 = vor.u32 %v393_v63, %v390_v61  ;;  %v262_v58 = vld [vmem:[#allocation2 + $0x8] sm:$0x1]  ;;  %v288_v60 = vld [vmem:[#allocation2 + $0xc] sm:$0x1] }
  0x40   : > { %v4309_v8 = vcombine.low %v557_v56, %v571_v3  ;;  %v404_v10 = vrot.slane %v402_v1, 4  ;;  %v407_v11 = vrot.slane %v405_v38, 5  ;;  %v524_v12 = vrot.slane %v523_v53, 4  ;;  %v271_v63 = vld [vmem:[#allocation2 + $0x20] sm:$0x1] }
  0x41   : > { %v413_v13 = vrot.slane %v411_v2, 5  ;;  %v528_v15 = vrot.slane %v526_v6, 5  ;;  %v4294_v16 = vcombine.low %v5000_v37, %v5008_v42  ;;  %v395_v17 = vrot.slane %v394_v9, 4  ;;  %v294_v37 = vld [vmem:[#allocation2 + $0x1c] sm:$0x1] }
  0x42   : > { %v408_v19 = vor.u32 %v407_v11, %v404_v10  ;;  %v542_v20 = vrot.slane %v540_v7, 5  ;;  %v4295_v22 = vcombine.low %v5039_v4, %v5052_v18  ;;  %v4297_v23 = vcombine.low %v5060_v29, %v5066_v34  ;;  %v297_v38 = vld [vmem:[#allocation2 + $0x24] sm:$0x1]  ;;  %v265_v2 = vld [vmem:[#allocation2 + $0x10] sm:$0x1] }
  0x43   : > { %658 = vrot.lane.b32.xlu1 %v4309_v8, %s4876_s29  ;;  %v400_v40 = vsel %vm5047_vm2, %v395_v17, %v399_v5  ;;  %v4296_v53 = vcombine.low %v5091_v21, %v5101_v39  ;;  %v529_v4 = vsel %vm5047_vm2, %v524_v12, %v528_v15  ;;  %v6806_v29 = vmov 0  ;;  %v291_v6 = vld [vmem:[#allocation2 + $0x14] sm:$0x1]  ;;  %v280_v8 = vld [vmem:[#allocation2 + $0x38] sm:$0x1] }
  0x44   : > { %v409_v44 = vrot.slane %v408_v19, 4  ;;  %v543_v18 = vsel %vm5047_vm2, %v5035_v0, %v542_v20  ;;  %v6807_v29 = vsel %vm5149_vm5, 4294967295, %v6806_v29  ;;  %v269_v21 = vsel %vm5149_vm5, 0, %v268_v24  ;;  %v306_v9 = vld [vmem:[#allocation2 + $0x3c] sm:$0x1] }
  0x45   : > { %6808 = vst [vmem:[#allocation6_spill] sm:$0xff] %v6807_v29  ;;  %270 = vst [vmem:[#allocation2 + $0x18] sm:$0x1] %v269_v21  ;;  %v295_v0 = vsel %vm5157_vm7, 0, %v294_v37  ;;  %v4308_v26 = vcombine.low %v529_v4, %v543_v18  ;;  %v263_v61 = vsel %vm5149_vm5, 0, %v262_v58  ;;  %v289_v62 = vsel %vm5157_vm7, 0, %v288_v60 }
  0x46   : > { %v414_v42 = vsel %vm5047_vm2, %v409_v44, %v413_v13  ;;  %296 = vst [vmem:[#allocation2 + $0x1c] sm:$0x1] %v295_v0  ;;  %264 = vst [vmem:[#allocation2 + $0x8] sm:$0x1] %v263_v61  ;;  %v272_v1 = vsel %vm5149_vm5, 0, %v271_v63  ;;  %v298_v3 = vsel %vm5157_vm7, 0, %v297_v38 }
  0x47   : > { %v4300_v34 = vcombine.low %v400_v40, %v414_v42  ;;  %290 = vst [vmem:[#allocation2 + $0xc] sm:$0x1] %v289_v62  ;;  %273 = vst [vmem:[#allocation2 + $0x20] sm:$0x1] %v272_v1  ;;  %v266_v5 = vsel %vm5149_vm5, 0, %v265_v2  ;;  %v292_v7 = vsel %vm5157_vm7, 0, %v291_v6 }
  0x48   : > { %299 = vst [vmem:[#allocation2 + $0x24] sm:$0x1] %v298_v3  ;;  %267 = vst [vmem:[#allocation2 + $0x10] sm:$0x1] %v266_v5  ;;  %v281_v10 = vsel %vm5149_vm5, 0, %v280_v8  ;;  %v307_v11 = vsel %vm5157_vm7, 0, %v306_v9 }
  0x49   : > { %608 = vrot.lane.b32.xlu0 %v4300_v34, %s4877_s9  ;;  %293 = vst [vmem:[#allocation2 + $0x14] sm:$0x1] %v292_v7  ;;  %v274_v12 = vld [vmem:[#allocation2 + $0x28] sm:$0x1]  ;;  %v300_v13 = vld [vmem:[#allocation2 + $0x2c] sm:$0x1] }
  0x4a   : > { %282 = vst [vmem:[#allocation2 + $0x38] sm:$0x1] %v281_v10  ;;  %308 = vst [vmem:[#allocation2 + $0x3c] sm:$0x1] %v307_v11  ;;  %v275_v15 = vsel %vm5149_vm5, 0, %v274_v12 }
  0x4b   : > { %276 = vst [vmem:[#allocation2 + $0x28] sm:$0x1] %v275_v15  ;;  %v283_v17 = vld [vmem:[#allocation2 + $0x40] sm:$0x1]  ;;  %v309_v19 = vld [vmem:[#allocation2 + $0x44] sm:$0x1] }
  0x4c   : > { %v284_v20 = vsel %vm5149_vm5, 0, %v283_v17  ;;  %v303_v24 = vld [vmem:[#allocation2 + $0x34] sm:$0x1]  ;;  %v5216_v42 = vld [vmem:[%s6798_s5] ss:$0 sm:$0xff] }
  0x4d   : > { %656 = vrot.lane.b32.xlu0 %v4308_v26, %s4876_s29  ;;  %285 = vst [vmem:[#allocation2 + $0x40] sm:$0x1] %v284_v20  ;;  %v304_v44 = vsel %vm5157_vm7, 0, %v303_v24 }
  0x4e   : > { %305 = vst [vmem:[#allocation2 + $0x34] sm:$0x1] %v304_v44  ;;  %v952_v1 = vld [vmem:[#allocation2 + $0xc] sm:$0x1]  ;;  %v967_v8 = vld [vmem:[#allocation2 + $0x20] sm:$0xf] }
  0x4f   : > { %v970_v11 = vld [vmem:[#allocation2 + $0x24] sm:$0x1]  ;;  %v955_v20 = vld [vmem:[#allocation2 + $0x10] sm:$0xf] }
  0x91   : > { %v633_v27 = vpop.permute.xlu1 %632 }
  0x95   : > { %v635_v30 = vpop.permute.xlu1 %634 }
  0x96   : > { %v637_v28 = vpop.permute.xlu0 %636 }
  0x9a   : > { %v639_v32 = vpop.permute.xlu1 %638 }
  0xa5   : > { %v655_v54 = vpop.permute.xlu1 %654 }
  0xa6   : > { %v605_v31 = vpop.permute.xlu0 %604 }
  0xa7   : > { %v663_v35 = vsel %vm660_vm8, %v4294_v16, %v605_v31  ;;  %v301_v16 = vsel %vm5157_vm7, 0, %v300_v13 }
  0xa8   : > { %v675_v49 = vsel %vm673_vm9, %v663_v35, %v633_v27  ;;  %302 = vst [vmem:[#allocation2 + $0x2c] sm:$0x1] %v301_v16 }
  0xad   : > { %v607_v33 = vpop.permute.xlu0 %606 }
  0xae   : > { %v666_v36 = vsel %vm660_vm8, %v4295_v22, %v607_v33  ;;  %v310_v22 = vsel %vm5157_vm7, 0, %v309_v19  ;;  %vm1804_vm7 = vcmask 457728  }
  0xaf   : > { %v677_v39 = vsel %vm673_vm9, %v666_v36, %v635_v30  ;;  %311 = vst [vmem:[#allocation2 + $0x44] sm:$0x1] %v310_v22  ;;  %v958_v22 = vld [vmem:[#allocation2 + $0x14] sm:$0x1] }
  0xb0   : > { %v686_v46 = vsel %vm682_vm10, %v677_v39, %v655_v54 }
  0xb1   : > { %v653_v41 = vpop.permute.xlu0 %652  ;;  %v611_v47 = vpop.permute.xlu1 %610 }
  0xb2   : > { %v684_v45 = vsel %vm682_vm10, %v675_v49, %v653_v41  ;;  %v672_v59 = vsel %vm660_vm8, %v4297_v23, %v611_v47  ;;  %v277_v23 = vld [vmem:[#allocation2 + $0x30] sm:$0x1] }
  0xb3   : > { %4627 = vmatprep.mubr.msk.bf16.mxu0 %vm723_vm11, %v684_v45  ;;  %v681_v43 = vsel %vm673_vm9, %v672_v59, %v639_v32  ;;  %v278_v40 = vsel %vm5149_vm5, 0, %v277_v23  ;;  %v964_v59 = vld [vmem:[#allocation2 + $0x1c] sm:$0x1] }
  0xb4   : > { %4628 = vmatmul.mubr.msk.bf16.vlgmr.msra.gmra.mrb[0].mxu0 %vm723_vm11, %v686_v46  ;;  %279 = vst [vmem:[#allocation2 + $0x30] sm:$0x1] %v278_v40 }
  0xb5   : > { %v659_v50 = vpop.permute.xlu1 %658 }
  0xb6   : > { %v690_v57 = vsel %vm682_vm10, %v681_v43, %v659_v50 }
  0xbb   : > { %v609_v48 = vpop.permute.xlu0 %608 }
  0xbc   : > { %v669_v55 = vsel %vm660_vm8, %v4296_v53, %v609_v48  ;;  %v4878_v53 = vmov 0  }
  0xbd   : > { %v679_v51 = vsel %vm673_vm9, %v669_v55, %v637_v28  ;;  %252 = vst.msk [vmem:[#allocation2] sm:$0xf] %vm251_vm12, %v4878_v53  ;;  %256 = vst.msk [vmem:[#allocation2 + $0x48] sm:$0xf] %vm251_vm12, %v4878_v53  ;;  %v961_v55 = vld [vmem:[#allocation2 + $0x18] sm:$0xf] }
  0xbe   : > { %254 = vst.msk [vmem:[#allocation2 + $0x4] sm:$0x1] %vm253_vm3, %v4878_v53  ;;  %257 = vst.msk [vmem:[#allocation2 + $0x4c] sm:$0x1] %vm253_vm3, %v4878_v53  ;;  %vm1749_vm3 = vcmask 64512   ;;  %vm1862_vm12 = vcmask 588800  }
  0xbf   : > { %v657_v52 = vpop.permute.xlu0 %656 }
  0xc0   : > { %v688_v56 = vsel %vm682_vm10, %v679_v51, %v657_v52 }
  0xc1   : > { %4631 = vmatprep.mubr.msk.bf16.mxu0 %vm723_vm11, %v688_v56 }
  0xc2   : > { %4632 = vmatmul.mubr.msk.bf16.gmra.mrb[4].mxu0 %vm723_vm11, %v690_v57  ;;  %v949_v57 = vld [vmem:[#allocation2 + $0x8] sm:$0xf] }
  0xc4   : > { %v997_v37 = vld [vmem:[#allocation2] sm:$0xf]  ;;  %v5228_v27 = vld [vmem:[#allocation2 + $0x48] sm:$0xf] }
  0xc5   : > { %v1014_v18 = vshrl.u32 %v997_v37, 16  ;;  %v1017_v34 = vshll.u32 %v997_v37, 16  ;;  %v1484_v49 = vshrl.u32 %v5228_v27, 16  ;;  %v1487_v46 = vshll.u32 %v5228_v27, 16  ;;  %v1005_v37 = vld [vmem:[#allocation2 + $0x4] sm:$0x1] }
  0xc7   : > { %v5236_v35 = vrot.slane %v1014_v18, 4  ;;  %v5238_v36 = vrot.slane %v1017_v34, 5  ;;  %v5244_v60 = vrot.slane %v1484_v49, 4  ;;  %v1489_v2 = vrot.slane %v1487_v46, 5 }
  0xc9   : > { %v1020_v52 = vor.u32 %v5238_v36, %v5236_v35 }
 0x187   : > { %v5218_v4 = vpop.f32.mrb[0].mxu0 }
 0x188   : > { %v804_v21 = vadd.f32 %v5218_v4, %v5216_v42  ;;  %v5222_v25 = vpop.f32.mrb[1].mxu0 }
 0x189   : > { %v802_v0 = vadd.f32 %v5216_v42, %v5222_v25  ;;  %v5226_v26 = vpop.f32.mrb[2].mxu0 }
 0x18a   : > { %v812_v28 = vmax.f32 %v804_v21, 0.0  ;;  %v805_v30 = vadd.f32 %v5226_v26, %v5216_v42  ;;  %v5232_v31 = vpop.f32.mrb[3].mxu0 }
 0x18b   : > { %v810_v32 = vmax.f32 %v802_v0, 0.0  ;;  %v803_v33 = vadd.f32 %v5216_v42, %v5232_v31 }
 0x18c   : > { %v4561_v39 = vpack.c.bf16 %v812_v28, %v812_v28  ;;  %v813_v41 = vmax.f32 %v805_v30, 0.0  ;;  %v1125_v28 = vld [vmem:[#allocation2] sm:$0xe]  ;;  %v1023_v30 = vshll.u32 %v1005_v37, 16 }
 0x18d   : > { %v4559_v54 = vpack.c.bf16 %v810_v32, %v810_v32  ;;  %v811_v45 = vmax.f32 %v803_v33, 0.0 }
 0x18e   : > { %v884_v47 = vshrl.u32 %v4561_v39, 16  ;;  %v4562_v48 = vpack.c.bf16 %v813_v41, %v813_v41  ;;  %v887_v56 = vshll.u32 %v4561_v39, 16  ;;  %v1490_v39 = vor.u32 %v1489_v2, %v5244_v60 }
 0x18f   : > { %v868_v50 = vshrl.u32 %v4559_v54, 16  ;;  %v4560_v51 = vpack.c.bf16 %v811_v45, %v811_v45  ;;  %v871_v63 = vshll.u32 %v4559_v54, 16 }
 0x190   : > { %v886_v43 = vrot.slane %v884_v47, 7  ;;  %v892_v58 = vshrl.u32 %v4562_v48, 16  ;;  %v895_v7 = vshll.u32 %v4562_v48, 16  ;;  %v4328_v47 = vrot.slane %v1125_v28, 9  ;;  %v979_v28 = vld [vmem:[#allocation2 + $0x30] sm:$0xf] }
 0x191   : > { %v870_v62 = vrot.slane %v868_v50, 7  ;;  %v876_v38 = vshrl.u32 %v4560_v51, 16  ;;  %v879_v13 = vshll.u32 %v4560_v51, 16  ;;  %v1154_v48 = vrot.slane %v1005_v37, 5 }
 0x192   : > { %v889_v3 = vor.u32 %v887_v56, %v886_v43  ;;  %v890_v5 = vrot.slane %v886_v43, 4  ;;  %v894_v6 = vrot.slane %v892_v58, 7  ;;  %v5291_v51 = vrot.slane %v1020_v52, 4  ;;  %v5295_v56 = vld [vmem:[#allocation2 + $0x4c] sm:$0x1] }
 0x193   : > { %v873_v9 = vor.u32 %v871_v63, %v870_v62  ;;  %v874_v10 = vrot.slane %v870_v62, 4  ;;  %v878_v12 = vrot.slane %v876_v38, 7  ;;  %v5293_v43 = vrot.slane %v1023_v30, 5  ;;  %v988_v52 = vld [vmem:[#allocation2 + $0x3c] sm:$0x1] }
 0x194   : > { %v962_v15 = vsel %vm5248_vm15, %v889_v3, %v961_v55  ;;  %v965_v16 = vsel %vm5149_vm5, %v890_v5, %v964_v59  ;;  %v897_v17 = vor.u32 %v895_v7, %v894_v6  ;;  %v898_v19 = vrot.slane %v894_v6, 4  ;;  %v985_v3 = vld [vmem:[#allocation2 + $0x38] sm:$0xf]  ;;  %v982_v30 = vld [vmem:[#allocation2 + $0x34] sm:$0x1] }
 0x195   : > { %963 = vst [vmem:[#allocation2 + $0x18] sm:$0xf] %v962_v15  ;;  %966 = vst [vmem:[#allocation2 + $0x1c] sm:$0x1] %v965_v16  ;;  %v950_v23 = vsel %vm5248_vm15, %v873_v9, %v949_v57  ;;  %v953_v24 = vsel %vm5149_vm5, %v874_v10, %v952_v1  ;;  %v881_v40 = vor.u32 %v879_v13, %v878_v12  ;;  %v882_v44 = vrot.slane %v878_v12, 4  ;;  %v5260_v53 = vpop.f32.mrb[4].mxu0 }
 0x196   : > { %951 = vst [vmem:[#allocation2 + $0x8] sm:$0xf] %v950_v23  ;;  %954 = vst [vmem:[#allocation2 + $0xc] sm:$0x1] %v953_v24  ;;  %v968_v18 = vsel %vm5248_vm15, %v897_v17, %v967_v8  ;;  %v971_v34 = vsel %vm5149_vm5, %v898_v19, %v970_v11  ;;  %v808_v21 = vadd.f32 %v5260_v53, %v5216_v42  ;;  %v5268_v0 = vpop.f32.mrb[5].mxu0  ;;  %v5297_v60 = vrot.slane %v1490_v39, 4 }
 0x197   : > { %969 = vst [vmem:[#allocation2 + $0x20] sm:$0xf] %v968_v18  ;;  %972 = vst [vmem:[#allocation2 + $0x24] sm:$0x1] %v971_v34  ;;  %v956_v32 = vsel %vm5248_vm15, %v881_v40, %v955_v20  ;;  %v959_v33 = vsel %vm5149_vm5, %v882_v44, %v958_v22  ;;  %v806_v35 = vadd.f32 %v5216_v42, %v5268_v0  ;;  %v5276_v36 = vpop.f32.mrb[6].mxu0 }
 0x198   : > { %957 = vst [vmem:[#allocation2 + $0x10] sm:$0xf] %v956_v32  ;;  %960 = vst [vmem:[#allocation2 + $0x14] sm:$0x1] %v959_v33  ;;  %v816_v41 = vmax.f32 %v808_v21, 0.0  ;;  %v809_v49 = vadd.f32 %v5276_v36, %v5216_v42  ;;  %v5281_v54 = vpop.f32.mrb[7].mxu0  ;;  %v5310_v10 = vsel %vm5287_vm0, %v4328_v47, %v1154_v48 }
 0x199   : > { %v814_v45 = vmax.f32 %v806_v35, 0.0  ;;  %v807_v46 = vadd.f32 %v5216_v42, %v5281_v54  ;;  %v1493_v42 = vshll.u32 %v5295_v56, 16  ;;  %v973_v12 = vld [vmem:[#allocation2 + $0x28] sm:$0xf]  ;;  %v976_v13 = vld [vmem:[#allocation2 + $0x2c] sm:$0x1] }
 0x19a   : > { %v4565_v55 = vpack.c.bf16 %v816_v41, %v816_v41  ;;  %v817_v59 = vmax.f32 %v809_v49, 0.0  ;;  %v991_v22 = vld [vmem:[#allocation2 + $0x40] sm:$0xf]  ;;  %v994_v23 = vld [vmem:[#allocation2 + $0x44] sm:$0x1] }
 0x19b   : > { %v4563_v57 = vpack.c.bf16 %v814_v45, %v814_v45  ;;  %v815_v58 = vmax.f32 %v807_v46, 0.0 }
 0x19c   : > { %v916_v62 = vshrl.u32 %v4565_v55, 16  ;;  %v919_v63 = vshll.u32 %v4565_v55, 16  ;;  %v4566_v1 = vpack.c.bf16 %v817_v59, %v817_v59  ;;  %v5300_v38 = vld [vmem:[#allocation2 + $0x18] sm:$0xf]  ;;  %v5302_v2 = vld [vmem:[#allocation2 + $0x1c] sm:$0x1] }
 0x19d   : > { %v900_v5 = vshrl.u32 %v4563_v57, 16  ;;  %v903_v6 = vshll.u32 %v4563_v57, 16  ;;  %v4564_v7 = vpack.c.bf16 %v815_v58, %v815_v58  ;;  %v5304_v8 = vld [vmem:[#allocation2 + $0x8] sm:$0xf]  ;;  %v5306_v9 = vld [vmem:[#allocation2 + $0x18] sm:$0xe] }
 0x19e   : > { %v918_v11 = vrot.slane %v916_v62, 7  ;;  %v924_v15 = vshrl.u32 %v4566_v1, 16  ;;  %v927_v16 = vshll.u32 %v4566_v1, 16  ;;  %v5312_v17 = vld [vmem:[#allocation2 + $0x20] sm:$0xf]  ;;  %v4338_v19 = vrot.slane %v5306_v9, 9 }
 0x19f   : > { %v902_v20 = vrot.slane %v900_v5, 7  ;;  %v908_v24 = vshrl.u32 %v4564_v7, 16  ;;  %v911_v40 = vshll.u32 %v4564_v7, 16  ;;  %v4365_v44 = vcombine.low %v5300_v38, %v5312_v17  ;;  %v5317_v37 = vld [vmem:[#allocation2 + $0x10] sm:$0xf] }
 0x1a0   : > { %v921_v18 = vor.u32 %v919_v63, %v918_v11  ;;  %v922_v34 = vrot.slane %v918_v11, 4  ;;  %v926_v21 = vrot.slane %v924_v15, 7  ;;  %v4364_v32 = vcombine.low %v5304_v8, %v5317_v37  ;;  %v5321_v33 = vld [vmem:[#allocation2 + $0x24] sm:$0x1]  ;;  %v1315_v35 = vld [vmem:[#allocation2 + $0x20] sm:$0xe] }
 0x1a1   : > { %v905_v39 = vor.u32 %v903_v6, %v902_v20  ;;  %v906_v41 = vrot.slane %v902_v20, 4  ;;  %v910_v49 = vrot.slane %v908_v24, 7  ;;  %1635 = vrot.lane.b32.xlu1 %v4365_v44, %s4879_s12  ;;  %v1346_v45 = vrot.slane %v5302_v2, 5  ;;  %v5325_v46 = vld [vmem:[#allocation2 + $0x10] sm:$0xf] }
 0x1a2   : > { %v986_v47 = vsel %vm5248_vm15, %v921_v18, %v985_v3  ;;  %v989_v48 = vsel %vm5149_vm5, %v922_v34, %v988_v52  ;;  %v929_v55 = vor.u32 %v927_v16, %v926_v21  ;;  %v930_v59 = vrot.slane %v926_v21, 4  ;;  %1633 = vrot.lane.b32.xlu0 %v4364_v32, %s4879_s12  ;;  %v5332_v57 = vld [vmem:[#allocation2 + $0x18] sm:$0xf]  ;;  %v5334_v58 = vld [vmem:[#allocation2 + $0x14] sm:$0x1] }
 0x1a3   : > { %987 = vst [vmem:[#allocation2 + $0x38] sm:$0xf] %v986_v47  ;;  %990 = vst [vmem:[#allocation2 + $0x3c] sm:$0x1] %v989_v48  ;;  %v974_v62 = vsel %vm5248_vm15, %v905_v39, %v973_v12  ;;  %v977_v63 = vsel %vm5149_vm5, %v906_v41, %v976_v13  ;;  %v913_v1 = vor.u32 %v911_v40, %v910_v49  ;;  %v914_v3 = vrot.slane %v910_v49, 4 }
 0x1a4   : > { %v5340_v5 = vld [vmem:[#allocation2 + $0x1c] sm:$0x1]  ;;  %v1127_v52 = vld [vmem:[#allocation2 + $0x10] sm:$0xe]  ;;  %975 = vst [vmem:[#allocation2 + $0x28] sm:$0xf] %v974_v62  ;;  %v992_v6 = vsel %vm5248_vm15, %v929_v55, %v991_v22  ;;  %v995_v7 = vsel %vm5149_vm5, %v930_v59, %v994_v23  ;;  %v4376_v22 = vcombine.low %v5325_v46, %v5332_v57  ;;  %v1347_v21 = vsel %vm5287_vm0, %v4338_v19, %v1346_v45 }
 0x1a5   : > { %978 = vst [vmem:[#allocation2 + $0x2c] sm:$0x1] %v977_v63  ;;  %v4339_v9 = vrot.slane %v1315_v35, 9  ;;  %v1128_v11 = vld [vmem:[#allocation2 + $0x18] sm:$0xe]  ;;  %v5350_v12 = vrot.slane %v1493_v42, 5  ;;  %v980_v13 = vsel %vm5248_vm15, %v913_v1, %v979_v28  ;;  %v983_v16 = vsel %vm5149_vm5, %v914_v3, %v982_v30 }
 0x1a6   : > { %v5346_v15 = vld [vmem:[#allocation2 + $0xc] sm:$0x1]  ;;  %993 = vst [vmem:[#allocation2 + $0x40] sm:$0xf] %v992_v6  ;;  %996 = vst [vmem:[#allocation2 + $0x44] sm:$0x1] %v995_v7  ;;  %1701 = vrot.lane.b32.xlu0 %v4376_v22, %s4876_s29  ;;  %v1026_v19 = vsel %vm5047_vm2, %v5291_v51, %v5293_v43 }
 0x1a7   : > { %v1350_v20 = vrot.slane %v5321_v33, 5  ;;  %v1126_v23 = vld [vmem:[#allocation2 + $0x8] sm:$0xe]  ;;  %981 = vst [vmem:[#allocation2 + $0x30] sm:$0xf] %v980_v13  ;;  %v4330_v42 = vrot.slane %v1127_v52, 9 }
 0x1a8   : > { %v5359_v24 = vld [vmem:[#allocation2 + $0x48] sm:$0xe]  ;;  %984 = vst [vmem:[#allocation2 + $0x34] sm:$0x1] %v983_v16  ;;  %v1162_v40 = vrot.slane %v5334_v58, 5  ;;  %v4331_v44 = vrot.slane %v1128_v11, 9 }
 0x1a9   : > { %v1166_v18 = vrot.slane %v5340_v5, 5  ;;  %v5363_v34 = vld [vmem:[#allocation2 + $0xc] sm:$0x1]  ;;  %v1351_v28 = vsel %vm5287_vm0, %v4339_v9, %v1350_v20  ;;  %v4329_v30 = vrot.slane %v1126_v23, 9  ;;  %v1158_v32 = vrot.slane %v5346_v15, 5 }
 0x1aa   : > { %v5371_v35 = vld [vmem:[#allocation2 + $0x14] sm:$0x1]  ;;  %v1312_v39 = vld [vmem:[#allocation2 + $0x8] sm:$0xe]  ;;  %v4373_v41 = vcombine.low %v1347_v21, %v1351_v28  ;;  %v1313_v49 = vld [vmem:[#allocation2 + $0x10] sm:$0xe]  ;;  %v1163_v55 = vsel %vm5287_vm0, %v4330_v42, %v1162_v40 }
 0x1ab   : > { %v4336_v47 = vrot.slane %v1312_v39, 9  ;;  %v5373_v48 = vld [vmem:[#allocation2 + $0x14] sm:$0x1]  ;;  %v1159_v59 = vsel %vm5287_vm0, %v4329_v30, %v1158_v32  ;;  %v5384_v62 = vld [vmem:[#allocation2 + $0x20] sm:$0xf]  ;;  %v1338_v63 = vrot.slane %v5363_v34, 5  ;;  %v1167_v20 = vsel %vm5287_vm0, %v4331_v44, %v1166_v18 }
 0x1ac   : > { %v4337_v1 = vrot.slane %v1313_v49, 9  ;;  %v5387_v3 = vld [vmem:[#allocation2 + $0x1c] sm:$0x1]  ;;  %v1497_v52 = vld [vmem:[#allocation2 + $0x10] sm:$0xe]  ;;  %1675 = vrot.lane.b32.xlu1 %v4373_v41, %s4880_s13  ;;  %v4360_v6 = vcombine.low %v5310_v10, %v1159_v59  ;;  %v1342_v7 = vrot.slane %v5371_v35, 5  ;;  %v4361_v40 = vcombine.low %v1163_v55, %v1167_v20 }
 0x1ad   : > { %v5392_v9 = vld [vmem:[#allocation2 + $0x38] sm:$0xf]  ;;  %v4344_v13 = vrot.slane %v1497_v52, 9  ;;  %v5400_v22 = vld [vmem:[#allocation2 + $0x28] sm:$0xf]  ;;  %v1523_v23 = vrot.slane %v5373_v48, 5  ;;  %v1339_v28 = vsel %vm5287_vm0, %v4336_v47, %v1338_v63 }
 0x1ae   : > { %v1498_v11 = vld [vmem:[#allocation2 + $0x18] sm:$0xe]  ;;  %v1527_v10 = vrot.slane %v5387_v3, 5  ;;  %1605 = vrot.lane.b32.xlu0 %v4360_v6, %s4877_s9  ;;  %v4377_v21 = vcombine.low %v5384_v62, %v5400_v22  ;;  %v1343_v30 = vsel %vm5287_vm0, %v4337_v1, %v1342_v7  ;;  %v5411_v44 = vld [vmem:[#allocation2 + $0x40] sm:$0xf]  ;;  %v1037_v52 = vshll.u32 %v5346_v15, 16 }
 0x1af   : > { %v4345_v42 = vrot.slane %v1498_v11, 9  ;;  %v5413_v18 = vld [vmem:[#allocation2 + $0x40] sm:$0xf]  ;;  %v5415_v32 = vld [vmem:[#allocation2 + $0x8] sm:$0xf]  ;;  %v4372_v39 = vcombine.low %v1339_v28, %v1343_v30  ;;  %v4367_v41 = vcombine.low %v5392_v9, %v5411_v44  ;;  %v1524_v49 = vsel %vm5287_vm0, %v4344_v13, %v1523_v23 }
 0x1b0   : > { %1607 = vrot.lane.b32.xlu1 %v4361_v40, %s4877_s9  ;;  %v1028_v63 = vshrl.u32 %v5415_v32, 16  ;;  %v1031_v1 = vshll.u32 %v5415_v32, 16  ;;  %v1229_v6 = vshrl.u32 %v5300_v38, 16  ;;  %v1232_v7 = vshll.u32 %v5300_v38, 16  ;;  %v5432_v13 = vld [vmem:[#allocation2 + $0x30] sm:$0xf] }
 0x1b1   : > { %v1528_v55 = vsel %vm5287_vm0, %v4345_v42, %v1527_v10  ;;  %v1238_v11 = vshll.u32 %v5302_v2, 16  ;;  %v1243_v42 = vshrl.u32 %v5312_v17, 16  ;;  %v1246_v10 = vshll.u32 %v5312_v17, 16  ;;  %v5437_v40 = vld [vmem:[#allocation2 + $0x10] sm:$0xf]  ;;  %v4764_v17 = vld [vmem:[%s6795_s2] sm:$0xff]  }
 0x1b2   : > { %v4384_v47 = vcombine.low %v1524_v49, %v1528_v55  ;;  %1673 = vrot.lane.b32.xlu0 %v4372_v39, %s4880_s13  ;;  %v1030_v20 = vrot.slane %v1028_v63, 4  ;;  %v1033_v23 = vrot.slane %v1031_v1, 5  ;;  %v1039_v28 = vrot.slane %v1037_v52, 5  ;;  %v5439_v55 = vld [vmem:[#allocation2 + $0x28] sm:$0xf]  ;;  %4635 = vmatprep.subr.bf16.mxu1 %v4764_v17 }
 0x1b3   : > { %v1231_v15 = vrot.slane %v1229_v6, 4  ;;  %v1234_v30 = vrot.slane %v1232_v7, 5  ;;  %v1240_v49 = vrot.slane %v1238_v11, 5  ;;  %v1245_v2 = vrot.slane %v1243_v42, 4  ;;  %v5443_v63 = vld [vmem:[#allocation2 + $0x18] sm:$0xf]  ;;  %4636 = vmatpush3.bf16.msra.mxu1 %v4764_v17 }
 0x1b4   : > { %1703 = vrot.lane.b32.xlu1 %v4377_v21, %s4876_s29  ;;  %v1034_v38 = vor.u32 %v1033_v23, %v1030_v20  ;;  %v1248_v16 = vrot.slane %v1246_v10, 5  ;;  %v1252_v39 = vshll.u32 %v5321_v33, 16  ;;  %v4366_v52 = vcombine.low %v5439_v55, %v5432_v13  ;;  %v5454_v23 = vld [vmem:[#allocation2 + $0x30] sm:$0xf]  ;;  %v4765_v42 = vld [vmem:[%s6795_s2 + $0x8] sm:$0xff]  }
 0x1b5   : > { %v1235_v1 = vor.u32 %v1234_v30, %v1231_v15  ;;  %v1042_v6 = vshrl.u32 %v5437_v40, 16  ;;  %v1045_v7 = vshll.u32 %v5437_v40, 16  ;;  %v1051_v20 = vshll.u32 %v5334_v58, 16  ;;  %v5460_v59 = vld [vmem:[#allocation2 + $0x38] sm:$0xf]  ;;  %4637 = vmatprep.subr.bf16.mxu1 %v4765_v42 }
 0x1b6   : > { %1741 = vrot.lane.b32.xlu0 %v4384_v47, %s4881_s16  ;;  %v1035_v21 = vrot.slane %v1034_v38, 4  ;;  %v1249_v11 = vor.u32 %v1248_v16, %v1245_v2  ;;  %v1254_v33 = vrot.slane %v1252_v39, 5  ;;  %v1056_v45 = vshrl.u32 %v5443_v63, 16  ;;  %v5462_v47 = vld [vmem:[#allocation2 + $0x3c] sm:$0x1] }
 0x1b7   : > { %v1236_v10 = vrot.slane %v1235_v1, 4  ;;  %v1044_v15 = vrot.slane %v1042_v6, 4  ;;  %v1047_v30 = vrot.slane %v1045_v7, 5  ;;  %v1053_v38 = vrot.slane %v1051_v20, 5  ;;  %v1318_v39 = vld [vmem:[#allocation2 + $0x38] sm:$0xe]  ;;  %4638 = vmatpush3.bf16.msra.mxu1 %v4765_v42 }
 0x1b8   : > { %1639 = vrot.lane.b32.xlu1 %v4367_v41, %s4879_s12  ;;  %v1040_v58 = vsel %vm5047_vm2, %v1035_v21, %v1039_v28  ;;  %v1250_v16 = vrot.slane %v1249_v11, 4  ;;  %v1059_v2 = vshll.u32 %v5443_v63, 16  ;;  %v1058_v41 = vrot.slane %v1056_v45, 4  ;;  %v5475_v7 = vld [vmem:[#allocation2 + $0x44] sm:$0x1]  ;;  %v4767_v21 = vld [vmem:[%s6795_s2 + $0x10] sm:$0xff]  }
 0x1b9   : > { %v4356_v1 = vcombine.low %v1026_v19, %v1040_v58  ;;  %v1241_v17 = vsel %vm5047_vm2, %v1236_v10, %v1240_v49  ;;  %v1048_v6 = vor.u32 %v1047_v30, %v1044_v15  ;;  %v1319_v28 = vld [vmem:[#allocation2 + $0x40] sm:$0xe]  ;;  %v1065_v29 = vshll.u32 %v5340_v5, 16  ;;  %4639 = vmatprep.subr.bf16.mxu1 %v4767_v21 }
 0x1ba   : > { %v1255_v11 = vsel %vm5047_vm2, %v1250_v16, %v1254_v33  ;;  %v1061_v20 = vrot.slane %v1059_v2, 5  ;;  %v4378_v51 = vcombine.low %v5454_v23, %v5460_v59  ;;  %v4342_v45 = vrot.slane %v1318_v39, 9  ;;  %v5498_v39 = vld [vmem:[#allocation2 + $0x34] sm:$0x1] }
 0x1bb   : > { %1585 = vrot.lane.b32.xlu0 %v4356_v1, %s4882_s28  ;;  %v4369_v43 = vcombine.low %v1241_v17, %v1255_v11  ;;  %v1049_v19 = vrot.slane %v1048_v6, 4  ;;  %v1362_v49 = vrot.slane %v5462_v47, 5  ;;  %v6815_v10 = vcombine.low %v5413_v18, %v5228_v27  ;;  %v5500_v27 = vld [vmem:[#allocation2 + $0x3c] sm:$0x1]  ;;  %4640 = vmatpush3.bf16.msra.mxu1 %v4767_v21 }
 0x1bc   : > { %v1062_v33 = vor.u32 %v1061_v20, %v1058_v41  ;;  %v1067_v15 = vrot.slane %v1065_v29, 5  ;;  %v4343_v5 = vrot.slane %v1319_v28, 9  ;;  %v1366_v30 = vrot.slane %v5475_v7, 5  ;;  %v4768_v41 = vld [vmem:[%s6795_s2 + $0x18] sm:$0xff]  }
 0x1bd   : > { %1707 = vrot.lane.b32.xlu1 %v6815_v10, %s4876_s29  ;;  %v1054_v58 = vsel %vm5047_vm2, %v1049_v19, %v1053_v38  ;;  %v1363_v16 = vsel %vm5287_vm0, %v4342_v45, %v1362_v49  ;;  %v1201_v2 = vshrl.u32 %v5304_v8, 16  ;;  %v1204_v42 = vshll.u32 %v5304_v8, 16  ;;  %v1131_v38 = vld [vmem:[#allocation2 + $0x30] sm:$0xe]  ;;  %v1132_v19 = vld [vmem:[#allocation2 + $0x38] sm:$0xe]  ;;  %4641 = vmatprep.subr.bf16.mxu1 %v4768_v41 }
 0x1be   : > { %v1063_v1 = vrot.slane %v1062_v33, 4  ;;  %v1367_v29 = vsel %vm5287_vm0, %v4343_v5, %v1366_v30  ;;  %v1210_v17 = vshll.u32 %v5363_v34, 16  ;;  %v1215_v6 = vshrl.u32 %v5317_v37, 16 }
 0x1bf   : > { %1637 = vrot.lane.b32.xlu0 %v4366_v52, %s4879_s12  ;;  %v4375_v8 = vcombine.low %v1363_v16, %v1367_v29  ;;  %v1203_v28 = vrot.slane %v1201_v2, 4  ;;  %v1206_v11 = vrot.slane %v1204_v42, 5  ;;  %v1218_v20 = vshll.u32 %v5317_v37, 16  ;;  %4642 = vmatpush3.bf16.msra.mxu1 %v4768_v41 }
 0x1c0   : > { %v1068_v34 = vsel %vm5047_vm2, %v1063_v1, %v1067_v15  ;;  %v1212_v45 = vrot.slane %v1210_v17, 5  ;;  %v1217_v49 = vrot.slane %v1215_v6, 4  ;;  %v1224_v10 = vshll.u32 %v5371_v35, 16 }
 0x1c1   : > { %1655 = vrot.lane.b32.xlu1 %v4369_v43, %s4875_s18  ;;  %v4357_v33 = vcombine.low %v1054_v58, %v1068_v34  ;;  %v1207_v5 = vor.u32 %v1206_v11, %v1203_v28  ;;  %v1220_v52 = vrot.slane %v1218_v20, 5  ;;  %v4334_v30 = vrot.slane %v1131_v38, 9 }
 0x1c2   : > { %v1226_v16 = vrot.slane %v1224_v10, 5  ;;  %v1178_v2 = vrot.slane %v5498_v39, 5  ;;  %v4335_v37 = vrot.slane %v1132_v19, 9  ;;  %v1182_v21 = vrot.slane %v5500_v27, 5 }
 0x1c3   : > { %1705 = vrot.lane.b32.xlu0 %v4378_v51, %s4876_s29  ;;  %v1208_v43 = vrot.slane %v1207_v5, 4  ;;  %v1221_v42 = vor.u32 %v1220_v52, %v1217_v49  ;;  %v1386_v15 = vshrl.u32 %v5325_v46, 16  ;;  %v1389_v1 = vshll.u32 %v5325_v46, 16  ;;  %v1379_v46 = vld [vmem:[#allocation2 + $0x24] sm:$0x1] }
 0x1c4   : > { %v1179_v35 = vsel %vm5287_vm0, %v4334_v30, %v1178_v2  ;;  %v1183_v58 = vsel %vm5287_vm0, %v4335_v37, %v1182_v21  ;;  %v1395_v29 = vshll.u32 %v5373_v48, 16  ;;  %v1400_v17 = vshrl.u32 %v5332_v57, 16  ;;  %v1380_v52 = vld [vmem:[#allocation2 + $0x2c] sm:$0x1]  ;;  %v1499_v2 = vld [vmem:[#allocation2 + $0x20] sm:$0xe] }
 0x1c5   : > { %1587 = vrot.lane.b32.xlu1 %v4357_v33, %s4882_s28  ;;  %v1213_v51 = vsel %vm5047_vm2, %v1208_v43, %v1212_v45  ;;  %v1222_v6 = vrot.slane %v1221_v42, 4  ;;  %v4363_v38 = vcombine.low %v1179_v35, %v1183_v58  ;;  %v1388_v28 = vrot.slane %v1386_v15, 4  ;;  %v1500_v15 = vld [vmem:[#allocation2 + $0x28] sm:$0xe] }
 0x1c6   : > { %v1391_v41 = vrot.slane %v1389_v1, 5  ;;  %v1397_v11 = vrot.slane %v1395_v29, 5  ;;  %v1402_v20 = vrot.slane %v1400_v17, 4  ;;  %v1403_v19 = vshll.u32 %v5332_v57, 16  ;;  %v5539_v29 = vld [vmem:[#allocation2 + $0x20] sm:$0xf] }
 0x1c7   : > { %v1227_v34 = vsel %vm5047_vm2, %v1222_v6, %v1226_v16  ;;  %v1409_v49 = vshll.u32 %v5387_v3, 16  ;;  %v1414_v48 = vshrl.u32 %v5384_v62, 16  ;;  %v1417_v10 = vshll.u32 %v5384_v62, 16 }
 0x1c8   : > { %v4368_v45 = vcombine.low %v1213_v51, %v1227_v34  ;;  %v1392_v33 = vor.u32 %v1391_v41, %v1388_v28  ;;  %v1405_v5 = vrot.slane %v1403_v19, 5  ;;  %v1423_v30 = vshll.u32 %v1379_v46, 16 }
 0x1c9   : > { %1679 = vrot.lane.b32.xlu1 %v4375_v8, %s4880_s13  ;;  %v1411_v37 = vrot.slane %v1409_v49, 5  ;;  %v1416_v21 = vrot.slane %v1414_v48, 4  ;;  %v1419_v57 = vrot.slane %v1417_v10, 5  ;;  %v1428_v43 = vshrl.u32 %v5400_v22, 16 }
 0x1ca   : > { %1653 = vrot.lane.b32.xlu0 %v4368_v45, %s4875_s18  ;;  %v1393_v3 = vrot.slane %v1392_v33, 4  ;;  %v1406_v16 = vor.u32 %v1405_v5, %v1402_v20  ;;  %v1425_v42 = vrot.slane %v1423_v30, 5  ;;  %v1431_v62 = vshll.u32 %v5400_v22, 16  ;;  %v1009_v22 = vld [vmem:[#allocation2 + $0x24] sm:$0x1] }
 0x1cb   : > { %v1420_v8 = vor.u32 %v1419_v57, %v1416_v21  ;;  %v1430_v1 = vrot.slane %v1428_v43, 4  ;;  %v1437_v35 = vshll.u32 %v1380_v52, 16  ;;  %v4346_v58 = vrot.slane %v1499_v2, 9  ;;  %v5548_v45 = vld [vmem:[#allocation2 + $0x28] sm:$0xf] }
 0x1cc   : > { %v1398_v17 = vsel %vm5047_vm2, %v1393_v3, %v1397_v11  ;;  %v1407_v51 = vrot.slane %v1406_v16, 4  ;;  %v1433_v6 = vrot.slane %v1431_v62, 5  ;;  %v1531_v28 = vrot.slane %v1379_v46, 5  ;;  %v1129_v30 = vld [vmem:[#allocation2 + $0x20] sm:$0xe] }
 0x1cd   : > { %1611 = vrot.lane.b32.xlu1 %v4363_v38, %s4877_s9  ;;  %v1421_v41 = vrot.slane %v1420_v8, 4  ;;  %v1439_v20 = vrot.slane %v1437_v35, 5  ;;  %v4347_v19 = vrot.slane %v1500_v15, 9  ;;  %v1535_v34 = vrot.slane %v1380_v52, 5  ;;  %v1010_v38 = vld [vmem:[#allocation2 + $0x2c] sm:$0x1] }
 0x1ce   : > { %v1412_v49 = vsel %vm5047_vm2, %v1407_v51, %v1411_v37  ;;  %v1434_v48 = vor.u32 %v1433_v6, %v1430_v1  ;;  %v1532_v10 = vsel %vm5287_vm0, %v4346_v58, %v1531_v28  ;;  %v1070_v11 = vshrl.u32 %v5539_v29, 16 }
 0x1cf   : > { %v4380_v33 = vcombine.low %v1398_v17, %v1412_v49  ;;  %v1426_v46 = vsel %vm5047_vm2, %v1421_v41, %v1425_v42  ;;  %v1536_v5 = vsel %vm5287_vm0, %v4347_v19, %v1535_v34  ;;  %v1073_v52 = vshll.u32 %v5539_v29, 16  ;;  %v1130_v42 = vld [vmem:[#allocation2 + $0x28] sm:$0xe] }
 0x1d0   : > { %v1435_v2 = vrot.slane %v1434_v48, 4  ;;  %v4385_v37 = vcombine.low %v1532_v10, %v1536_v5  ;;  %v1072_v21 = vrot.slane %v1070_v11, 4  ;;  %v1079_v57 = vshll.u32 %v1009_v22, 16  ;;  %v5567_v10 = vld [vmem:[#allocation2 + $0x2c] sm:$0x1] }
 0x1d1   : > { %1721 = vrot.lane.b32.xlu0 %v4380_v33, %s4883_s14  ;;  %v1075_v43 = vrot.slane %v1073_v52, 5  ;;  %v1084_v3 = vshrl.u32 %v5548_v45, 16  ;;  %v1087_v16 = vshll.u32 %v5548_v45, 16  ;;  %v1093_v62 = vshll.u32 %v1010_v38, 16  ;;  %v1316_v5 = vld [vmem:[#allocation2 + $0x28] sm:$0xe] }
 0x1d2   : > { %v1440_v15 = vsel %vm5047_vm2, %v1435_v2, %v1439_v20  ;;  %v1081_v8 = vrot.slane %v1079_v57, 5  ;;  %v4332_v1 = vrot.slane %v1129_v30, 9  ;;  %v1170_v35 = vrot.slane %v1009_v22, 5 }
 0x1d3   : > { %v4381_v58 = vcombine.low %v1426_v46, %v1440_v15  ;;  %v1076_v17 = vor.u32 %v1075_v43, %v1072_v21  ;;  %v1086_v51 = vrot.slane %v1084_v3, 4  ;;  %v1089_v6 = vrot.slane %v1087_v16, 5  ;;  %v5576_v21 = vld [vmem:[#allocation2 + $0x34] sm:$0x1] }
 0x1d4   : > { %v1095_v28 = vrot.slane %v1093_v62, 5  ;;  %v1171_v41 = vsel %vm5287_vm0, %v4332_v1, %v1170_v35  ;;  %v4333_v19 = vrot.slane %v1130_v42, 9  ;;  %v1174_v34 = vrot.slane %v1010_v38, 5  ;;  %v5578_v62 = vld [vmem:[#allocation2 + $0x30] sm:$0xf] }
 0x1d5   : > { %1723 = vrot.lane.b32.xlu1 %v4381_v58, %s4883_s14  ;;  %1743 = vrot.lane.b32.xlu0 %v4385_v37, %s4881_s16  ;;  %v1077_v49 = vrot.slane %v1076_v17, 4  ;;  %v1090_v48 = vor.u32 %v1089_v6, %v1086_v51  ;;  %v1285_v20 = vshrl.u32 %v5392_v9, 16  ;;  %v1288_v22 = vshll.u32 %v5392_v9, 16  ;;  %v1317_v9 = vld [vmem:[#allocation2 + $0x30] sm:$0xe] }
 0x1d6   : > { %v1175_v11 = vsel %vm5287_vm0, %v4333_v19, %v1174_v34  ;;  %v1294_v33 = vshll.u32 %v5462_v47, 16  ;;  %v1299_v46 = vshrl.u32 %v5411_v44, 16  ;;  %v1302_v38 = vshll.u32 %v5411_v44, 16  ;;  %v5585_v17 = vld [vmem:[#allocation2 + $0x38] sm:$0xf] }
 0x1d7   : > { %v1082_v52 = vsel %vm5047_vm2, %v1077_v49, %v1081_v8  ;;  %v1091_v30 = vrot.slane %v1090_v48, 4  ;;  %v4362_v2 = vcombine.low %v1171_v41, %v1175_v11  ;;  %v1287_v37 = vrot.slane %v1285_v20, 4 }
 0x1d8   : > { %v1290_v57 = vrot.slane %v1288_v22, 5  ;;  %v1296_v43 = vrot.slane %v1294_v33, 5  ;;  %v1301_v3 = vrot.slane %v1299_v46, 4  ;;  %v1304_v16 = vrot.slane %v1302_v38, 5 }
 0x1d9   : > { %v1096_v47 = vsel %vm5047_vm2, %v1091_v30, %v1095_v28  ;;  %1609 = vrot.lane.b32.xlu0 %v4362_v2, %s4877_s9  ;;  %v1308_v44 = vshll.u32 %v5475_v7, 16  ;;  %v4340_v42 = vrot.slane %v1316_v5, 9  ;;  %v1354_v15 = vrot.slane %v5567_v10, 5 }
 0x1da   : > { %v4358_v8 = vcombine.low %v1082_v52, %v1096_v47  ;;  %v1291_v1 = vor.u32 %v1290_v57, %v1287_v37  ;;  %v1305_v35 = vor.u32 %v1304_v16, %v1301_v3  ;;  %v4341_v58 = vrot.slane %v1317_v9, 9 }
 0x1db   : > { %v1310_v51 = vrot.slane %v1308_v44, 5  ;;  %v1355_v6 = vsel %vm5287_vm0, %v4340_v42, %v1354_v15  ;;  %v1358_v41 = vrot.slane %v5576_v21, 5  ;;  %v1098_v28 = vshrl.u32 %v5578_v62, 16 }
 0x1dc   : > { %1589 = vrot.lane.b32.xlu1 %v4358_v8, %s4882_s28  ;;  %v1292_v7 = vrot.slane %v1291_v1, 4  ;;  %v1306_v19 = vrot.slane %v1305_v35, 4  ;;  %v1101_v34 = vshll.u32 %v5578_v62, 16  ;;  %v1107_v49 = vshll.u32 %v5498_v39, 16  ;;  %v1383_v35 = vld [vmem:[#allocation2 + $0x44] sm:$0x1] }
 0x1dd   : > { %v1359_v48 = vsel %vm5287_vm0, %v4341_v58, %v1358_v41  ;;  %v1100_v20 = vrot.slane %v1098_v28, 4  ;;  %v1112_v22 = vshrl.u32 %v5585_v17, 16  ;;  %v1115_v11 = vshll.u32 %v5585_v17, 16 }
 0x1de   : > { %v1297_v33 = vsel %vm5047_vm2, %v1292_v7, %v1296_v43  ;;  %v1311_v46 = vsel %vm5047_vm2, %v1306_v19, %v1310_v51  ;;  %v4374_v38 = vcombine.low %v1355_v6, %v1359_v48  ;;  %v1103_v5 = vrot.slane %v1101_v34, 5 }
 0x1df   : > { %v4371_v52 = vcombine.low %v1297_v33, %v1311_v46  ;;  %v1114_v30 = vrot.slane %v1112_v22, 4  ;;  %v1117_v2 = vrot.slane %v1115_v11, 5  ;;  %v1551_v39 = vrot.slane %v5295_v56, 5  ;;  %v1381_v11 = vld [vmem:[#allocation2 + $0x34] sm:$0x1] }
 0x1e0   : > { %1677 = vrot.lane.b32.xlu0 %v4374_v38, %s4880_s13  ;;  %v1104_v37 = vor.u32 %v1103_v5, %v1100_v20  ;;  %v1121_v9 = vshll.u32 %v5500_v27, 16  ;;  %v1257_v57 = vshrl.u32 %v5439_v55, 16  ;;  %v1260_v3 = vshll.u32 %v5439_v55, 16  ;;  %v1382_v5 = vld [vmem:[#allocation2 + $0x3c] sm:$0x1] }
 0x1e1   : > { %1659 = vrot.lane.b32.xlu1 %v4371_v52, %s4875_s18  ;;  %v1109_v43 = vrot.slane %v1107_v49, 5  ;;  %v1118_v16 = vor.u32 %v1117_v2, %v1114_v30  ;;  %v1271_v47 = vshrl.u32 %v5432_v13, 16  ;;  %v1274_v44 = vshll.u32 %v5432_v13, 16 }
 0x1e2   : > { %v1105_v42 = vrot.slane %v1104_v37, 4  ;;  %v1259_v15 = vrot.slane %v1257_v57, 4  ;;  %v1262_v8 = vrot.slane %v1260_v3, 5  ;;  %v1266_v1 = vshll.u32 %v5567_v10, 16  ;;  %v1503_v37 = vld [vmem:[#allocation2 + $0x40] sm:$0xe] }
 0x1e3   : > { %v1119_v58 = vrot.slane %v1118_v16, 4  ;;  %v1123_v27 = vrot.slane %v1121_v9, 5  ;;  %v1273_v51 = vrot.slane %v1271_v47, 4  ;;  %v1276_v6 = vrot.slane %v1274_v44, 5 }
 0x1e4   : > { %v1110_v55 = vsel %vm5047_vm2, %v1105_v42, %v1109_v43  ;;  %v1263_v41 = vor.u32 %v1262_v8, %v1259_v15  ;;  %v1280_v28 = vshll.u32 %v5576_v21, 16  ;;  %v1470_v7 = vshrl.u32 %v5413_v18, 16 }
 0x1e5   : > { %v1124_v13 = vsel %vm5047_vm2, %v1119_v58, %v1123_v27  ;;  %v1277_v19 = vor.u32 %v1276_v6, %v1273_v51  ;;  %v1473_v34 = vshll.u32 %v5413_v18, 16  ;;  %v1479_v10 = vshll.u32 %v1383_v35, 16  ;;  %v1501_v27 = vld [vmem:[#allocation2 + $0x30] sm:$0xe] }
 0x1e6   : > { %v4359_v49 = vcombine.low %v1110_v55, %v1124_v13  ;;  %v1264_v48 = vrot.slane %v1263_v41, 4  ;;  %v1268_v20 = vrot.slane %v1266_v1, 5  ;;  %v1472_v22 = vrot.slane %v1470_v7, 4 }
 0x1e7   : > { %v1278_v33 = vrot.slane %v1277_v19, 4  ;;  %v1282_v46 = vrot.slane %v1280_v28, 5  ;;  %v1475_v38 = vrot.slane %v1473_v34, 5  ;;  %v1442_v21 = vshrl.u32 %v5454_v23, 16 }
 0x1e8   : > { %1591 = vrot.lane.b32.xlu1 %v4359_v49, %s4882_s28  ;;  %v1269_v52 = vsel %vm5047_vm2, %v1264_v48, %v1268_v20  ;;  %v1481_v30 = vrot.slane %v1479_v10, 5  ;;  %v1445_v18 = vshll.u32 %v5454_v23, 16  ;;  %v1456_v2 = vshrl.u32 %v5460_v59, 16 }
 0x1e9   : > { %v1283_v9 = vsel %vm5047_vm2, %v1278_v33, %v1282_v46  ;;  %v1476_v57 = vor.u32 %v1475_v38, %v1472_v22  ;;  %v1444_v3 = vrot.slane %v1442_v21, 4  ;;  %v1459_v43 = vshll.u32 %v5460_v59, 16 }
 0x1ea   : > { %v4370_v16 = vcombine.low %v1269_v52, %v1283_v9  ;;  %v1447_v47 = vrot.slane %v1445_v18, 5  ;;  %v1451_v44 = vshll.u32 %v1381_v11, 16  ;;  %v1458_v42 = vrot.slane %v1456_v2, 4 }
 0x1eb   : > { %v1477_v15 = vrot.slane %v1476_v57, 4  ;;  %v1461_v8 = vrot.slane %v1459_v43, 5  ;;  %v1465_v1 = vshll.u32 %v1382_v5, 16  ;;  %v4350_v58 = vrot.slane %v1503_v37, 9 }
 0x1ec   : > { %1657 = vrot.lane.b32.xlu0 %v4370_v16, %s4875_s18  ;;  %v1448_v23 = vor.u32 %v1447_v47, %v1444_v3  ;;  %v1547_v51 = vrot.slane %v1383_v35, 5  ;;  %v6816_v59 = vrot.slane %v5359_v24, 9  ;;  %v6817_v28 = vsel %vm5047_vm2, %v5297_v60, %v5350_v12  ;;  %v1502_v35 = vld [vmem:[#allocation2 + $0x38] sm:$0xe]  ;;  %v4769_v24 = vld [vmem:[%s6795_s2 + $0x20] ss:$0 sps:$4 sm:$0xff]  }
 0x1ed   : > { %v1482_v6 = vsel %vm5047_vm2, %v1477_v15, %v1481_v30  ;;  %v1462_v55 = vor.u32 %v1461_v8, %v1458_v42  ;;  %v1453_v19 = vrot.slane %v1451_v44, 5  ;;  %v4348_v34 = vrot.slane %v1501_v27, 9  ;;  %4689 = vmatprep.subr.msk.bf16.mxu1 %vm1871_vm1, %v4769_v24  ;;  %v4806_v8 = vld [vmem:[#allocation2] sm:$0xf] }
 0x1ee   : > { %v1552_v41 = vsel %vm5287_vm0, %v6816_v59, %v1551_v39  ;;  %v4383_v7 = vcombine.low %v1482_v6, %v6817_v28  ;;  %v1449_v13 = vrot.slane %v1448_v23, 4  ;;  %v1467_v49 = vrot.slane %v1465_v1, 5 }
 0x1ef   : > { %v1463_v10 = vrot.slane %v1462_v55, 4  ;;  %v1548_v56 = vsel %vm5287_vm0, %v4350_v58, %v1547_v51  ;;  %v1539_v48 = vrot.slane %v1381_v11, 5  ;;  %v4349_v39 = vrot.slane %v1502_v35, 9 }
 0x1f0   : > { %1727 = vrot.lane.b32.xlu1 %v4383_v7, %s4883_s14  ;;  %v1454_v60 = vsel %vm5047_vm2, %v1449_v13, %v1453_v19  ;;  %v1543_v20 = vrot.slane %v1382_v5, 5  ;;  %v4387_v33 = vcombine.low %v1548_v56, %v1552_v41  ;;  %v1873_v46 = vsel %vm1871_vm1, %v4769_v24, 0  ;;  %v4319_v5 = vld [vmem:[%s6798_s5 + $0x1] ss:$0 sm:$0xff] }
 0x1f1   : > { %v1468_v12 = vsel %vm5047_vm2, %v1463_v10, %v1467_v49  ;;  %v1540_v11 = vsel %vm5287_vm0, %v4348_v34, %v1539_v48  ;;  %4644 = vmatpush3.bf16.msra.mxu1 %v1873_v46  ;;  %v4352_v1 = vcombine.low %v4806_v8, %v5415_v32  ;;  %v4353_v27 = vcombine.low %v5437_v40, %v5443_v63 }
 0x1f2   : > { %v4382_v22 = vcombine.low %v1454_v60, %v1468_v12  ;;  %v1544_v38 = vsel %vm5287_vm0, %v4349_v39, %v1543_v20 }
 0x1f3   : > { %v4386_v21 = vcombine.low %v1540_v11, %v1544_v38  ;;  %v4354_v11 = vcombine.low %v5539_v29, %v5548_v45  ;;  %v4355_v38 = vcombine.low %v5578_v62, %v5585_v17 }
 0x1f4   : > { %1725 = vrot.lane.b32.xlu0 %v4382_v22, %s4883_s14  ;;  %1747 = vrot.lane.b32.xlu1 %v4387_v33, %s4881_s16 }
 0x1f8   : > { %1745 = vrot.lane.b32.xlu0 %v4386_v21, %s4881_s16 }
 0x1fc   : > { %824 = vrot.lane.b32.xlu0 %v4319_v5, %s4882_s28 }
 0x213   : > { %v1636_v30 = vpop.permute.xlu1 %1635 }
 0x214   : > { %v1634_v52 = vpop.permute.xlu0 %1633 }
 0x218   : > { %v1702_v18 = vpop.permute.xlu0 %1701 }
 0x21e   : > { %v1676_v2 = vpop.permute.xlu1 %1675 }
 0x220   : > { %v1606_v37 = vpop.permute.xlu0 %1605 }
 0x222   : > { %v1608_v9 = vpop.permute.xlu1 %1607 }
 0x224   : > { %v1674_v57 = vpop.permute.xlu0 %1673 }
 0x226   : > { %v1704_v3 = vpop.permute.xlu1 %1703 }
 0x228   : > { %v1742_v43 = vpop.permute.xlu0 %1741 }
 0x22a   : > { %v1640_v16 = vpop.permute.xlu1 %1639 }
 0x22d   : > { %v1586_v47 = vpop.permute.xlu0 %1585 }
 0x22e   : > { %v1752_v58 = vsel %vm1749_vm3, %v4352_v1, %v1586_v47 }
 0x22f   : > { %v1708_v44 = vpop.permute.xlu1 %1707  ;;  %v1763_v55 = vsel %vm660_vm8, %v1752_v58, %v1606_v37 }
 0x230   : > { %v1772_v28 = vsel %vm1770_vm4, %v1763_v55, %v1634_v52 }
 0x231   : > { %v1638_v42 = vpop.permute.xlu0 %1637 }
 0x233   : > { %v1656_v15 = vpop.permute.xlu1 %1655 }
 0x235   : > { %v1706_v51 = vpop.permute.xlu0 %1705 }
 0x237   : > { %v1588_v23 = vpop.permute.xlu1 %1587 }
 0x238   : > { %v1755_v6 = vsel %vm1749_vm3, %v4353_v27, %v1588_v23 }
 0x239   : > { %v1765_v59 = vsel %vm660_vm8, %v1755_v6, %v1608_v9 }
 0x23a   : > { %v1774_v13 = vsel %vm1770_vm4, %v1765_v59, %v1636_v30 }
 0x23b   : > { %v1680_v41 = vpop.permute.xlu1 %1679  ;;  %v1782_v35 = vsel %vm673_vm9, %v1774_v13, %v1656_v15 }
 0x23c   : > { %v1654_v7 = vpop.permute.xlu0 %1653  ;;  %v1791_v49 = vsel %vm1787_vm6, %v1782_v35, %v1676_v2 }
 0x23d   : > { %v1780_v32 = vsel %vm673_vm9, %v1772_v28, %v1654_v7  ;;  %v1799_v48 = vsel %vm682_vm10, %v1791_v49, %v1704_v3 }
 0x23e   : > { %v1789_v40 = vsel %vm1787_vm6, %v1780_v32, %v1674_v57 }
 0x23f   : > { %v1612_v63 = vpop.permute.xlu1 %1611  ;;  %v1797_v19 = vsel %vm682_vm10, %v1789_v40, %v1702_v18 }
 0x243   : > { %v1722_v34 = vpop.permute.xlu0 %1721 }
 0x244   : > { %v1806_v10 = vsel %vm1804_vm7, %v1797_v19, %v1722_v34 }
 0x245   : > { %v1814_v56 = vsel %vm723_vm11, %v1806_v10, %v1742_v43 }
 0x246   : > { %4645 = vmatprep.mubr.msk.bf16.mxu1 %vm1862_vm12, %v1814_v56 }
 0x247   : > { %v1724_v24 = vpop.permute.xlu1 %1723  ;;  %v1744_v60 = vpop.permute.xlu0 %1743 }
 0x248   : > { %v1808_v12 = vsel %vm1804_vm7, %v1799_v48, %v1724_v24 }
 0x249   : > { %v1816_v39 = vsel %vm723_vm11, %v1808_v12, %v1744_v60 }
 0x24a   : > { %4646 = vmatmul.mubr.msk.bf16.vlgmr.msra.gmra.mrb[0].mxu1 %vm1862_vm12, %v1816_v39 }
 0x24b   : > { %v1610_v22 = vpop.permute.xlu0 %1609 }
 0x24e   : > { %v1590_v20 = vpop.permute.xlu1 %1589 }
 0x24f   : > { %v1758_v21 = vsel %vm1749_vm3, %v4354_v11, %v1590_v20 }
 0x250   : > { %v1767_v18 = vsel %vm660_vm8, %v1758_v21, %v1610_v22  ;;  %v2103_v21 = vld [vmem:[#allocation2 + $0x18] sm:$0xf] }
 0x251   : > { %v1776_v9 = vsel %vm1770_vm4, %v1767_v18, %v1638_v42 }
 0x252   : > { %v1678_v46 = vpop.permute.xlu0 %1677 }
 0x253   : > { %v1660_v33 = vpop.permute.xlu1 %1659 }
 0x25a   : > { %v1592_v5 = vpop.permute.xlu1 %1591 }
 0x25b   : > { %v1761_v52 = vsel %vm1749_vm3, %v4355_v38, %v1592_v5 }
 0x25c   : > { %v1769_v30 = vsel %vm660_vm8, %v1761_v52, %v1612_v63 }
 0x25d   : > { %v1778_v2 = vsel %vm1770_vm4, %v1769_v30, %v1640_v16 }
 0x25e   : > { %v1658_v37 = vpop.permute.xlu0 %1657  ;;  %v1786_v29 = vsel %vm673_vm9, %v1778_v2, %v1660_v33 }
 0x25f   : > { %v1784_v45 = vsel %vm673_vm9, %v1776_v9, %v1658_v37  ;;  %v1795_v62 = vsel %vm1787_vm6, %v1786_v29, %v1680_v41  ;;  %v2106_v9 = vld [vmem:[#allocation2 + $0x1c] sm:$0x1] }
 0x260   : > { %v1793_v57 = vsel %vm1787_vm6, %v1784_v45, %v1678_v46  ;;  %v1803_v3 = vsel %vm682_vm10, %v1795_v62, %v1708_v44 }
 0x261   : > { %v1801_v47 = vsel %vm682_vm10, %v1793_v57, %v1706_v51  ;;  %v2094_v57 = vld [vmem:[#allocation2 + $0xc] sm:$0x1] }
 0x262   : > { %v1728_v17 = vpop.permute.xlu1 %1727 }
 0x263   : > { %v1812_v15 = vsel %vm1804_vm7, %v1803_v3, %v1728_v17 }
 0x266   : > { %v1726_v43 = vpop.permute.xlu0 %1725  ;;  %v1748_v16 = vpop.permute.xlu1 %1747 }
 0x267   : > { %v1810_v8 = vsel %vm1804_vm7, %v1801_v47, %v1726_v43  ;;  %v1820_v58 = vsel %vm723_vm11, %v1812_v15, %v1748_v16 }
 0x26a   : > { %v1746_v42 = vpop.permute.xlu0 %1745 }
 0x26b   : > { %v1818_v1 = vsel %vm723_vm11, %v1810_v8, %v1746_v42 }
 0x26c   : > { %4649 = vmatprep.mubr.msk.bf16.mxu1 %vm1862_vm12, %v1818_v1  ;;  %v2109_v1 = vld [vmem:[#allocation2 + $0x20] sm:$0xf] }
 0x26d   : > { %4650 = vmatmul.mubr.msk.bf16.gmra.mrb[4].mxu1 %vm1862_vm12, %v1820_v58  ;;  %v5744_v58 = vld [vmem:[#allocation2 + $0x48] sm:$0xf] }
 0x26e   : > { %v825_v27 = vpop.permute.xlu0 %824 }
 0x26f   : > { %v828_v44 = vadd.f32 %v825_v27, %v5232_v31  ;;  %v827_v23 = vadd.f32 %v825_v27, %v5222_v25  ;;  %v830_v51 = vadd.f32 %v5226_v26, %v825_v27  ;;  %v829_v6 = vadd.f32 %v5218_v4, %v825_v27  ;;  %v5718_v4 = vld [vmem:[%s6798_s5 + $0x2] ss:$0 sm:$0xff] }
 0x270   : > { %v832_v55 = vadd.f32 %v825_v27, %v5281_v54  ;;  %v831_v59 = vadd.f32 %v825_v27, %v5268_v0  ;;  %v834_v41 = vadd.f32 %v5276_v36, %v825_v27  ;;  %v833_v31 = vadd.f32 %v5260_v53, %v825_v27  ;;  %v2139_v36 = vld [vmem:[#allocation2] sm:$0xf]  ;;  %v4807_v27 = vld [vmem:[#allocation2 + $0x8] sm:$0xf] }
 0x271   : > { %1950 = vrot.lane.b32.xlu0 %v828_v44, %s4884_s26  ;;  %1948 = vrot.lane.b32.xlu1 %v827_v23, %s4884_s26  ;;  %v2156_v56 = vshrl.u32 %v2139_v36, 16  ;;  %v2159_v60 = vshll.u32 %v2139_v36, 16  ;;  %v2625_v36 = vshll.u32 %v5744_v58, 16 }
 0x273   : > { %v2158_v38 = vrot.slane %v2156_v56, 4  ;;  %v2161_v18 = vrot.slane %v2159_v60, 5  ;;  %v5770_v56 = vld [vmem:[#allocation2 + $0x4c] sm:$0x1] }
 0x275   : > { %1954 = vrot.lane.b32.xlu0 %v830_v51, %s4884_s26  ;;  %1952 = vrot.lane.b32.xlu1 %v829_v6, %s4884_s26  ;;  %v2112_v51 = vld [vmem:[#allocation2 + $0x24] sm:$0x1] }
 0x279   : > { %1958 = vrot.lane.b32.xlu0 %v832_v55, %s4884_s26  ;;  %1956 = vrot.lane.b32.xlu1 %v831_v59, %s4884_s26  ;;  %v5750_v59 = vld [vmem:[#allocation2 + $0x4] sm:$0x1] }
 0x27d   : > { %1962 = vrot.lane.b32.xlu0 %v834_v41, %s4884_s26  ;;  %1960 = vrot.lane.b32.xlu1 %v833_v31, %s4884_s26  ;;  %s4885_s26 = smov [#allocation3]  }
 0x2e3   : > { %v1949_v25 = vpop.permute.xlu1 %1948  ;;  %v1951_v28 = vpop.permute.xlu0 %1950 }
 0x2e7   : > { %v1953_v0 = vpop.permute.xlu1 %1952  ;;  %v1955_v19 = vpop.permute.xlu0 %1954 }
 0x31d   : > { %v4647_v26 = vpop.f32.mrb[0].mxu1 }
 0x31e   : > { %v1918_v54 = vadd.f32 %v4647_v26, %v5718_v4  ;;  %v1909_v7 = vpop.f32.mrb[1].mxu1  ;;  %v2165_v26 = vshll.u32 %v5750_v59, 16 }
 0x31f   : > { %v1910_v32 = vadd.f32 %v5718_v4, %v1909_v7  ;;  %v4648_v13 = vpop.f32.mrb[2].mxu1 }
 0x320   : > { %v5722_v40 = vadd.f32 %v1953_v0, %v1918_v54  ;;  %v1921_v53 = vadd.f32 %v4648_v13, %v5718_v4  ;;  %v1912_v63 = vpop.f32.mrb[3].mxu1  ;;  %v2267_v0 = vld [vmem:[#allocation2] sm:$0xe]  ;;  %v2622_v13 = vshrl.u32 %v5744_v58, 16 }
 0x321   : > { %v5725_v35 = vadd.f32 %v1949_v25, %v1910_v32  ;;  %v1913_v34 = vadd.f32 %v5718_v4, %v1912_v63  ;;  %v2097_v25 = vld [vmem:[#allocation2 + $0x10] sm:$0xf]  ;;  %v2162_v32 = vor.u32 %v2161_v18, %v2158_v38  ;;  %v2293_v63 = vrot.slane %v5750_v59, 5 }
 0x322   : > { %v4569_v10 = vpack.c.bf16 %v5722_v40, %v5722_v40  ;;  %v5730_v49 = vadd.f32 %v1955_v19, %v1921_v53  ;;  %v4406_v53 = vrot.slane %v2267_v0, 9  ;;  %v1957_v0 = vpop.permute.xlu1 %1956 }
 0x323   : > { %v4567_v48 = vpack.c.bf16 %v5725_v35, %v5725_v35  ;;  %v5734_v24 = vadd.f32 %v1951_v28, %v1913_v34  ;;  %v2100_v28 = vld [vmem:[#allocation2 + $0x14] sm:$0x1]  ;;  %v5764_v19 = vrot.slane %v2162_v32, 4  ;;  %v5766_v34 = vrot.slane %v2165_v26, 5 }
 0x324   : > { %v2029_v12 = vshrl.u32 %v4569_v10, 16  ;;  %v4570_v39 = vpack.c.bf16 %v5730_v49, %v5730_v49  ;;  %v2032_v11 = vshll.u32 %v4569_v10, 16  ;;  %v5768_v10 = vrot.slane %v2622_v13, 4 }
 0x325   : > { %v2013_v20 = vshrl.u32 %v4567_v48, 16  ;;  %v4568_v22 = vpack.c.bf16 %v5734_v24, %v5734_v24  ;;  %v2016_v52 = vshll.u32 %v4567_v48, 16 }
 0x326   : > { %v2031_v33 = vrot.slane %v2029_v12, 7  ;;  %v2037_v46 = vshrl.u32 %v4570_v39, 16  ;;  %v2040_v45 = vshll.u32 %v4570_v39, 16 }
 0x327   : > { %v2015_v5 = vrot.slane %v2013_v20, 7  ;;  %v2021_v30 = vshrl.u32 %v4568_v22, 16  ;;  %v2024_v43 = vshll.u32 %v4568_v22, 16  ;;  %v5777_v22 = vrot.slane %v2625_v36, 5 }
 0x328   : > { %v2034_v2 = vor.u32 %v2032_v11, %v2031_v33  ;;  %v2035_v37 = vrot.slane %v2031_v33, 4  ;;  %v2039_v29 = vrot.slane %v2037_v46, 7 }
 0x329   : > { %v2018_v62 = vor.u32 %v2016_v52, %v2015_v5  ;;  %v2019_v17 = vrot.slane %v2015_v5, 4  ;;  %v2023_v3 = vrot.slane %v2021_v30, 7 }
 0x32a   : > { %v2104_v47 = vsel %vm5248_vm15, %v2034_v2, %v2103_v21  ;;  %v2107_v16 = vsel %vm5149_vm5, %v2035_v37, %v2106_v9  ;;  %v2042_v8 = vor.u32 %v2040_v45, %v2039_v29  ;;  %v2043_v42 = vrot.slane %v2039_v29, 4 }
 0x32b   : > { %2108 = vst [vmem:[#allocation2 + $0x1c] sm:$0x1] %v2107_v16  ;;  %2105 = vst [vmem:[#allocation2 + $0x18] sm:$0xf] %v2104_v47  ;;  %v2092_v44 = vsel %vm5248_vm15, %v2018_v62, %v4807_v27  ;;  %v2095_v23 = vsel %vm5149_vm5, %v2019_v17, %v2094_v57  ;;  %v2026_v6 = vor.u32 %v2024_v43, %v2023_v3  ;;  %v2027_v55 = vrot.slane %v2023_v3, 4 }
 0x32c   : > { %2093 = vst [vmem:[#allocation2 + $0x8] sm:$0xf] %v2092_v44  ;;  %2096 = vst [vmem:[#allocation2 + $0xc] sm:$0x1] %v2095_v23  ;;  %v2110_v41 = vsel %vm5248_vm15, %v2042_v8, %v2109_v1  ;;  %v2113_v31 = vsel %vm5149_vm5, %v2043_v42, %v2112_v51 }
 0x32d   : > { %2114 = vst [vmem:[#allocation2 + $0x24] sm:$0x1] %v2113_v31  ;;  %2111 = vst [vmem:[#allocation2 + $0x20] sm:$0xf] %v2110_v41  ;;  %v2098_v54 = vsel %vm5248_vm15, %v2026_v6, %v2097_v25  ;;  %v2101_v7 = vsel %vm5149_vm5, %v2027_v55, %v2100_v28  ;;  %v2294_v25 = vsel %vm5287_vm0, %v4406_v53, %v2293_v63 }
 0x32e   : > { %2102 = vst [vmem:[#allocation2 + $0x14] sm:$0x1] %v2101_v7  ;;  %2099 = vst [vmem:[#allocation2 + $0x10] sm:$0xf] %v2098_v54  ;;  %v2168_v53 = vsel %vm5047_vm2, %v5764_v19, %v5766_v34  ;;  %v2115_v34 = vld [vmem:[#allocation2 + $0x28] sm:$0xf] }
 0x332   : > { %v5772_v48 = vld [vmem:[#allocation2 + $0x18] sm:$0xf]  ;;  %v5774_v60 = vld [vmem:[#allocation2 + $0x1c] sm:$0x1] }
 0x333   : > { %v2453_v12 = vld [vmem:[#allocation2 + $0x18] sm:$0xe]  ;;  %v2485_v20 = vrot.slane %v5774_v60, 5  ;;  %v2368_v5 = vshrl.u32 %v5772_v48, 16  ;;  %v2371_v52 = vshll.u32 %v5772_v48, 16 }
 0x334   : > { %v4416_v39 = vrot.slane %v2453_v12, 9  ;;  %v5780_v11 = vld [vmem:[#allocation2 + $0x20] sm:$0xf]  ;;  %v5782_v46 = vld [vmem:[#allocation2 + $0x24] sm:$0x1] }
 0x335   : > { %v2454_v38 = vld [vmem:[#allocation2 + $0x20] sm:$0xe]  ;;  %v4443_v21 = vcombine.low %v5772_v48, %v5780_v11  ;;  %v5788_v30 = vld [vmem:[#allocation2 + $0x8] sm:$0xf]  ;;  %v5790_v18 = vld [vmem:[#allocation2 + $0x10] sm:$0xf] }
 0x336   : > { %v2382_v2 = vshrl.u32 %v5780_v11, 16  ;;  %v2385_v37 = vshll.u32 %v5780_v11, 16  ;;  %v4442_v9 = vcombine.low %v5788_v30, %v5790_v18  ;;  %v4417_v29 = vrot.slane %v2454_v38, 9  ;;  %v5799_v17 = vld [vmem:[#allocation2 + $0x10] sm:$0xf] }
 0x337   : > { %2773 = vrot.lane.b32.xlu0 %v4443_v21, %s4879_s12  ;;  %v2354_v45 = vshrl.u32 %v5790_v18, 16  ;;  %v2489_v62 = vrot.slane %v5782_v46, 5  ;;  %v5801_v57 = vld [vmem:[#allocation2 + $0x14] sm:$0x1]  ;;  %v2486_v3 = vsel %vm5287_vm0, %v4416_v39, %v2485_v20  ;;  %v5806_v43 = vld [vmem:[#allocation2 + $0x18] sm:$0xf] }
 0x338   : > { %2771 = vrot.lane.b32.xlu1 %v4442_v9, %s4879_s12  ;;  %v5808_v47 = vld [vmem:[#allocation2 + $0x1c] sm:$0x1]  ;;  %v2269_v16 = vld [vmem:[#allocation2 + $0x10] sm:$0xe]  ;;  %v2270_v42 = vld [vmem:[#allocation2 + $0x18] sm:$0xe]  ;;  %v4454_v6 = vcombine.low %v5799_v17, %v5806_v43 }
 0x339   : > { %v2490_v8 = vsel %vm5287_vm0, %v4417_v29, %v2489_v62  ;;  %v4408_v1 = vrot.slane %v2269_v16, 9  ;;  %v2301_v27 = vrot.slane %v5801_v57, 5  ;;  %v2305_v44 = vrot.slane %v5808_v47, 5  ;;  %v5817_v59 = vld [vmem:[#allocation2 + $0xc] sm:$0x1]  ;;  %v1959_v62 = vpop.permute.xlu0 %1958 }
 0x33a   : > { %v2357_v23 = vshll.u32 %v5790_v18, 16  ;;  %v4451_v51 = vcombine.low %v2486_v3, %v2490_v8  ;;  %v4409_v55 = vrot.slane %v2270_v42, 9  ;;  %v2268_v41 = vld [vmem:[#allocation2 + $0x8] sm:$0xe]  ;;  %v2297_v26 = vrot.slane %v5817_v59, 5 }
 0x33b   : > { %v2302_v31 = vsel %vm5287_vm0, %v4408_v1, %v2301_v27  ;;  %v4407_v28 = vrot.slane %v2268_v41, 9  ;;  %v5824_v54 = vld [vmem:[#allocation2 + $0xc] sm:$0x1]  ;;  %v5826_v7 = vld [vmem:[#allocation2 + $0x14] sm:$0x1] }
 0x33c   : > { %2813 = vrot.lane.b32.xlu0 %v4451_v51, %s4880_s13  ;;  %2839 = vrot.lane.b32.xlu1 %v4454_v6, %s4876_s29  ;;  %v2451_v32 = vld [vmem:[#allocation2 + $0x8] sm:$0xe]  ;;  %v2452_v13 = vld [vmem:[#allocation2 + $0x10] sm:$0xe]  ;;  %v2477_v36 = vrot.slane %v5824_v54, 5  ;;  %v2481_v12 = vrot.slane %v5826_v7, 5  ;;  %v2306_v39 = vsel %vm5287_vm0, %v4409_v55, %v2305_v44 }
 0x33d   : > { %v2298_v20 = vsel %vm5287_vm0, %v4407_v28, %v2297_v26  ;;  %v4414_v38 = vrot.slane %v2451_v32, 9  ;;  %v4415_v21 = vrot.slane %v2452_v13, 9  ;;  %v5842_v9 = vld [vmem:[#allocation2 + $0x14] sm:$0x1]  ;;  %v5844_v29 = vld [vmem:[#allocation2 + $0x1c] sm:$0x1]  ;;  %v4439_v3 = vcombine.low %v2302_v31, %v2306_v39 }
 0x33e   : > { %v4438_v16 = vcombine.low %v2294_v25, %v2298_v20  ;;  %v2635_v8 = vld [vmem:[#allocation2 + $0x10] sm:$0xe]  ;;  %v2636_v42 = vld [vmem:[#allocation2 + $0x18] sm:$0xe]  ;;  %v2661_v1 = vrot.slane %v5842_v9, 5  ;;  %v2665_v27 = vrot.slane %v5844_v29, 5 }
 0x33f   : > { %v2524_v44 = vshrl.u32 %v5799_v17, 16  ;;  %v2482_v51 = vsel %vm5287_vm0, %v4415_v21, %v2481_v12  ;;  %v4422_v6 = vrot.slane %v2635_v8, 9  ;;  %v4423_v55 = vrot.slane %v2636_v42, 9  ;;  %v5851_v41 = vld [vmem:[#allocation2 + $0x8] sm:$0xf] }
 0x340   : > { %v4651_v28 = vpop.f32.mrb[4].mxu1  ;;  %v2527_v26 = vshll.u32 %v5799_v17, 16  ;;  %2745 = vrot.lane.b32.xlu0 %v4439_v3, %s4877_s9  ;;  %2743 = vrot.lane.b32.xlu1 %v4438_v16, %s4877_s9  ;;  %v2478_v31 = vsel %vm5287_vm0, %v4414_v38, %v2477_v36  ;;  %v2170_v25 = vshrl.u32 %v5851_v41, 16  ;;  %v2370_v32 = vrot.slane %v2368_v5, 4  ;;  %v1961_v3 = vpop.permute.xlu1 %1960  ;;  %v2133_v11 = vld [vmem:[#allocation2 + $0x40] sm:$0xf] }
 0x341   : > { %v1934_v13 = vadd.f32 %v4651_v28, %v5718_v4  ;;  %v1925_v12 = vpop.f32.mrb[5].mxu1  ;;  %v4450_v39 = vcombine.low %v2478_v31, %v2482_v51  ;;  %v2662_v20 = vsel %vm5287_vm0, %v4422_v6, %v2661_v1  ;;  %v2173_v21 = vshll.u32 %v5851_v41, 16  ;;  %v1963_v6 = vpop.permute.xlu0 %1962  ;;  %v5994_v63 = vld [vmem:[#allocation2 + $0x18] sm:$0xf] }
 0x342   : > { %v1926_v16 = vadd.f32 %v5718_v4, %v1925_v12  ;;  %v4652_v8 = vpop.f32.mrb[6].mxu1  ;;  %v2666_v36 = vsel %vm5287_vm0, %v4423_v55, %v2665_v27  ;;  %v2172_v38 = vrot.slane %v2170_v25, 4  ;;  %v2179_v42 = vshll.u32 %v5817_v59, 16 }
 0x343   : > { %v5869_v5 = vadd.f32 %v1961_v3, %v1934_v13  ;;  %v1937_v28 = vadd.f32 %v4652_v8, %v5718_v4  ;;  %v1928_v51 = vpop.f32.mrb[7].mxu1  ;;  %v2175_v31 = vrot.slane %v2173_v21, 5  ;;  %v2373_v1 = vrot.slane %v2371_v52, 5 }
 0x344   : > { %v5874_v33 = vadd.f32 %v1957_v0, %v1926_v16  ;;  %v1929_v12 = vadd.f32 %v5718_v4, %v1928_v51  ;;  %2811 = vrot.lane.b32.xlu1 %v4450_v39, %s4880_s13  ;;  %v4462_v27 = vcombine.low %v2662_v20, %v2666_v36  ;;  %v2377_v55 = vshll.u32 %v5774_v60, 16 }
 0x345   : > { %v4573_v59 = vpack.c.bf16 %v5869_v5, %v5869_v5  ;;  %v5881_v25 = vadd.f32 %v1963_v6, %v1937_v28  ;;  %v2176_v13 = vor.u32 %v2175_v31, %v2172_v38  ;;  %v2374_v21 = vor.u32 %v2373_v1, %v2370_v32 }
 0x346   : > { %v4571_v48 = vpack.c.bf16 %v5874_v33, %v5874_v33  ;;  %v5885_v52 = vadd.f32 %v1959_v62, %v1929_v12  ;;  %v2181_v0 = vrot.slane %v2179_v42, 5  ;;  %v5887_v3 = vrot.slane %v2377_v55, 5  ;;  %v2127_v55 = vld [vmem:[#allocation2 + $0x38] sm:$0xf] }
 0x347   : > { %v2061_v4 = vshrl.u32 %v4573_v59, 16  ;;  %v4574_v39 = vpack.c.bf16 %v5881_v25, %v5881_v25  ;;  %v2177_v60 = vrot.slane %v2176_v13, 4  ;;  %v2384_v20 = vrot.slane %v2382_v2, 4  ;;  %v2130_v13 = vld [vmem:[#allocation2 + $0x3c] sm:$0x1] }
 0x348   : > { %v2064_v16 = vshll.u32 %v4573_v59, 16  ;;  %v2045_v8 = vshrl.u32 %v4571_v48, 16  ;;  %v2048_v36 = vshll.u32 %v4571_v48, 16  ;;  %v4572_v32 = vpack.c.bf16 %v5885_v52, %v5885_v52  ;;  %2879 = vrot.lane.b32.xlu1 %v4462_v27, %s4881_s16 }
 0x349   : > { %v2063_v62 = vrot.slane %v2061_v4, 7  ;;  %v2069_v38 = vshrl.u32 %v4574_v39, 16  ;;  %v2182_v42 = vsel %vm5047_vm2, %v2177_v60, %v2181_v0  ;;  %v5898_v28 = vrot.slane %v2374_v21, 4 }
 0x34a   : > { %v2047_v51 = vrot.slane %v2045_v8, 7  ;;  %v2072_v31 = vshll.u32 %v4574_v39, 16  ;;  %v2053_v1 = vshrl.u32 %v4572_v32, 16  ;;  %v4434_v2 = vcombine.low %v2168_v53, %v2182_v42  ;;  %v2118_v53 = vld [vmem:[#allocation2 + $0x2c] sm:$0x1] }
 0x34b   : > { %v2066_v6 = vor.u32 %v2064_v16, %v2063_v62  ;;  %v2067_v12 = vrot.slane %v2063_v62, 4  ;;  %v2071_v27 = vrot.slane %v2069_v38, 7  ;;  %v2056_v59 = vshll.u32 %v4572_v32, 16 }
 0x34c   : > { %v2050_v48 = vor.u32 %v2048_v36, %v2047_v51  ;;  %v2051_v4 = vrot.slane %v2047_v51, 4  ;;  %v2055_v0 = vrot.slane %v2053_v1, 7  ;;  %2723 = vrot.lane.b32.xlu1 %v4434_v2, %s4882_s28  ;;  %v2387_v21 = vrot.slane %v2385_v37, 5  ;;  %v2136_v37 = vld [vmem:[#allocation2 + $0x44] sm:$0x1] }
 0x34d   : > { %v2128_v39 = vsel %vm5248_vm15, %v2066_v6, %v2127_v55  ;;  %v2131_v19 = vsel %vm5149_vm5, %v2067_v12, %v2130_v13  ;;  %v2074_v60 = vor.u32 %v2072_v31, %v2071_v27  ;;  %v2075_v16 = vrot.slane %v2071_v27, 4  ;;  %v2121_v51 = vld [vmem:[#allocation2 + $0x30] sm:$0xf]  ;;  %v2124_v31 = vld [vmem:[#allocation2 + $0x34] sm:$0x1] }
 0x34e   : > { %2132 = vst [vmem:[#allocation2 + $0x3c] sm:$0x1] %v2131_v19  ;;  %2129 = vst [vmem:[#allocation2 + $0x38] sm:$0xf] %v2128_v39  ;;  %v2116_v8 = vsel %vm5248_vm15, %v2050_v48, %v2115_v34  ;;  %v2119_v36 = vsel %vm5149_vm5, %v2051_v4, %v2118_v53  ;;  %v2058_v32 = vor.u32 %v2056_v59, %v2055_v0  ;;  %v2059_v62 = vrot.slane %v2055_v0, 4 }
 0x34f   : > { %2120 = vst [vmem:[#allocation2 + $0x2c] sm:$0x1] %v2119_v36  ;;  %2117 = vst [vmem:[#allocation2 + $0x28] sm:$0xf] %v2116_v8  ;;  %v2134_v38 = vsel %vm5248_vm15, %v2074_v60, %v2133_v11  ;;  %v2137_v42 = vsel %vm5149_vm5, %v2075_v16, %v2136_v37  ;;  %v2388_v1 = vor.u32 %v2387_v21, %v2384_v20  ;;  %v2391_v2 = vshll.u32 %v5782_v46, 16 }
 0x350   : > { %2135 = vst [vmem:[#allocation2 + $0x40] sm:$0xf] %v2134_v38  ;;  %2138 = vst [vmem:[#allocation2 + $0x44] sm:$0x1] %v2137_v42  ;;  %v2122_v6 = vsel %vm5248_vm15, %v2058_v32, %v2121_v51  ;;  %v2125_v12 = vsel %vm5149_vm5, %v2059_v62, %v2124_v31  ;;  %v2340_v55 = vshrl.u32 %v5788_v30, 16  ;;  %v2343_v27 = vshll.u32 %v5788_v30, 16 }
 0x351   : > { %v5927_v59 = vld [vmem:[#allocation2 + $0x10] sm:$0xf]  ;;  %2126 = vst [vmem:[#allocation2 + $0x34] sm:$0x1] %v2125_v12  ;;  %2123 = vst [vmem:[#allocation2 + $0x30] sm:$0xf] %v2122_v6 }
 0x352   : > { %v5929_v13 = vld [vmem:[#allocation2 + $0x20] sm:$0xf]  ;;  %v2389_v20 = vrot.slane %v2388_v1, 4  ;;  %v2393_v46 = vrot.slane %v2391_v2, 5  ;;  %v2349_v48 = vshll.u32 %v5824_v54, 16  ;;  %v2356_v4 = vrot.slane %v2354_v45, 4 }
 0x353   : > { %v2342_v0 = vrot.slane %v2340_v55, 4  ;;  %v2345_v21 = vrot.slane %v2343_v27, 5  ;;  %v2359_v39 = vrot.slane %v2357_v23, 5  ;;  %v2363_v30 = vshll.u32 %v5826_v7, 16  ;;  %v4781_v45 = vld [vmem:[%s6796_s3] sm:$0xff]   ;;  %v4782_v55 = vld [vmem:[%s6796_s3 + $0x8] sm:$0xff]  }
 0x354   : > { %v2538_v19 = vshrl.u32 %v5806_v43, 16  ;;  %v2394_v34 = vsel %vm5047_vm2, %v2389_v20, %v2393_v46  ;;  %v2184_v53 = vshrl.u32 %v5927_v59, 16  ;;  %v2187_v60 = vshll.u32 %v5927_v59, 16  ;;  %4653 = vmatprep.subr.bf16.mxu0 %v4781_v45 }
 0x355   : > { %v2541_v54 = vshll.u32 %v5806_v43, 16  ;;  %v2552_v18 = vshrl.u32 %v5929_v13, 16  ;;  %v2555_v23 = vshll.u32 %v5929_v13, 16  ;;  %v2380_v7 = vsel %vm5047_vm2, %v5898_v28, %v5887_v3  ;;  %v5952_v16 = vld [vmem:[#allocation2 + $0x38] sm:$0xf]  ;;  %4654 = vmatpush3.bf16.msra.mxu0 %v4781_v45 }
 0x356   : > { %v5954_v8 = vcombine.low %v2380_v7, %v2394_v34  ;;  %v2351_v36 = vrot.slane %v2349_v48, 5  ;;  %v2186_v11 = vrot.slane %v2184_v53, 4  ;;  %v2189_v37 = vrot.slane %v2187_v60, 5  ;;  %v5956_v32 = vld [vmem:[#allocation2 + $0x28] sm:$0xf]  ;;  %4655 = vmatprep.subr.bf16.mxu0 %v4782_v55 }
 0x357   : > { %v5959_v38 = vld [vmem:[#allocation2 + $0x28] sm:$0xf]  ;;  %v5961_v42 = vld [vmem:[#allocation2 + $0x38] sm:$0xf]  ;;  %v2346_v51 = vor.u32 %v2345_v21, %v2342_v0  ;;  %v2360_v31 = vor.u32 %v2359_v39, %v2356_v4  ;;  %v2365_v1 = vrot.slane %v2363_v30, 5  ;;  %v4455_v3 = vcombine.low %v5929_v13, %v5956_v32 }
 0x358   : > { %v2566_v28 = vshrl.u32 %v5956_v32, 16  ;;  %v2569_v2 = vshll.u32 %v5956_v32, 16  ;;  %v5967_v6 = vld [vmem:[#allocation2 + $0x40] sm:$0xf]  ;;  %v5977_v48 = vld [vmem:[#allocation2 + $0x30] sm:$0xf]  ;;  %v2190_v53 = vor.u32 %v2189_v37, %v2186_v11 }
 0x359   : > { %v4445_v46 = vcombine.low %v5952_v16, %v5967_v6  ;;  %v2396_v4 = vshrl.u32 %v5959_v38, 16  ;;  %2841 = vrot.lane.b32.xlu0 %v4455_v3, %s4876_s29  ;;  %v4444_v21 = vcombine.low %v5959_v38, %v5977_v48  ;;  %v5985_v30 = vld [vmem:[#allocation2 + $0x40] sm:$0xf]  ;;  %v5987_v34 = vld [vmem:[#allocation2 + $0x30] sm:$0xf]  ;;  %4656 = vmatpush3.bf16.msra.mxu0 %v4782_v55  ;;  %v2347_v45 = vrot.slane %v2346_v51, 4 }
 0x35a   : > { %v4457_v7 = vcombine.low %v5985_v30, %v5744_v58  ;;  %v4456_v11 = vcombine.low %v5987_v34, %v5961_v42  ;;  %v2361_v12 = vrot.slane %v2360_v31, 4  ;;  %v2191_v62 = vrot.slane %v2190_v53, 4  ;;  %v2457_v53 = vld [vmem:[#allocation2 + $0x38] sm:$0xe]  ;;  %v6018_v39 = vld [vmem:[#allocation2 + $0x24] sm:$0x1] }
 0x35b   : > { %2775 = vrot.lane.b32.xlu1 %v4444_v21, %s4879_s12  ;;  %v2193_v58 = vshll.u32 %v5801_v57, 16  ;;  %v2198_v55 = vshrl.u32 %v5994_v63, 16  ;;  %v2201_v21 = vshll.u32 %v5994_v63, 16  ;;  %v2207_v20 = vshll.u32 %v5808_v47, 16 }
 0x35c   : > { %v2526_v3 = vrot.slane %v2524_v44, 4  ;;  %v2352_v37 = vsel %vm5047_vm2, %v2347_v45, %v2351_v36  ;;  %v2366_v51 = vsel %vm5047_vm2, %v2361_v12, %v2365_v1  ;;  %v2529_v57 = vrot.slane %v2527_v26, 5  ;;  %v2458_v44 = vld [vmem:[#allocation2 + $0x40] sm:$0xe]  ;;  %v4784_v36 = vld [vmem:[%s6796_s3 + $0x10] sm:$0xff]  }
 0x35d   : > { %2777 = vrot.lane.b32.xlu0 %v4445_v46, %s4879_s12  ;;  %v2195_v31 = vrot.slane %v2193_v58, 5  ;;  %v6015_v46 = vld [vmem:[#allocation2 + $0x3c] sm:$0x1]  ;;  %v4446_v27 = vcombine.low %v2352_v37, %v2366_v51  ;;  %v2200_v47 = vrot.slane %v2198_v55, 4  ;;  %v2203_v60 = vrot.slane %v2201_v21, 5  ;;  %4657 = vmatprep.subr.bf16.mxu0 %v4784_v36 }
 0x35e   : > { %v2209_v0 = vrot.slane %v2207_v20, 5  ;;  %v2530_v26 = vor.u32 %v2529_v57, %v2526_v3  ;;  %v2533_v1 = vshll.u32 %v5842_v9, 16  ;;  %v2540_v12 = vrot.slane %v2538_v19, 4  ;;  %v6028_v45 = vld [vmem:[#allocation2 + $0x44] sm:$0x1]  ;;  %v4785_v9 = vld [vmem:[%s6796_s3 + $0x18] sm:$0xff]   ;;  %4658 = vmatpush3.bf16.msra.mxu0 %v4784_v36 }
 0x35f   : > { %2843 = vrot.lane.b32.xlu1 %v4456_v11, %s4876_s29  ;;  %v2196_v17 = vsel %vm5047_vm2, %v2191_v62, %v2195_v31  ;;  %v2637_v11 = vld [vmem:[#allocation2 + $0x20] sm:$0xe]  ;;  %v2204_v20 = vor.u32 %v2203_v60, %v2200_v47  ;;  %v2543_v37 = vrot.slane %v2541_v54, 5  ;;  %v2547_v58 = vshll.u32 %v5844_v29, 16  ;;  %v6034_v21 = vld [vmem:[#allocation2 + $0x2c] sm:$0x1]  ;;  %4659 = vmatprep.subr.bf16.mxu0 %v4785_v9 }
 0x360   : > { %v4420_v55 = vrot.slane %v2457_v53, 9  ;;  %v2531_v19 = vrot.slane %v2530_v26, 4  ;;  %v2535_v62 = vrot.slane %v2533_v1, 5  ;;  %v2501_v3 = vrot.slane %v6015_v46, 5  ;;  %v6042_v31 = vld [vmem:[#allocation2 + $0x34] sm:$0x1] }
 0x361   : > { %2845 = vrot.lane.b32.xlu0 %v4457_v7, %s4876_s29  ;;  %v4421_v51 = vrot.slane %v2458_v44, 9  ;;  %v2638_v7 = vld [vmem:[#allocation2 + $0x28] sm:$0xe]  ;;  %v2205_v43 = vrot.slane %v2204_v20, 4  ;;  %v2544_v54 = vor.u32 %v2543_v37, %v2540_v12  ;;  %v2549_v29 = vrot.slane %v2547_v58, 5 }
 0x362   : > { %v2505_v60 = vrot.slane %v6028_v45, 5  ;;  %v2536_v57 = vsel %vm5047_vm2, %v2531_v19, %v2535_v62  ;;  %v2502_v53 = vsel %vm5287_vm0, %v4420_v55, %v2501_v3  ;;  %v4424_v47 = vrot.slane %v2637_v11, 9  ;;  %v2273_v36 = vld [vmem:[#allocation2 + $0x30] sm:$0xe]  ;;  %v2274_v26 = vld [vmem:[#allocation2 + $0x38] sm:$0xe]  ;;  %4660 = vmatpush3.bf16.msra.mxu0 %v4785_v9 }
 0x363   : > { %2791 = vrot.lane.b32.xlu1 %v4446_v27, %s4875_s18  ;;  %v2669_v44 = vrot.slane %v6018_v39, 5  ;;  %v2210_v27 = vsel %vm5047_vm2, %v2205_v43, %v2209_v0  ;;  %v2545_v1 = vrot.slane %v2544_v54, 4  ;;  %v4425_v20 = vrot.slane %v2638_v7, 9  ;;  %v6055_v37 = vld [vmem:[#allocation2 + $0x3c] sm:$0x1] }
 0x364   : > { %v2506_v12 = vsel %vm5287_vm0, %v4421_v51, %v2505_v60  ;;  %v2271_v58 = vld [vmem:[#allocation2 + $0x20] sm:$0xe]  ;;  %v4435_v55 = vcombine.low %v2196_v17, %v2210_v27  ;;  %v2673_v62 = vrot.slane %v6034_v21, 5  ;;  %v6060_v3 = vld [vmem:[#allocation2 + $0x24] sm:$0x1]  ;;  %v4412_v43 = vrot.slane %v2273_v36, 9 }
 0x365   : > { %2793 = vrot.lane.b32.xlu0 %v5954_v8, %s4875_s18  ;;  %v4453_v11 = vcombine.low %v2502_v53, %v2506_v12  ;;  %v2670_v19 = vsel %vm5287_vm0, %v4424_v47, %v2669_v44  ;;  %v2272_v8 = vld [vmem:[#allocation2 + $0x28] sm:$0xe]  ;;  %v2550_v0 = vsel %vm5047_vm2, %v2545_v1, %v2549_v29  ;;  %v2317_v51 = vrot.slane %v6042_v31, 5  ;;  %v6065_v54 = vld [vmem:[#allocation2 + $0x2c] sm:$0x1] }
 0x366   : > { %v4413_v7 = vrot.slane %v2274_v26, 9  ;;  %v4458_v17 = vcombine.low %v2536_v57, %v2550_v0  ;;  %v2674_v60 = vsel %vm5287_vm0, %v4425_v20, %v2673_v62  ;;  %v2321_v53 = vrot.slane %v6055_v37, 5  ;;  %v6074_v27 = vld [vmem:[#allocation2 + $0x2c] sm:$0x1]  ;;  %v2455_v20 = vld [vmem:[#allocation2 + $0x28] sm:$0xe] }
 0x367   : > { %v4410_v47 = vrot.slane %v2271_v58, 9  ;;  %v4463_v44 = vcombine.low %v2670_v19, %v2674_v60  ;;  %v2318_v9 = vsel %vm5287_vm0, %v4412_v43, %v2317_v51  ;;  %v2309_v29 = vrot.slane %v6060_v3, 5  ;;  %v6092_v0 = vld [vmem:[%s6796_s3 + $0x20] ss:$0 sps:$4 sm:$0xff]   ;;  %v2336_v51 = vld [vmem:[#allocation2 + $0x34] sm:$0x1] }
 0x368   : > { %v4411_v36 = vrot.slane %v2272_v8, 9  ;;  %2859 = vrot.lane.b32.xlu1 %v4458_v17, %s4883_s14  ;;  %v2322_v57 = vsel %vm5287_vm0, %v4413_v7, %v2321_v53  ;;  %v2313_v26 = vrot.slane %v6065_v54, 5  ;;  %v2554_v1 = vrot.slane %v2552_v18, 4  ;;  %v2456_v8 = vld [vmem:[#allocation2 + $0x30] sm:$0xe]  ;;  %4690 = vmatprep.subr.msk.bf16.mxu0 %vm1871_vm1, %v6092_v0 }
 0x369   : > { %2725 = vrot.lane.b32.xlu0 %v4435_v55, %s4882_s28  ;;  %v2557_v12 = vrot.slane %v2555_v23, 5  ;;  %v4441_v58 = vcombine.low %v2318_v9, %v2322_v57  ;;  %v2310_v55 = vsel %vm5287_vm0, %v4410_v47, %v2309_v29  ;;  %v2561_v19 = vshll.u32 %v6018_v39, 16  ;;  %v6099_v39 = vld [vmem:[#allocation2 + $0x20] sm:$0xf]  ;;  %v6103_v53 = vld [vmem:[#allocation2 + $0x28] sm:$0xf] }
 0x36a   : > { %v2568_v62 = vrot.slane %v2566_v28, 4  ;;  %v2314_v13 = vsel %vm5287_vm0, %v4411_v36, %v2313_v26  ;;  %v2571_v23 = vrot.slane %v2569_v2, 5  ;;  %v2575_v43 = vshll.u32 %v6034_v21, 16 }
 0x36b   : > { %v2558_v18 = vor.u32 %v2557_v12, %v2554_v1  ;;  %v4440_v28 = vcombine.low %v2310_v55, %v2314_v13  ;;  %v2563_v7 = vrot.slane %v2561_v19, 5  ;;  %v4418_v17 = vrot.slane %v2455_v20, 9 }
 0x36c   : > { %v2493_v60 = vrot.slane %v6074_v27, 5  ;;  %2881 = vrot.lane.b32.xlu1 %v4463_v44, %s4881_s16  ;;  %v2572_v2 = vor.u32 %v2571_v23, %v2568_v62  ;;  %v2577_v21 = vrot.slane %v2575_v43, 5  ;;  %v4419_v47 = vrot.slane %v2456_v8, 9 }
 0x36d   : > { %2817 = vrot.lane.b32.xlu0 %v4453_v11, %s4880_s13  ;;  %v2559_v32 = vrot.slane %v2558_v18, 4  ;;  %v2497_v11 = vrot.slane %v2336_v51, 5  ;;  %v2212_v29 = vshrl.u32 %v6099_v39, 16  ;;  %v2215_v36 = vshll.u32 %v6099_v39, 16 }
 0x36e   : > { %v2494_v9 = vsel %vm5287_vm0, %v4418_v17, %v2493_v60  ;;  %v2573_v26 = vrot.slane %v2572_v2, 4  ;;  %v2221_v1 = vshll.u32 %v6060_v3, 16  ;;  %v2226_v44 = vshrl.u32 %v6103_v53, 16 }
 0x36f   : > { %v2564_v57 = vsel %vm5047_vm2, %v2559_v32, %v2563_v7  ;;  %v2498_v12 = vsel %vm5287_vm0, %v4419_v47, %v2497_v11  ;;  %v2214_v20 = vrot.slane %v2212_v29, 4  ;;  %v2217_v55 = vrot.slane %v2215_v36, 5 }
 0x370   : > { %v2229_v19 = vshll.u32 %v6103_v53, 16  ;;  %2747 = vrot.lane.b32.xlu1 %v4440_v28, %s4877_s9  ;;  %v2578_v62 = vsel %vm5047_vm2, %v2573_v26, %v2577_v21  ;;  %v4452_v8 = vcombine.low %v2494_v9, %v2498_v12  ;;  %v2223_v13 = vrot.slane %v2221_v1, 5 }
 0x371   : > { %2749 = vrot.lane.b32.xlu0 %v4441_v58, %s4877_s9  ;;  %v2228_v18 = vrot.slane %v2226_v44, 4  ;;  %v4459_v3 = vcombine.low %v2564_v57, %v2578_v62  ;;  %v2218_v23 = vor.u32 %v2217_v55, %v2214_v20  ;;  %v2235_v58 = vshll.u32 %v6065_v54, 16 }
 0x372   : > { %v2231_v43 = vrot.slane %v2229_v19, 5  ;;  %v2398_v7 = vrot.slane %v2396_v4, 4  ;;  %v6819_v17 = vshll.u32 %v5959_v38, 16  ;;  %v2405_v32 = vshll.u32 %v6074_v27, 16 }
 0x373   : > { %v6820_v28 = vshrl.u32 %v5977_v48, 16  ;;  %v2219_v21 = vrot.slane %v2218_v23, 4  ;;  %v2237_v9 = vrot.slane %v2235_v58, 5  ;;  %v6821_v11 = vshll.u32 %v5977_v48, 16  ;;  %v2519_v23 = vld [vmem:[#allocation2 + $0x34] sm:$0x1] }
 0x374   : > { %v2401_v60 = vrot.slane %v6819_v17, 5  ;;  %v2232_v47 = vor.u32 %v2231_v43, %v2228_v18  ;;  %2815 = vrot.lane.b32.xlu1 %v4452_v8, %s4880_s13  ;;  %v2407_v4 = vrot.slane %v2405_v32, 5  ;;  %v2419_v36 = vshll.u32 %v2336_v51, 16  ;;  %v2520_v32 = vld [vmem:[#allocation2 + $0x3c] sm:$0x1] }
 0x375   : > { %v2412_v2 = vrot.slane %v6820_v28, 4  ;;  %2861 = vrot.lane.b32.xlu0 %v4459_v3, %s4883_s14  ;;  %v2415_v29 = vrot.slane %v6821_v11, 5  ;;  %v6822_v38 = vshrl.u32 %v5952_v16, 16  ;;  %v2224_v27 = vsel %vm5047_vm2, %v2219_v21, %v2223_v13 }
 0x376   : > { %v2402_v54 = vor.u32 %v2401_v60, %v2398_v7  ;;  %v2233_v26 = vrot.slane %v2232_v47, 4  ;;  %v6823_v44 = vshll.u32 %v5952_v16, 16  ;;  %v2421_v55 = vrot.slane %v2419_v36, 5 }
 0x377   : > { %v2426_v57 = vrot.slane %v6822_v38, 4  ;;  %v2416_v1 = vor.u32 %v2415_v29, %v2412_v2  ;;  %v2433_v48 = vshll.u32 %v6015_v46, 16  ;;  %v6824_v19 = vshrl.u32 %v5967_v6, 16 }
 0x378   : > { %v2429_v12 = vrot.slane %v6823_v44, 5  ;;  %v2403_v20 = vrot.slane %v2402_v54, 4  ;;  %v2238_v51 = vsel %vm5047_vm2, %v2233_v26, %v2237_v9  ;;  %v6825_v3 = vshll.u32 %v5967_v6, 16  ;;  %v6156_v6 = vld [vmem:[#allocation2 + $0x30] sm:$0xf] }
 0x379   : > { %v2440_v62 = vrot.slane %v6824_v19, 4  ;;  %v2417_v8 = vrot.slane %v2416_v1, 4  ;;  %v2611_v43 = vshll.u32 %v5985_v30, 16  ;;  %v4436_v16 = vcombine.low %v2224_v27, %v2238_v51  ;;  %v6168_v44 = vld [vmem:[#allocation2 + $0x38] sm:$0xf] }
 0x37a   : > { %v2430_v18 = vor.u32 %v2429_v12, %v2426_v57  ;;  %v2443_v13 = vrot.slane %v6825_v3, 5  ;;  %v2408_v58 = vsel %vm5047_vm2, %v2403_v20, %v2407_v4  ;;  %v2447_v46 = vshll.u32 %v6028_v45, 16 }
 0x37b   : > { %v2422_v7 = vsel %vm5047_vm2, %v2417_v8, %v2421_v55  ;;  %v6826_v28 = vshrl.u32 %v5987_v34, 16  ;;  %2727 = vrot.lane.b32.xlu0 %v4436_v16, %s4882_s28  ;;  %v2435_v47 = vrot.slane %v2433_v48, 5  ;;  %v6827_v9 = vshll.u32 %v5987_v34, 16 }
 0x37c   : > { %v2431_v17 = vrot.slane %v2430_v18, 4  ;;  %v2444_v60 = vor.u32 %v2443_v13, %v2440_v62  ;;  %v4448_v21 = vcombine.low %v2408_v58, %v2422_v7  ;;  %v2589_v29 = vshll.u32 %v2519_v23, 16  ;;  %v2640_v58 = vld [vmem:[#allocation2 + $0x38] sm:$0xe] }
 0x37d   : > { %v2582_v2 = vrot.slane %v6826_v28, 4  ;;  %v2585_v11 = vrot.slane %v6827_v9, 5  ;;  %v2449_v54 = vrot.slane %v2447_v46, 5  ;;  %v6828_v4 = vshrl.u32 %v5961_v42, 16 }
 0x37e   : > { %v2445_v45 = vrot.slane %v2444_v60, 4  ;;  %v6829_v38 = vshll.u32 %v5961_v42, 16  ;;  %2795 = vrot.lane.b32.xlu1 %v4448_v21, %s4875_s18  ;;  %v2436_v27 = vsel %vm5047_vm2, %v2431_v17, %v2435_v47  ;;  %v2603_v1 = vshll.u32 %v2520_v32, 16  ;;  %v2639_v42 = vld [vmem:[#allocation2 + $0x30] sm:$0xe] }
 0x37f   : > { %v2596_v36 = vrot.slane %v6828_v4, 4  ;;  %v2586_v26 = vor.u32 %v2585_v11, %v2582_v2  ;;  %v2240_v34 = vshrl.u32 %v6156_v6, 16  ;;  %v2591_v20 = vrot.slane %v2589_v29, 5  ;;  %v2521_v47 = vld [vmem:[#allocation2 + $0x44] sm:$0x1] }
 0x380   : > { %v2599_v57 = vrot.slane %v6829_v38, 5  ;;  %v2450_v12 = vsel %vm5047_vm2, %v2445_v45, %v2449_v54  ;;  %v2243_v48 = vshll.u32 %v6156_v6, 16  ;;  %v2249_v8 = vshll.u32 %v6042_v31, 16 }
 0x381   : > { %v4449_v19 = vcombine.low %v2436_v27, %v2450_v12  ;;  %v2587_v62 = vrot.slane %v2586_v26, 4  ;;  %v2242_v51 = vrot.slane %v2240_v34, 4  ;;  %v2605_v3 = vrot.slane %v2603_v1, 5 }
 0x382   : > { %v2600_v55 = vor.u32 %v2599_v57, %v2596_v36  ;;  %v2245_v13 = vrot.slane %v2243_v48, 5  ;;  %v2254_v16 = vshrl.u32 %v6168_v44, 16  ;;  %v2257_v7 = vshll.u32 %v6168_v44, 16 }
 0x383   : > { %2797 = vrot.lane.b32.xlu0 %v4449_v19, %s4875_s18  ;;  %v2592_v46 = vsel %vm5047_vm2, %v2587_v62, %v2591_v20  ;;  %v2263_v17 = vshll.u32 %v6055_v37, 16  ;;  %v4426_v60 = vrot.slane %v2639_v42, 9  ;;  %v2677_v21 = vrot.slane %v2519_v23, 5  ;;  %v2642_v42 = vld [vmem:[#allocation2 + $0x48] sm:$0xe] }
 0x384   : > { %v2601_v18 = vrot.slane %v2600_v55, 4  ;;  %v2246_v31 = vor.u32 %v2245_v13, %v2242_v51  ;;  %v2256_v2 = vrot.slane %v2254_v16, 4  ;;  %v2259_v11 = vrot.slane %v2257_v7, 5 }
 0x385   : > { %v4427_v29 = vrot.slane %v2640_v58, 9  ;;  %v6830_v45 = vor.u32 %v5777_v22, %v5768_v10  ;;  %v2678_v36 = vsel %vm5287_vm0, %v4426_v60, %v2677_v21  ;;  %v2681_v37 = vrot.slane %v2520_v32, 5 }
 0x386   : > { %v2606_v28 = vsel %vm5047_vm2, %v2601_v18, %v2605_v3  ;;  %v2247_v4 = vrot.slane %v2246_v31, 4  ;;  %v6831_v38 = vshrl.u32 %v5985_v30, 16  ;;  %v2251_v27 = vrot.slane %v2249_v8, 5 }
 0x387   : > { %v4460_v9 = vcombine.low %v2592_v46, %v2606_v28  ;;  %v2629_v54 = vrot.slane %v6830_v45, 4  ;;  %v2260_v23 = vor.u32 %v2259_v11, %v2256_v2  ;;  %v2613_v26 = vrot.slane %v2611_v43, 5  ;;  %v2641_v43 = vld [vmem:[#allocation2 + $0x40] sm:$0xe] }
 0x388   : > { %v2610_v57 = vrot.slane %v6831_v38, 4  ;;  %v2617_v1 = vshll.u32 %v2521_v47, 16  ;;  %v2265_v34 = vrot.slane %v2263_v17, 5  ;;  %v2682_v12 = vsel %vm5287_vm0, %v4427_v29, %v2681_v37 }
 0x389   : > { %2863 = vrot.lane.b32.xlu1 %v4460_v9, %s4883_s14  ;;  %v6832_v10 = vshll.u32 %v5770_v56, 16  ;;  %v3005_v20 = vsel %vm1871_vm1, %v6092_v0, 0  ;;  %v2252_v30 = vsel %vm5047_vm2, %v2247_v4, %v2251_v27  ;;  %v2261_v32 = vrot.slane %v2260_v23, 4 }
 0x38a   : > { %v4464_v55 = vcombine.low %v2678_v36, %v2682_v12  ;;  %v2614_v48 = vor.u32 %v2613_v26, %v2610_v57  ;;  %4662 = vmatpush3.bf16.msra.mxu0 %v3005_v20  ;;  %v2619_v51 = vrot.slane %v2617_v1, 5  ;;  %v4429_v18 = vrot.slane %v2642_v42, 9 }
 0x38b   : > { %v2633_v22 = vrot.slane %v6832_v10, 5  ;;  %v2266_v19 = vsel %vm5047_vm2, %v2261_v32, %v2265_v34  ;;  %v2689_v0 = vrot.slane %v5770_v56, 5  ;;  %v4428_v16 = vrot.slane %v2641_v43, 9 }
 0x38c   : > { %v2615_v62 = vrot.slane %v2614_v48, 4  ;;  %v4437_v8 = vcombine.low %v2252_v30, %v2266_v19  ;;  %v2685_v58 = vrot.slane %v2521_v47, 5 }
 0x38d   : > { %2883 = vrot.lane.b32.xlu1 %v4464_v55, %s4881_s16  ;;  %v2634_v13 = vsel %vm5047_vm2, %v2629_v54, %v2633_v22  ;;  %v2690_v17 = vsel %vm5287_vm0, %v4429_v18, %v2689_v0  ;;  %v4808_v54 = vld [vmem:[#allocation2] sm:$0xf]  ;;  %v4431_v22 = vcombine.low %v5927_v59, %v5994_v63 }
 0x38e   : > { %v2620_v3 = vsel %vm5047_vm2, %v2615_v62, %v2619_v51  ;;  %2729 = vrot.lane.b32.xlu0 %v4437_v8, %s4882_s28  ;;  %v2686_v7 = vsel %vm5287_vm0, %v4428_v16, %v2685_v58  ;;  %v4430_v4 = vcombine.low %v4808_v54, %v5851_v41  ;;  %v4432_v58 = vcombine.low %v6099_v39, %v6103_v53 }
 0x38f   : > { %v4461_v46 = vcombine.low %v2620_v3, %v2634_v13  ;;  %v4465_v56 = vcombine.low %v2686_v7, %v2690_v17  ;;  %v4433_v53 = vcombine.low %v6156_v6, %v6168_v44  ;;  %v6260_v44 = vld [vmem:[%s6798_s5 + $0x3] ss:$0 sm:$0xff] }
 0x392   : > { %2865 = vrot.lane.b32.xlu0 %v4461_v46, %s4883_s14 }
 0x396   : > { %2885 = vrot.lane.b32.xlu0 %v4465_v56, %s4881_s16 }
 0x3a9   : > { %v2774_v2 = vpop.permute.xlu0 %2773 }
 0x3aa   : > { %v2772_v60 = vpop.permute.xlu1 %2771 }
 0x3ae   : > { %v2840_v28 = vpop.permute.xlu1 %2839  ;;  %v2814_v47 = vpop.permute.xlu0 %2813 }
 0x3b2   : > { %v2744_v31 = vpop.permute.xlu1 %2743  ;;  %v2746_v11 = vpop.permute.xlu0 %2745 }
 0x3b6   : > { %v2812_v21 = vpop.permute.xlu1 %2811 }
 0x3ba   : > { %v2880_v9 = vpop.permute.xlu1 %2879 }
 0x3be   : > { %v2724_v29 = vpop.permute.xlu1 %2723 }
 0x3bf   : > { %v2889_v37 = vsel %vm1749_vm3, %v4430_v4, %v2724_v29 }
 0x3c0   : > { %v2900_v27 = vsel %vm660_vm8, %v2889_v37, %v2744_v31 }
 0x3c1   : > { %v2908_v26 = vsel %vm1770_vm4, %v2900_v27, %v2772_v60 }
 0x3cb   : > { %v2842_v45 = vpop.permute.xlu0 %2841 }
 0x3cd   : > { %v2776_v36 = vpop.permute.xlu1 %2775 }
 0x3cf   : > { %v2778_v38 = vpop.permute.xlu0 %2777 }
 0x3d1   : > { %v2844_v57 = vpop.permute.xlu1 %2843 }
 0x3d3   : > { %v2846_v23 = vpop.permute.xlu0 %2845 }
 0x3d5   : > { %v2792_v1 = vpop.permute.xlu1 %2791 }
 0x3d6   : > { %v2916_v34 = vsel %vm673_vm9, %v2908_v26, %v2792_v1 }
 0x3d7   : > { %v2794_v12 = vpop.permute.xlu0 %2793  ;;  %v2924_v10 = vsel %vm1787_vm6, %v2916_v34, %v2812_v21 }
 0x3d8   : > { %v2932_v41 = vsel %vm682_vm10, %v2924_v10, %v2840_v28 }
 0x3da   : > { %v2860_v32 = vpop.permute.xlu1 %2859 }
 0x3db   : > { %v2726_v20 = vpop.permute.xlu0 %2725  ;;  %v2940_v48 = vsel %vm1804_vm7, %v2932_v41, %v2860_v32 }
 0x3dc   : > { %v2892_v30 = vsel %vm1749_vm3, %v4431_v22, %v2726_v20  ;;  %v2948_v43 = vsel %vm723_vm11, %v2940_v48, %v2880_v9 }
 0x3dd   : > { %v2902_v55 = vsel %vm660_vm8, %v2892_v30, %v2746_v11  ;;  %4663 = vmatprep.mubr.msk.bf16.mxu0 %vm1862_vm12, %v2948_v43 }
 0x3de   : > { %v2910_v42 = vsel %vm1770_vm4, %v2902_v55, %v2774_v2  ;;  %v2882_v62 = vpop.permute.xlu1 %2881 }
 0x3df   : > { %v2818_v19 = vpop.permute.xlu0 %2817  ;;  %v2918_v63 = vsel %vm673_vm9, %v2910_v42, %v2794_v12 }
 0x3e0   : > { %v2926_v51 = vsel %vm1787_vm6, %v2918_v63, %v2814_v47 }
 0x3e1   : > { %v2934_v18 = vsel %vm682_vm10, %v2926_v51, %v2842_v45 }
 0x3e2   : > { %v2748_v8 = vpop.permute.xlu1 %2747 }
 0x3e3   : > { %v2750_v59 = vpop.permute.xlu0 %2749 }
 0x3e6   : > { %v2816_v16 = vpop.permute.xlu1 %2815 }
 0x3e7   : > { %v2862_v0 = vpop.permute.xlu0 %2861 }
 0x3e8   : > { %v2942_v3 = vsel %vm1804_vm7, %v2934_v18, %v2862_v0 }
 0x3e9   : > { %v2950_v13 = vsel %vm723_vm11, %v2942_v3, %v2882_v62 }
 0x3ea   : > { %4664 = vmatmul.mubr.msk.bf16.vlgmr.msra.gmra.mrb[8].mxu0 %vm1862_vm12, %v2950_v13  ;;  %v3247_v13 = vld [vmem:[#allocation2 + $0x4] sm:$0x1] }
 0x3ed   : > { %v2728_v46 = vpop.permute.xlu0 %2727 }
 0x3ee   : > { %v2895_v7 = vsel %vm1749_vm3, %v4432_v58, %v2728_v46 }
 0x3ef   : > { %v2904_v17 = vsel %vm660_vm8, %v2895_v7, %v2748_v8  ;;  %v3265_v7 = vshll.u32 %v3247_v13, 16 }
 0x3f0   : > { %v2912_v56 = vsel %vm1770_vm4, %v2904_v17, %v2776_v36  ;;  %v2796_v60 = vpop.permute.xlu1 %2795 }
 0x3f1   : > { %v2920_v28 = vsel %vm673_vm9, %v2912_v56, %v2796_v60 }
 0x3f2   : > { %v2928_v31 = vsel %vm1787_vm6, %v2920_v28, %v2816_v16 }
 0x3f3   : > { %v2936_v47 = vsel %vm682_vm10, %v2928_v31, %v2844_v57 }
 0x3f5   : > { %v2798_v21 = vpop.permute.xlu0 %2797 }
 0x3fb   : > { %v2864_v2 = vpop.permute.xlu1 %2863 }
 0x3fc   : > { %v2944_v9 = vsel %vm1804_vm7, %v2936_v47, %v2864_v2 }
 0x3ff   : > { %v2884_v11 = vpop.permute.xlu1 %2883 }
 0x400   : > { %v2952_v39 = vsel %vm723_vm11, %v2944_v9, %v2884_v11  ;;  %v2730_v29 = vpop.permute.xlu0 %2729  ;;  %v3206_v11 = vld [vmem:[#allocation2 + $0x1c] sm:$0x1] }
 0x401   : > { %4667 = vmatprep.mubr.msk.bf16.mxu0 %vm1862_vm12, %v2952_v39  ;;  %v2898_v45 = vsel %vm1749_vm3, %v4433_v53, %v2730_v29 }
 0x402   : > { %v2906_v54 = vsel %vm660_vm8, %v2898_v45, %v2750_v59 }
 0x403   : > { %v2914_v4 = vsel %vm1770_vm4, %v2906_v54, %v2778_v38  ;;  %v3239_v38 = vld [vmem:[#allocation2] sm:$0xf] }
 0x404   : > { %v2922_v36 = vsel %vm673_vm9, %v2914_v4, %v2798_v21  ;;  %v2866_v37 = vpop.permute.xlu0 %2865  ;;  %v3256_v41 = vshrl.u32 %v3239_v38, 16  ;;  %v3259_v20 = vshll.u32 %v3239_v38, 16  ;;  %v3203_v21 = vld [vmem:[#allocation2 + $0x18] sm:$0xf]  ;;  %v3212_v38 = vld [vmem:[#allocation2 + $0x24] sm:$0x1] }
 0x405   : > { %v2930_v57 = vsel %vm1787_vm6, %v2922_v36, %v2818_v19  ;;  %v3194_v36 = vld [vmem:[#allocation2 + $0xc] sm:$0x1] }
 0x406   : > { %v2938_v27 = vsel %vm682_vm10, %v2930_v57, %v2846_v23  ;;  %v3258_v59 = vrot.slane %v3256_v41, 4  ;;  %v3261_v51 = vrot.slane %v3259_v20, 5  ;;  %v3197_v41 = vld [vmem:[#allocation2 + $0x10] sm:$0xf]  ;;  %v3200_v20 = vld [vmem:[#allocation2 + $0x14] sm:$0x1] }
 0x407   : > { %v2946_v26 = vsel %vm1804_vm7, %v2938_v27, %v2866_v37  ;;  %v3209_v27 = vld [vmem:[#allocation2 + $0x20] sm:$0xf] }
 0x408   : > { %v2886_v1 = vpop.permute.xlu0 %2885  ;;  %v3262_v28 = vor.u32 %v3261_v51, %v3258_v59 }
 0x409   : > { %v2954_v6 = vsel %vm723_vm11, %v2946_v26, %v2886_v1  ;;  %v4809_v26 = vld [vmem:[#allocation2 + $0x8] sm:$0xf] }
 0x40a   : > { %4668 = vmatmul.mubr.msk.bf16.gmra.mrb[12].mxu0 %vm1862_vm12, %v2954_v6 }
 0x4bd   : > { %v4665_v34 = vpop.f32.mrb[8].mxu0 }
 0x4be   : > { %v3050_v12 = vadd.f32 %v4665_v34, %v6260_v44  ;;  %v3041_v10 = vpop.f32.mrb[9].mxu0 }
 0x4bf   : > { %v3042_v22 = vadd.f32 %v6260_v44, %v3041_v10  ;;  %v4666_v23 = vpop.f32.mrb[10].mxu0  ;;  %v6274_v10 = vld [vmem:[#allocation2 + $0x48] sm:$0xf] }
 0x4c0   : > { %v3074_v30 = vmax.f32 %v3050_v12, 0.0  ;;  %v3053_v32 = vadd.f32 %v4666_v23, %v6260_v44  ;;  %v3044_v55 = vpop.f32.mrb[11].mxu0 }
 0x4c1   : > { %v3072_v48 = vmax.f32 %v3042_v22, 0.0  ;;  %v3045_v42 = vadd.f32 %v6260_v44, %v3044_v55 }
 0x4c2   : > { %v4577_v43 = vpack.c.bf16 %v3074_v30, %v3074_v30  ;;  %v3075_v19 = vmax.f32 %v3053_v32, 0.0  ;;  %v3367_v30 = vld [vmem:[#allocation2] sm:$0xe] }
 0x4c3   : > { %v4575_v62 = vpack.c.bf16 %v3072_v48, %v3072_v48  ;;  %v3073_v63 = vmax.f32 %v3045_v42, 0.0  ;;  %v3722_v48 = vshrl.u32 %v6274_v10, 16  ;;  %v4484_v42 = vrot.slane %v3367_v30, 9 }
 0x4c4   : > { %v3129_v8 = vshrl.u32 %v4577_v43, 16  ;;  %v4578_v18 = vpack.c.bf16 %v3075_v19, %v3075_v19  ;;  %v3132_v58 = vshll.u32 %v4577_v43, 16  ;;  %v3393_v43 = vrot.slane %v3247_v13, 5 }
 0x4c5   : > { %v3113_v0 = vshrl.u32 %v4575_v62, 16  ;;  %v4576_v3 = vpack.c.bf16 %v3073_v63, %v3073_v63  ;;  %v3116_v56 = vshll.u32 %v4575_v62, 16  ;;  %v6285_v19 = vrot.slane %v3262_v28, 4 }
 0x4c6   : > { %v3131_v16 = vrot.slane %v3129_v8, 7  ;;  %v3137_v46 = vshrl.u32 %v4578_v18, 16  ;;  %v3140_v9 = vshll.u32 %v4578_v18, 16  ;;  %v6287_v62 = vrot.slane %v3265_v7, 5 }
 0x4c7   : > { %v3115_v17 = vrot.slane %v3113_v0, 7  ;;  %v3121_v60 = vshrl.u32 %v4576_v3, 16  ;;  %v3124_v45 = vshll.u32 %v4576_v3, 16  ;;  %v3725_v63 = vshll.u32 %v6274_v10, 16 }
 0x4c8   : > { %v3134_v31 = vor.u32 %v3132_v58, %v3131_v16  ;;  %v3135_v2 = vrot.slane %v3131_v16, 4  ;;  %v3139_v47 = vrot.slane %v3137_v46, 7  ;;  %v6290_v8 = vrot.slane %v3722_v48, 4 }
 0x4c9   : > { %v3118_v39 = vor.u32 %v3116_v56, %v3115_v17  ;;  %v3119_v53 = vrot.slane %v3115_v17, 4  ;;  %v3123_v29 = vrot.slane %v3121_v60, 7  ;;  %v6294_v58 = vsel %vm5287_vm0, %v4484_v42, %v3393_v43 }
 0x4ca   : > { %v3204_v54 = vsel %vm5248_vm15, %v3134_v31, %v3203_v21  ;;  %v3207_v4 = vsel %vm5149_vm5, %v3135_v2, %v3206_v11  ;;  %v3142_v37 = vor.u32 %v3140_v9, %v3139_v47  ;;  %v3143_v57 = vrot.slane %v3139_v47, 4 }
 0x4cb   : > { %3205 = vst [vmem:[#allocation2 + $0x18] sm:$0xf] %v3204_v54  ;;  %3208 = vst [vmem:[#allocation2 + $0x1c] sm:$0x1] %v3207_v4  ;;  %v3192_v1 = vsel %vm5248_vm15, %v3118_v39, %v4809_v26  ;;  %v3195_v6 = vsel %vm5149_vm5, %v3119_v53, %v3194_v36  ;;  %v3126_v34 = vor.u32 %v3124_v45, %v3123_v29  ;;  %v3127_v12 = vrot.slane %v3123_v29, 4 }
 0x4cc   : > { %3196 = vst [vmem:[#allocation2 + $0xc] sm:$0x1] %v3195_v6  ;;  %3193 = vst [vmem:[#allocation2 + $0x8] sm:$0xf] %v3192_v1  ;;  %v3210_v22 = vsel %vm5248_vm15, %v3142_v37, %v3209_v27  ;;  %v3213_v23 = vsel %vm5149_vm5, %v3143_v57, %v3212_v38  ;;  %v3268_v13 = vsel %vm5047_vm2, %v6285_v19, %v6287_v62  ;;  %v6300_v60 = vrot.slane %v3725_v63, 5 }
 0x4cd   : > { %3211 = vst [vmem:[#allocation2 + $0x20] sm:$0xf] %v3210_v22  ;;  %3214 = vst [vmem:[#allocation2 + $0x24] sm:$0x1] %v3213_v23  ;;  %v3198_v32 = vsel %vm5248_vm15, %v3126_v34, %v3197_v41  ;;  %v3201_v55 = vsel %vm5149_vm5, %v3127_v12, %v3200_v20  ;;  %v6302_v45 = vld [vmem:[#allocation2 + $0x4c] sm:$0x1] }
 0x4ce   : > { %3199 = vst [vmem:[#allocation2 + $0x10] sm:$0xf] %v3198_v32  ;;  %3202 = vst [vmem:[#allocation2 + $0x14] sm:$0x1] %v3201_v55 }
 0x4d2   : > { %v3425_v59 = vld [vmem:[#allocation2 + $0x18] sm:$0xf]  ;;  %v3433_v51 = vld [vmem:[#allocation2 + $0x1c] sm:$0x1] }
 0x4d3   : > { %v3468_v18 = vshrl.u32 %v3425_v59, 16  ;;  %v3471_v0 = vshll.u32 %v3425_v59, 16  ;;  %v3423_v3 = vld [vmem:[#allocation2 + $0x8] sm:$0xf]  ;;  %v3553_v16 = vld [vmem:[#allocation2 + $0x18] sm:$0xe] }
 0x4d4   : > { %v3426_v46 = vld [vmem:[#allocation2 + $0x20] sm:$0xf]  ;;  %v3440_v7 = vshrl.u32 %v3423_v3, 16  ;;  %v3443_v17 = vshll.u32 %v3423_v3, 16  ;;  %v3477_v56 = vshll.u32 %v3433_v51, 16  ;;  %v4494_v6 = vrot.slane %v3553_v16, 9 }
 0x4d5   : > { %v3470_v28 = vrot.slane %v3468_v18, 4  ;;  %v3473_v31 = vrot.slane %v3471_v0, 5  ;;  %v4521_v2 = vcombine.low %v3425_v59, %v3426_v46  ;;  %v3482_v21 = vshrl.u32 %v3426_v46, 16  ;;  %v3424_v47 = vld [vmem:[#allocation2 + $0x10] sm:$0xf] }
 0x4d6   : > { %v3485_v9 = vshll.u32 %v3426_v46, 16  ;;  %v3454_v11 = vshrl.u32 %v3424_v47, 16  ;;  %v3457_v39 = vshll.u32 %v3424_v47, 16  ;;  %v4520_v53 = vcombine.low %v3423_v3, %v3424_v47  ;;  %v3434_v29 = vld [vmem:[#allocation2 + $0x24] sm:$0x1] }
 0x4d7   : > { %v3474_v54 = vor.u32 %v3473_v31, %v3470_v28  ;;  %3873 = vrot.lane.b32.xlu0 %v4521_v2, %s4879_s12  ;;  %v3484_v4 = vrot.slane %v3482_v21, 4  ;;  %v3442_v36 = vrot.slane %v3440_v7, 4  ;;  %v3445_v37 = vrot.slane %v3443_v17, 5  ;;  %v3554_v57 = vld [vmem:[#allocation2 + $0x20] sm:$0xe] }
 0x4d8   : > { %v3487_v27 = vrot.slane %v3485_v9, 5  ;;  %v3456_v26 = vrot.slane %v3454_v11, 4  ;;  %v3459_v1 = vrot.slane %v3457_v39, 5  ;;  %3871 = vrot.lane.b32.xlu1 %v4520_v53, %s4879_s12  ;;  %v3607_v38 = vld [vmem:[#allocation2 + $0x10] sm:$0xf]  ;;  %v3491_v12 = vshll.u32 %v3434_v29, 16 }
 0x4d9   : > { %v3446_v34 = vor.u32 %v3445_v37, %v3442_v36  ;;  %v3585_v22 = vrot.slane %v3433_v51, 5  ;;  %v6307_v41 = vrot.slane %v3474_v54, 4  ;;  %v6309_v20 = vrot.slane %v3477_v56, 5  ;;  %v3608_v55 = vld [vmem:[#allocation2 + $0x18] sm:$0xf] }
 0x4da   : > { %v4495_v30 = vrot.slane %v3554_v57, 9  ;;  %v3589_v32 = vrot.slane %v3434_v29, 5  ;;  %v3488_v48 = vor.u32 %v3487_v27, %v3484_v4  ;;  %v3460_v42 = vor.u32 %v3459_v1, %v3456_v26  ;;  %v6319_v16 = vld [vmem:[#allocation2 + $0x14] sm:$0x1]  ;;  %v6327_v54 = vld [vmem:[#allocation2 + $0x1c] sm:$0x1] }
 0x4db   : > { %v6311_v43 = vrot.slane %v3446_v34, 4  ;;  %v3624_v63 = vshrl.u32 %v3607_v38, 16  ;;  %v6313_v18 = vrot.slane %v3491_v12, 5  ;;  %v3586_v51 = vsel %vm5287_vm0, %v4494_v6, %v3585_v22 }
 0x4dc   : > { %v3590_v0 = vsel %vm5287_vm0, %v4495_v30, %v3589_v32  ;;  %v3627_v3 = vshll.u32 %v3607_v38, 16  ;;  %v3638_v28 = vshrl.u32 %v3608_v55, 16  ;;  %v3641_v47 = vshll.u32 %v3608_v55, 16  ;;  %v3369_v32 = vld [vmem:[#allocation2 + $0x10] sm:$0xe] }
 0x4dd   : > { %v4669_v59 = vpop.f32.mrb[12].mxu0  ;;  %v4529_v17 = vcombine.low %v3586_v51, %v3590_v0  ;;  %v3626_v56 = vrot.slane %v3624_v63, 4  ;;  %v4532_v9 = vcombine.low %v3607_v38, %v3608_v55  ;;  %v3293_v4 = vshll.u32 %v6319_v16, 16 }
 0x4de   : > { %v3066_v46 = vadd.f32 %v4669_v59, %v6260_v44  ;;  %v3057_v7 = vpop.f32.mrb[13].mxu0  ;;  %v3629_v21 = vrot.slane %v3627_v3, 5  ;;  %v6325_v29 = vrot.slane %v3638_v28, 4  ;;  %v6331_v27 = vrot.slane %v3641_v47, 5  ;;  %v3227_v28 = vld [vmem:[#allocation2 + $0x38] sm:$0xf] }
 0x4df   : > { %v3058_v31 = vadd.f32 %v6260_v44, %v3057_v7  ;;  %v4670_v2 = vpop.f32.mrb[14].mxu0  ;;  %3913 = vrot.lane.b32.xlu0 %v4529_v17, %s4880_s13  ;;  %3939 = vrot.lane.b32.xlu1 %v4532_v9, %s4876_s29  ;;  %v6334_v6 = vrot.slane %v3488_v48, 4  ;;  %v6336_v38 = vrot.slane %v3460_v42, 4  ;;  %v6338_v22 = vrot.slane %v3293_v4, 5  ;;  %v3370_v42 = vld [vmem:[#allocation2 + $0x18] sm:$0xe] }
 0x4e0   : > { %v3078_v11 = vmax.f32 %v3066_v46, 0.0  ;;  %v3069_v39 = vadd.f32 %v4670_v2, %v6260_v44  ;;  %v3060_v53 = vpop.f32.mrb[15].mxu0  ;;  %v3630_v57 = vor.u32 %v3629_v21, %v3626_v56  ;;  %v3307_v30 = vshll.u32 %v6327_v54, 16  ;;  %v3218_v4 = vld [vmem:[#allocation2 + $0x2c] sm:$0x1] }
 0x4e1   : > { %v3076_v36 = vmax.f32 %v3058_v31, 0.0  ;;  %v3061_v37 = vadd.f32 %v6260_v44, %v3060_v53  ;;  %v3644_v59 = vor.u32 %v6331_v27, %v6325_v29  ;;  %v4486_v56 = vrot.slane %v3369_v32, 9  ;;  %v3230_v31 = vld [vmem:[#allocation2 + $0x3c] sm:$0x1]  ;;  %v3215_v53 = vld [vmem:[#allocation2 + $0x28] sm:$0xf] }
 0x4e2   : > { %v4581_v26 = vpack.c.bf16 %v3078_v11, %v3078_v11  ;;  %v3079_v1 = vmax.f32 %v3069_v39, 0.0  ;;  %v6341_v63 = vrot.slane %v3630_v57, 4  ;;  %v3401_v9 = vrot.slane %v6319_v16, 5 }
 0x4e3   : > { %v4579_v34 = vpack.c.bf16 %v3076_v36, %v3076_v36  ;;  %v3077_v12 = vmax.f32 %v3061_v37, 0.0  ;;  %v4487_v37 = vrot.slane %v3370_v42, 9  ;;  %v6374_v61 = vrot.slane %v3307_v30, 5 }
 0x4e4   : > { %v3161_v55 = vshrl.u32 %v4581_v26, 16  ;;  %v4582_v44 = vpack.c.bf16 %v3079_v1, %v3079_v1  ;;  %v3164_v51 = vshll.u32 %v4581_v26, 16  ;;  %v3233_v1 = vld [vmem:[#allocation2 + $0x40] sm:$0xf]  ;;  %v3402_v32 = vsel %vm5287_vm0, %v4486_v56, %v3401_v9  ;;  %v3224_v9 = vld [vmem:[#allocation2 + $0x34] sm:$0x1] }
 0x4e5   : > { %v3145_v0 = vshrl.u32 %v4579_v34, 16  ;;  %v3148_v48 = vshll.u32 %v4579_v34, 16  ;;  %v4580_v3 = vpack.c.bf16 %v3077_v12, %v3077_v12  ;;  %v3236_v34 = vld [vmem:[#allocation2 + $0x44] sm:$0x1] }
 0x4e6   : > { %v3163_v46 = vrot.slane %v3161_v55, 7  ;;  %v3169_v7 = vshrl.u32 %v4582_v44, 16  ;;  %v3172_v17 = vshll.u32 %v4582_v44, 16  ;;  %v3368_v55 = vld [vmem:[#allocation2 + $0x8] sm:$0xe] }
 0x4e7   : > { %v3147_v2 = vrot.slane %v3145_v0, 7  ;;  %v3153_v21 = vshrl.u32 %v4580_v3, 16  ;;  %v3156_v47 = vshll.u32 %v4580_v3, 16  ;;  %v3221_v3 = vld [vmem:[#allocation2 + $0x30] sm:$0xf] }
 0x4e8   : > { %v3166_v11 = vor.u32 %v3164_v51, %v3163_v46  ;;  %v3167_v39 = vrot.slane %v3163_v46, 4  ;;  %v3171_v36 = vrot.slane %v3169_v7, 7  ;;  %v6352_v46 = vld [vmem:[#allocation2 + $0xc] sm:$0x1] }
 0x4e9   : > { %v3150_v57 = vor.u32 %v3148_v48, %v3147_v2  ;;  %v3151_v26 = vrot.slane %v3147_v2, 4  ;;  %v3155_v12 = vrot.slane %v3153_v21, 7  ;;  %v3431_v48 = vld [vmem:[#allocation2 + $0xc] sm:$0x1]  ;;  %v3551_v21 = vld [vmem:[#allocation2 + $0x8] sm:$0xe] }
 0x4ea   : > { %v3228_v44 = vsel %vm5248_vm15, %v3166_v11, %v3227_v28  ;;  %v3231_v16 = vsel %vm5149_vm5, %v3167_v39, %v3230_v31  ;;  %v3174_v51 = vor.u32 %v3172_v17, %v3171_v36  ;;  %v3175_v0 = vrot.slane %v3171_v36, 4  ;;  %v3432_v28 = vld [vmem:[#allocation2 + $0x14] sm:$0x1] }
 0x4eb   : > { %3229 = vst [vmem:[#allocation2 + $0x38] sm:$0xf] %v3228_v44  ;;  %3232 = vst [vmem:[#allocation2 + $0x3c] sm:$0x1] %v3231_v16  ;;  %v3216_v42 = vsel %vm5248_vm15, %v3150_v57, %v3215_v53  ;;  %v3219_v7 = vsel %vm5149_vm5, %v3151_v26, %v3218_v4  ;;  %v3158_v56 = vor.u32 %v3156_v47, %v3155_v12  ;;  %v3159_v2 = vrot.slane %v3155_v12, 4 }
 0x4ec   : > { %3217 = vst [vmem:[#allocation2 + $0x28] sm:$0xf] %v3216_v42  ;;  %3220 = vst [vmem:[#allocation2 + $0x2c] sm:$0x1] %v3219_v7  ;;  %v3234_v17 = vsel %vm5248_vm15, %v3174_v51, %v3233_v1  ;;  %v3237_v31 = vsel %vm5149_vm5, %v3175_v0, %v3236_v34  ;;  %v3405_v11 = vrot.slane %v6327_v54, 5  ;;  %v4485_v39 = vrot.slane %v3368_v55, 9 }
 0x4ed   : > { %v3552_v53 = vld [vmem:[#allocation2 + $0x10] sm:$0xe]  ;;  %3238 = vst [vmem:[#allocation2 + $0x44] sm:$0x1] %v3237_v31  ;;  %3235 = vst [vmem:[#allocation2 + $0x40] sm:$0xf] %v3234_v17  ;;  %v3222_v47 = vsel %vm5248_vm15, %v3158_v56, %v3221_v3  ;;  %v3225_v4 = vsel %vm5149_vm5, %v3159_v2, %v3224_v9 }
 0x4ee   : > { %v3397_v36 = vrot.slane %v6352_v46, 5  ;;  %v3449_v57 = vshll.u32 %v3431_v48, 16  ;;  %v3615_v26 = vld [vmem:[#allocation2 + $0x14] sm:$0x1]  ;;  %v6368_v1 = vld [vmem:[#allocation2 + $0x1c] sm:$0x1]  ;;  %v3406_v34 = vsel %vm5287_vm0, %v4487_v37, %v3405_v11 }
 0x4ef   : > { %3223 = vst [vmem:[#allocation2 + $0x30] sm:$0xf] %v3222_v47  ;;  %3226 = vst [vmem:[#allocation2 + $0x34] sm:$0x1] %v3225_v4  ;;  %v3463_v12 = vshll.u32 %v3432_v28, 16  ;;  %v4492_v55 = vrot.slane %v3551_v21, 9  ;;  %v4517_v15 = vcombine.low %v3402_v32, %v3406_v34 }
 0x4f0   : > { %v3577_v44 = vrot.slane %v3431_v48, 5  ;;  %v3735_v16 = vld [vmem:[#allocation2 + $0x10] sm:$0xe]  ;;  %v3398_v51 = vsel %vm5287_vm0, %v4485_v39, %v3397_v36  ;;  %v4493_v0 = vrot.slane %v3552_v53, 9  ;;  %v3736_v3 = vld [vmem:[#allocation2 + $0x18] sm:$0xe] }
 0x4f1   : > { %v3609_v42 = vld [vmem:[#allocation2 + $0x20] sm:$0xf]  ;;  %v6381_v7 = vrot.slane %v3644_v59, 4  ;;  %v4516_v37 = vcombine.low %v6294_v58, %v3398_v51  ;;  %v6384_v48 = vrot.slane %v3449_v57, 5  ;;  %v3581_v56 = vrot.slane %v3432_v28, 5  ;;  %3845 = vrot.lane.b32.xlu0 %v4517_v15, %s4877_s9 }
 0x4f2   : > { %v6387_v54 = vrot.slane %v3463_v12, 5  ;;  %v3578_v30 = vsel %vm5287_vm0, %v4492_v55, %v3577_v44  ;;  %v4500_v32 = vrot.slane %v3735_v16, 9  ;;  %v3761_v2 = vrot.slane %v3615_v26, 5  ;;  %v6395_v21 = vld [vmem:[#allocation2 + $0x8] sm:$0xf] }
 0x4f3   : > { %3843 = vrot.lane.b32.xlu1 %v4516_v37, %s4877_s9  ;;  %v3582_v29 = vsel %vm5287_vm0, %v4493_v0, %v3581_v56  ;;  %v4501_v27 = vrot.slane %v3736_v3, 9  ;;  %v3765_v58 = vrot.slane %v6368_v1, 5  ;;  %v3652_v59 = vshrl.u32 %v3609_v42, 16  ;;  %v3610_v9 = vld [vmem:[#allocation2 + $0x28] sm:$0xf] }
 0x4f4   : > { %v4528_v28 = vcombine.low %v3578_v30, %v3582_v29  ;;  %v3633_v17 = vshll.u32 %v3615_v26, 16  ;;  %v3647_v31 = vshll.u32 %v6368_v1, 16  ;;  %v3429_v11 = vld [vmem:[#allocation2 + $0x38] sm:$0xf]  ;;  %v3762_v53 = vsel %vm5287_vm0, %v4500_v32, %v3761_v2  ;;  %v3430_v16 = vld [vmem:[#allocation2 + $0x40] sm:$0xf] }
 0x4f5   : > { %v3654_v47 = vrot.slane %v3652_v59, 4  ;;  %v3655_v4 = vshll.u32 %v3609_v42, 16  ;;  %v4533_v36 = vcombine.low %v3609_v42, %v3610_v9  ;;  %v3766_v57 = vsel %vm5287_vm0, %v4501_v27, %v3765_v58  ;;  %v4798_v29 = vld [vmem:[%s6797_s4] sm:$0xff]  }
 0x4f6   : > { %v3666_v34 = vshrl.u32 %v3610_v9, 16  ;;  %v3669_v12 = vshll.u32 %v3610_v9, 16  ;;  %v3270_v26 = vshrl.u32 %v6395_v21, 16  ;;  %v3273_v55 = vshll.u32 %v6395_v21, 16  ;;  %v6409_v37 = vld [vmem:[#allocation2 + $0x30] sm:$0xf]  ;;  %4671 = vmatprep.subr.bf16.mxu1 %v4798_v29 }
 0x4f7   : > { %3911 = vrot.lane.b32.xlu1 %v4528_v28, %s4880_s13  ;;  %v3657_v1 = vrot.slane %v3655_v4, 5  ;;  %3941 = vrot.lane.b32.xlu0 %v4533_v36, %s4876_s29  ;;  %v3279_v44 = vshll.u32 %v6352_v46, 16  ;;  %v3524_v15 = vshrl.u32 %v3429_v11, 16  ;;  %v3527_v42 = vshll.u32 %v3429_v11, 16  ;;  %v3427_v36 = vld [vmem:[#allocation2 + $0x28] sm:$0xf] }
 0x4f8   : > { %v3668_v51 = vrot.slane %v3666_v34, 4  ;;  %v3671_v0 = vrot.slane %v3669_v12, 5  ;;  %v3272_v3 = vrot.slane %v3270_v26, 4  ;;  %v6411_v56 = vrot.slane %v3633_v17, 5  ;;  %v3613_v12 = vld [vmem:[#allocation2 + $0x40] sm:$0xf]  ;;  %4672 = vmatpush3.bf16.msra.mxu1 %v4798_v29 }
 0x4f9   : > { %v4540_v30 = vcombine.low %v3762_v53, %v3766_v57  ;;  %v3658_v32 = vor.u32 %v3657_v1, %v3654_v47  ;;  %v3275_v2 = vrot.slane %v3273_v55, 5  ;;  %v3526_v27 = vrot.slane %v3524_v15, 4  ;;  %v4799_v26 = vld [vmem:[%s6797_s4 + $0x8] sm:$0xff]   ;;  %v3371_v39 = vld [vmem:[#allocation2 + $0x20] sm:$0xe] }
 0x4fa   : > { %v3529_v58 = vrot.slane %v3527_v42, 5  ;;  %v3538_v46 = vshrl.u32 %v3430_v16, 16  ;;  %v3541_v59 = vshll.u32 %v3430_v16, 16  ;;  %v6416_v28 = vrot.slane %v3647_v31, 5  ;;  %4673 = vmatprep.subr.bf16.mxu1 %v4799_v26 }
 0x4fb   : > { %3979 = vrot.lane.b32.xlu1 %v4540_v30, %s4881_s16  ;;  %v3276_v9 = vor.u32 %v3275_v2, %v3272_v3  ;;  %v4523_v4 = vcombine.low %v3429_v11, %v3430_v16  ;;  %v3510_v17 = vshrl.u32 %v6409_v37, 16  ;;  %v3672_v53 = vor.u32 %v3671_v0, %v3668_v51  ;;  %v6427_v0 = vld [vmem:[#allocation2 + $0x30] sm:$0xf]  ;;  %v3612_v2 = vld [vmem:[#allocation2 + $0x38] sm:$0xf] }
 0x4fc   : > { %v3281_v47 = vrot.slane %v3279_v44, 5  ;;  %v3540_v57 = vrot.slane %v3538_v46, 4  ;;  %v3543_v34 = vrot.slane %v3541_v59, 5  ;;  %v6423_v31 = vrot.slane %v3658_v32, 4  ;;  %4674 = vmatpush3.bf16.msra.mxu1 %v4799_v26 }
 0x4fd   : > { %v3277_v1 = vrot.slane %v3276_v9, 4  ;;  %3877 = vrot.lane.b32.xlu0 %v4523_v4, %s4879_s12  ;;  %v3512_v11 = vrot.slane %v3510_v17, 4  ;;  %v3513_v55 = vshll.u32 %v6409_v37, 16  ;;  %v3530_v16 = vor.u32 %v3529_v58, %v3526_v27 }
 0x4fe   : > { %v3544_v15 = vor.u32 %v3543_v34, %v3540_v57  ;;  %v3496_v51 = vshrl.u32 %v3427_v36, 16  ;;  %v3499_v44 = vshll.u32 %v3427_v36, 16  ;;  %v3708_v30 = vshrl.u32 %v3613_v12, 16 }
 0x4ff   : > { %v3282_v3 = vsel %vm5047_vm2, %v3277_v1, %v3281_v47  ;;  %v3515_v42 = vrot.slane %v3513_v55, 5  ;;  %v3711_v32 = vshll.u32 %v3613_v12, 16  ;;  %v6431_v29 = vrot.slane %v3672_v53, 4  ;;  %v6452_v1 = vld [vmem:[#allocation2 + $0x10] sm:$0xf] }
 0x500   : > { %v4512_v27 = vcombine.low %v3268_v13, %v3282_v3  ;;  %v3498_v58 = vrot.slane %v3496_v51, 4  ;;  %v3501_v46 = vrot.slane %v3499_v44, 5  ;;  %v6438_v9 = vrot.slane %v3708_v30, 4  ;;  %v6475_v44 = vld [vmem:[#allocation2 + $0x3c] sm:$0x1] }
 0x501   : > { %v3516_v59 = vor.u32 %v3515_v42, %v3512_v11  ;;  %v6440_v4 = vrot.slane %v3711_v32, 5  ;;  %v4535_v17 = vcombine.low %v3613_v12, %v6274_v10  ;;  %v3680_v47 = vshrl.u32 %v6427_v0, 16  ;;  %v3557_v3 = vld [vmem:[#allocation2 + $0x38] sm:$0xe]  ;;  %v6526_v11 = vld [vmem:[#allocation2 + $0x24] sm:$0x1] }
 0x502   : > { %3823 = vrot.lane.b32.xlu1 %v4512_v27, %s4882_s28  ;;  %v3502_v53 = vor.u32 %v3501_v46, %v3498_v58  ;;  %v3683_v57 = vshll.u32 %v6427_v0, 16  ;;  %v3694_v34 = vshrl.u32 %v3612_v2, 16  ;;  %v6446_v19 = vrot.slane %v3530_v16, 4  ;;  %v6461_v16 = vld [vmem:[#allocation2 + $0x18] sm:$0xf] }
 0x503   : > { %v6448_v62 = vrot.slane %v3544_v15, 4  ;;  %v4522_v13 = vcombine.low %v3427_v36, %v6409_v37  ;;  %3945 = vrot.lane.b32.xlu0 %v4535_v17, %s4876_s29  ;;  %v3697_v26 = vshll.u32 %v3612_v2, 16  ;;  %v6454_v10 = vrot.slane %v3516_v59, 4  ;;  %v3558_v46 = vld [vmem:[#allocation2 + $0x40] sm:$0xe]  ;;  %v4801_v59 = vld [vmem:[%s6797_s4 + $0x10] sm:$0xff]  }
 0x504   : > { %v6456_v12 = vrot.slane %v3502_v53, 4  ;;  %v4534_v55 = vcombine.low %v6427_v0, %v3612_v2  ;;  %v6463_v15 = vrot.slane %v3680_v47, 4  ;;  %v6465_v51 = vrot.slane %v3683_v57, 5  ;;  %v6477_v0 = vld [vmem:[#allocation2 + $0x20] sm:$0xe]  ;;  %4675 = vmatprep.subr.bf16.mxu1 %v4801_v59 }
 0x505   : > { %v3480_v37 = vsel %vm5047_vm2, %v6307_v41, %v6309_v20  ;;  %v3494_v36 = vsel %vm5047_vm2, %v6334_v6, %v6313_v18  ;;  %v6480_v42 = vrot.slane %v3694_v34, 4  ;;  %v6482_v30 = vrot.slane %v3697_v26, 5  ;;  %v6485_v41 = vld [vmem:[#allocation2 + $0x44] sm:$0x1]  ;;  %v6508_v47 = vld [vmem:[#allocation2 + $0x2c] sm:$0x1]  ;;  %4676 = vmatpush3.bf16.msra.mxu1 %v4801_v59 }
 0x506   : > { %3875 = vrot.lane.b32.xlu1 %v4522_v13, %s4879_s12  ;;  %v4525_v32 = vcombine.low %v3480_v37, %v3494_v36  ;;  %v3284_v2 = vshrl.u32 %v6452_v1, 16  ;;  %v6487_v20 = vld [vmem:[#allocation2 + $0x24] sm:$0x1]  ;;  %v3452_v18 = vsel %vm5047_vm2, %v6311_v43, %v6384_v48  ;;  %v3287_v6 = vshll.u32 %v6452_v1, 16  ;;  %v3738_v57 = vld [vmem:[#allocation2 + $0x28] sm:$0xe] }
 0x507   : > { %v3298_v27 = vshrl.u32 %v6461_v16, 16  ;;  %v3301_v58 = vshll.u32 %v6461_v16, 16  ;;  %v3466_v17 = vsel %vm5047_vm2, %v6336_v38, %v6387_v54  ;;  %v3636_v43 = vsel %vm5047_vm2, %v6341_v63, %v6411_v56  ;;  %v6514_v36 = vld [vmem:[#allocation2 + $0x34] sm:$0x1]  ;;  %v4802_v38 = vld [vmem:[%s6797_s4 + $0x18] sm:$0xff]  }
 0x508   : > { %3893 = vrot.lane.b32.xlu0 %v4525_v32, %s4875_s18  ;;  %v3286_v53 = vrot.slane %v3284_v2, 4  ;;  %v4498_v48 = vrot.slane %v3557_v3, 9  ;;  %v3289_v34 = vrot.slane %v3287_v6, 5  ;;  %v3650_v37 = vsel %vm5047_vm2, %v6381_v7, %v6416_v28  ;;  %v3373_v32 = vld [vmem:[#allocation2 + $0x30] sm:$0xe]  ;;  %4677 = vmatprep.subr.bf16.mxu1 %v4802_v38 }
 0x509   : > { %v3300_v13 = vrot.slane %v3298_v27, 4  ;;  %v3303_v26 = vrot.slane %v3301_v58, 5  ;;  %v3601_v63 = vrot.slane %v6475_v44, 5  ;;  %v4499_v54 = vrot.slane %v3558_v46, 9  ;;  %v6524_v27 = vld [vmem:[#allocation2 + $0x3c] sm:$0x1]  ;;  %4678 = vmatpush3.bf16.msra.mxu1 %v4802_v38 }
 0x50a   : > { %3943 = vrot.lane.b32.xlu1 %v4534_v55, %s4876_s29  ;;  %v3605_v56 = vrot.slane %v6485_v41, 5  ;;  %v4502_v3 = vrot.slane %v6477_v0, 9  ;;  %v3290_v2 = vor.u32 %v3289_v34, %v3286_v53  ;;  %v3769_v28 = vrot.slane %v6487_v20, 5  ;;  %v3374_v58 = vld [vmem:[#allocation2 + $0x38] sm:$0xe]  ;;  %s4815_s29 = sshll.u32 %s4885_s26, 4  ;;  %s4816_s29 = int_to_ptr.vmem [resolvable:$false] %s4815_s29 }
 0x50b   : > { %v3304_v7 = vor.u32 %v3303_v26, %v3300_v13  ;;  %v4503_v6 = vrot.slane %v3738_v57, 9  ;;  %v4524_v55 = vcombine.low %v3452_v18, %v3466_v17  ;;  %v4536_v23 = vcombine.low %v3636_v43, %v3650_v37  ;;  %v6534_v59 = vld [vmem:[%s6797_s4 + $0x20] ss:$0 sps:$4 sm:$0xff]   ;;  %v6538_v26 = vld [vmem:[#allocation2 + $0x2c] sm:$0x1]  ;;  %s4817_s10 = scalar_lea.vmem %s4816_s29, 2048 }
 0x50c   : > { %v3602_v46 = vsel %vm5287_vm0, %v4498_v48, %v3601_v63  ;;  %v3773_v0 = vrot.slane %v6508_v47, 5  ;;  %v3291_v53 = vrot.slane %v3290_v2, 4  ;;  %v3606_v34 = vsel %vm5287_vm0, %v4499_v54, %v3605_v56  ;;  %v3372_v37 = vld [vmem:[#allocation2 + $0x28] sm:$0xe]  ;;  %v3435_v2 = vld [vmem:[#allocation2 + $0x2c] sm:$0x1]  ;;  %4691 = vmatprep.subr.msk.bf16.mxu1 %vm1871_vm1, %v6534_v59 }
 0x50d   : > { %v3305_v57 = vrot.slane %v3304_v7, 4  ;;  %v4490_v13 = vrot.slane %v3373_v32, 9  ;;  %v3417_v17 = vrot.slane %v6514_v36, 5  ;;  %v4491_v43 = vrot.slane %v3374_v58, 9  ;;  %v3555_v7 = vld [vmem:[#allocation2 + $0x28] sm:$0xe] }
 0x50e   : > { %3891 = vrot.lane.b32.xlu1 %v4524_v55, %s4875_s18  ;;  %v3774_v18 = vsel %vm5287_vm0, %v4503_v6, %v3773_v0  ;;  %v3421_v48 = vrot.slane %v6524_v27, 5  ;;  %v3296_v63 = vsel %vm5047_vm2, %v3291_v53, %v6338_v22  ;;  %v3770_v56 = vsel %vm5287_vm0, %v4502_v3, %v3769_v28  ;;  %v3436_v0 = vld [vmem:[#allocation2 + $0x34] sm:$0x1]  ;;  %v3556_v22 = vld [vmem:[#allocation2 + $0x30] sm:$0xe] }
 0x50f   : > { %v3310_v54 = vsel %vm5047_vm2, %v3305_v57, %v6374_v61  ;;  %v4488_v32 = vrot.slane %v3371_v39, 9  ;;  %v4531_v58 = vcombine.low %v3602_v46, %v3606_v34  ;;  %v4541_v38 = vcombine.low %v3770_v56, %v3774_v18  ;;  %v6560_v3 = vld [vmem:[#allocation2 + $0x20] sm:$0xf] }
 0x510   : > { %v4513_v6 = vcombine.low %v3296_v63, %v3310_v54  ;;  %v3409_v55 = vrot.slane %v6526_v11, 5  ;;  %v3418_v53 = vsel %vm5287_vm0, %v4490_v13, %v3417_v17  ;;  %v4489_v61 = vrot.slane %v3372_v37, 9  ;;  %v6571_v63 = vld [vmem:[#allocation2 + $0x28] sm:$0xf] }
 0x511   : > { %v3413_v57 = vrot.slane %v6538_v26, 5  ;;  %v3661_v39 = vshll.u32 %v6487_v20, 16  ;;  %v3422_v28 = vsel %vm5287_vm0, %v4491_v43, %v3421_v48  ;;  %v3675_v46 = vshll.u32 %v6508_v47, 16 }
 0x512   : > { %3825 = vrot.lane.b32.xlu0 %v4513_v6, %s4882_s28  ;;  %3959 = vrot.lane.b32.xlu1 %v4536_v23, %s4883_s14  ;;  %v4496_v34 = vrot.slane %v3555_v7, 9  ;;  %v3593_v18 = vrot.slane %v3435_v2, 5  ;;  %v3410_v13 = vsel %vm5287_vm0, %v4488_v32, %v3409_v55  ;;  %v4497_v20 = vrot.slane %v3556_v22, 9 }
 0x513   : > { %v3414_v17 = vsel %vm5287_vm0, %v4489_v61, %v3413_v57  ;;  %v3597_v37 = vrot.slane %v3436_v0, 5  ;;  %v4519_v54 = vcombine.low %v3418_v53, %v3422_v28  ;;  %v3663_v23 = vrot.slane %v3661_v39, 5 }
 0x514   : > { %v4518_v56 = vcombine.low %v3410_v13, %v3414_v17  ;;  %v3312_v6 = vshrl.u32 %v6560_v3, 16  ;;  %v3677_v43 = vrot.slane %v3675_v46, 5  ;;  %v3594_v47 = vsel %vm5287_vm0, %v4496_v34, %v3593_v18  ;;  %v6593_v17 = vld [vmem:[#allocation2 + $0x34] sm:$0x1] }
 0x515   : > { %v3598_v48 = vsel %vm5287_vm0, %v4497_v20, %v3597_v37  ;;  %v3315_v32 = vshll.u32 %v6560_v3, 16  ;;  %v3664_v7 = vsel %vm5047_vm2, %v6423_v31, %v3663_v23  ;;  %v3321_v22 = vshll.u32 %v6526_v11, 16 }
 0x516   : > { %3917 = vrot.lane.b32.xlu0 %v4531_v58, %s4880_s13  ;;  %3981 = vrot.lane.b32.xlu1 %v4541_v38, %s4881_s16  ;;  %v3314_v55 = vrot.slane %v3312_v6, 4  ;;  %v3326_v53 = vshrl.u32 %v6571_v63, 16  ;;  %v3678_v61 = vsel %vm5047_vm2, %v6431_v29, %v3677_v43  ;;  %v4530_v57 = vcombine.low %v3594_v47, %v3598_v48  ;;  %v3620_v43 = vld [vmem:[#allocation2 + $0x3c] sm:$0x1] }
 0x517   : > { %v3317_v39 = vrot.slane %v3315_v32, 5  ;;  %v3329_v28 = vshll.u32 %v6571_v63, 16  ;;  %v3335_v38 = vshll.u32 %v6538_v26, 16  ;;  %v3505_v46 = vshll.u32 %v3435_v2, 16 }
 0x518   : > { %v3328_v58 = vrot.slane %v3326_v53, 4  ;;  %v3519_v34 = vshll.u32 %v3436_v0, 16  ;;  %v3533_v13 = vshll.u32 %v6475_v44, 16  ;;  %v3547_v11 = vshll.u32 %v6485_v41, 16  ;;  %v6614_v53 = vld [vmem:[#allocation2 + $0x38] sm:$0xf] }
 0x519   : > { %v3318_v18 = vor.u32 %v3317_v39, %v3314_v55  ;;  %v3331_v31 = vrot.slane %v3329_v28, 5  ;;  %v4537_v29 = vcombine.low %v3664_v7, %v3678_v61  ;;  %v3323_v20 = vrot.slane %v3321_v22, 5 }
 0x51a   : > { %3849 = vrot.lane.b32.xlu0 %v4519_v54, %s4877_s9  ;;  %3847 = vrot.lane.b32.xlu1 %v4518_v56, %s4877_s9  ;;  %v3521_v37 = vrot.slane %v3519_v34, 5  ;;  %v3686_v26 = vor.u32 %v6465_v51, %v6463_v15  ;;  %v3337_v23 = vrot.slane %v3335_v38, 5  ;;  %v3507_v6 = vrot.slane %v3505_v46, 5  ;;  %v6603_v56 = vld [vmem:[#allocation2 + $0x30] sm:$0xf] }
 0x51b   : > { %v3319_v2 = vrot.slane %v3318_v18, 4  ;;  %v3332_v0 = vor.u32 %v3331_v31, %v3328_v58  ;;  %v3535_v41 = vrot.slane %v3533_v13, 5  ;;  %v3689_v54 = vshll.u32 %v6593_v17, 16 }
 0x51c   : > { %v3522_v44 = vsel %vm5047_vm2, %v6454_v10, %v3521_v37  ;;  %v3687_v47 = vrot.slane %v3686_v26, 4  ;;  %v3508_v15 = vsel %vm5047_vm2, %v6456_v12, %v3507_v6  ;;  %v3549_v51 = vrot.slane %v3547_v11, 5 }
 0x51d   : > { %v3324_v48 = vsel %vm5047_vm2, %v3319_v2, %v3323_v20  ;;  %v3333_v32 = vrot.slane %v3332_v0, 4  ;;  %v4526_v10 = vcombine.low %v3508_v15, %v3522_v44  ;;  %v3691_v7 = vrot.slane %v3689_v54, 5  ;;  %v3621_v0 = vld [vmem:[#allocation2 + $0x44] sm:$0x1] }
 0x51e   : > { %3961 = vrot.lane.b32.xlu0 %v4537_v29, %s4883_s14  ;;  %3915 = vrot.lane.b32.xlu1 %v4530_v57, %s4880_s13  ;;  %v3700_v55 = vor.u32 %v6482_v30, %v6480_v42  ;;  %v3703_v22 = vshll.u32 %v3620_v43, 16  ;;  %v3550_v12 = vsel %vm5047_vm2, %v6448_v62, %v3549_v51  ;;  %v3340_v39 = vshrl.u32 %v6603_v56, 16  ;;  %v3739_v57 = vld [vmem:[#allocation2 + $0x30] sm:$0xe]  ;;  %v3740_v62 = vld [vmem:[#allocation2 + $0x38] sm:$0xe] }
 0x51f   : > { %v3338_v61 = vsel %vm5047_vm2, %v3333_v32, %v3337_v23  ;;  %v3343_v28 = vshll.u32 %v6603_v56, 16  ;;  %v3536_v42 = vsel %vm5047_vm2, %v6446_v19, %v3535_v41  ;;  %v3692_v30 = vsel %vm5047_vm2, %v3687_v47, %v3691_v7 }
 0x520   : > { %v4514_v58 = vcombine.low %v3324_v48, %v3338_v61  ;;  %v3701_v38 = vrot.slane %v3700_v55, 4  ;;  %v3705_v46 = vrot.slane %v3703_v22, 5  ;;  %v3342_v34 = vrot.slane %v3340_v39, 4  ;;  %v3742_v39 = vld [vmem:[#allocation2 + $0x48] sm:$0xe] }
 0x521   : > { %v3345_v18 = vrot.slane %v3343_v28, 5  ;;  %v3354_v31 = vshrl.u32 %v6614_v53, 16  ;;  %v4527_v13 = vcombine.low %v3536_v42, %v3550_v12  ;;  %v3349_v11 = vshll.u32 %v6514_v36, 16 }
 0x522   : > { %3827 = vrot.lane.b32.xlu0 %v4514_v58, %s4882_s28  ;;  %3895 = vrot.lane.b32.xlu1 %v4526_v10, %s4875_s18  ;;  %v3357_v29 = vshll.u32 %v6614_v53, 16  ;;  %v4504_v19 = vrot.slane %v3739_v57, 9  ;;  %v3706_v20 = vsel %vm5047_vm2, %v3701_v38, %v3705_v46  ;;  %v3363_v2 = vshll.u32 %v6524_v27, 16  ;;  %v3741_v57 = vld [vmem:[#allocation2 + $0x40] sm:$0xe] }
 0x523   : > { %v3346_v37 = vor.u32 %v3345_v18, %v3342_v34  ;;  %v3356_v26 = vrot.slane %v3354_v31, 4  ;;  %v4538_v23 = vcombine.low %v3692_v30, %v3706_v20  ;;  %v3777_v44 = vrot.slane %v6593_v17, 5 }
 0x524   : > { %v3359_v6 = vrot.slane %v3357_v29, 5  ;;  %v4505_v41 = vrot.slane %v3740_v62, 9  ;;  %v6833_v47 = vor.u32 %v6300_v60, %v6290_v8  ;;  %v3781_v48 = vrot.slane %v3620_v43, 5 }
 0x525   : > { %v3347_v54 = vrot.slane %v3346_v37, 4  ;;  %v6834_v32 = vshll.u32 %v6302_v45, 16  ;;  %v3351_v27 = vrot.slane %v3349_v11, 5  ;;  %v3778_v10 = vsel %vm5287_vm0, %v4504_v19, %v3777_v44 }
 0x526   : > { %v3729_v36 = vrot.slane %v6833_v47, 4  ;;  %3897 = vrot.lane.b32.xlu0 %v4527_v13, %s4875_s18  ;;  %3963 = vrot.lane.b32.xlu1 %v4538_v23, %s4883_s14  ;;  %v3360_v51 = vor.u32 %v3359_v6, %v3356_v26  ;;  %v3717_v17 = vshll.u32 %v3621_v0, 16  ;;  %v6835_v7 = vor.u32 %v6440_v4, %v6438_v9  ;;  %v4810_v6 = vld [vmem:[#allocation2] sm:$0xf]  ;;  %s242_s18 = sand.u32 1, %s4865_s22  }
 0x527   : > { %v3733_v15 = vrot.slane %v6834_v32, 5  ;;  %v3365_v60 = vrot.slane %v3363_v2, 5  ;;  %v3782_v43 = vsel %vm5287_vm0, %v4505_v41, %v3781_v48  ;;  %v4509_v55 = vcombine.low %v6452_v1, %v6461_v16  ;;  %s6751_s25 = scalar_lea.sflag [#allocation4], %s242_s18 }
 0x528   : > { %v3715_v8 = vrot.slane %v6835_v7, 4  ;;  %v3352_v22 = vsel %vm5047_vm2, %v3347_v54, %v3351_v27  ;;  %v3361_v61 = vrot.slane %v3360_v51, 4  ;;  %v4542_v12 = vcombine.low %v3778_v10, %v3782_v43 }
 0x529   : > { %v4105_v28 = vsel %vm1871_vm1, %v6534_v59, 0  ;;  %v4510_v9 = vcombine.low %v6560_v3, %v6571_v63  ;;  %v4511_v4 = vcombine.low %v6603_v56, %v6614_v53  ;;  %v3719_v16 = vrot.slane %v3717_v17, 5  ;;  %v4544_v56 = vld [vmem:[%s6798_s5 + $0x4] ss:$0 sm:$0xff] }
 0x52a   : > { %4680 = vmatpush3.bf16.msra.mxu1 %v4105_v28  ;;  %v3366_v1 = vsel %vm5047_vm2, %v3361_v61, %v3365_v60  ;;  %3983 = vrot.lane.b32.xlu1 %v4542_v12, %s4881_s16  ;;  %v4507_v42 = vrot.slane %v3742_v39, 9  ;;  %v3789_v30 = vrot.slane %v6302_v45, 5  ;;  %v3734_v38 = vsel %vm5047_vm2, %v3729_v36, %v3733_v15 }
 0x52b   : > { %v4515_v58 = vcombine.low %v3352_v22, %v3366_v1  ;;  %v3720_v59 = vsel %vm5047_vm2, %v3715_v8, %v3719_v16  ;;  %v4506_v46 = vrot.slane %v3741_v57, 9  ;;  %v3785_v34 = vrot.slane %v3621_v0, 5 }
 0x52c   : > { %v4539_v18 = vcombine.low %v3720_v59, %v3734_v38  ;;  %v3790_v62 = vsel %vm5287_vm0, %v4507_v42, %v3789_v30  ;;  %v4508_v50 = vcombine.low %v4810_v6, %v6395_v21 }
 0x52d   : > { %3829 = vrot.lane.b32.xlu0 %v4515_v58, %s4882_s28  ;;  %v3786_v31 = vsel %vm5287_vm0, %v4506_v46, %v3785_v34 }
 0x52e   : > { %v4543_v45 = vcombine.low %v3786_v31, %v3790_v62 }
 0x531   : > { %3965 = vrot.lane.b32.xlu0 %v4539_v18, %s4883_s14 }
 0x535   : > { %3985 = vrot.lane.b32.xlu0 %v4543_v45, %s4881_s16  ;;  %s4276_s16 = sshll.u32 %s242_s18, 6 }
 0x536   : > { %s244_s14 = scalar_lea.vmem [#allocation3], %s4276_s16 }
 0x537   : > { %s4210_s15 = sshll.u32 %s244_s14, 4  ;;  %s6745_s15 = int_to_ptr.vmem [resolvable:$true] %s4210_s15 }
 0x538   : > { %s4811_s20 = scalar_lea.vmem %s6745_s15, 1024  ;;  %p4818_p0 = scmp.lt.s32.totalorder %s6745_s15, %s4816_s29 }
 0x539   : > { %p4812_p11 = scmp.ne.s32.totalorder %s6745_s15, %s4811_s20  ;;  %p4819_p1 = scmp.lt.s32.totalorder %s4817_s10, %s4811_s20 }
 0x53b   : > { %p4813_p12 = pnand %p4812_p11, %p4960_p5  ;;  %p4820_p2 = por %p4819_p1, %p4818_p0 }
 0x53d   : > { %p4814_p13 = pneg %p4813_p12 }
 0x53f   : > { %p4821_p3 = pnand %p4820_p2, %p4814_p13 }
 0x549   : > { %v3874_v11 = vpop.permute.xlu0 %3873 }
 0x54a   : > { %v3872_v13 = vpop.permute.xlu1 %3871 }
 0x551   : > { %v3940_v14 = vpop.permute.xlu1 %3939  ;;  %v3914_v29 = vpop.permute.xlu0 %3913 }
 0x563   : > { %v3846_v20 = vpop.permute.xlu0 %3845 }
 0x565   : > { %v3844_v19 = vpop.permute.xlu1 %3843 }
 0x569   : > { %v3912_v37 = vpop.permute.xlu1 %3911  ;;  %v3942_v26 = vpop.permute.xlu0 %3941 }
 0x56d   : > { %v3980_v2 = vpop.permute.xlu1 %3979 }
 0x56f   : > { %v3878_v0 = vpop.permute.xlu0 %3877 }
 0x574   : > { %v3824_v23 = vpop.permute.xlu1 %3823 }
 0x575   : > { %v3946_v41 = vpop.permute.xlu0 %3945  ;;  %v3989_v47 = vsel %vm1749_vm3, %v4508_v50, %v3824_v23 }
 0x576   : > { %v4000_v54 = vsel %vm660_vm8, %v3989_v47, %v3844_v19 }
 0x577   : > { %v4008_v32 = vsel %vm1770_vm4, %v4000_v54, %v3872_v13 }
 0x578   : > { %v3876_v44 = vpop.permute.xlu1 %3875 }
 0x57a   : > { %v3894_v48 = vpop.permute.xlu0 %3893 }
 0x57c   : > { %v3944_v36 = vpop.permute.xlu1 %3943 }
 0x580   : > { %v3892_v15 = vpop.permute.xlu1 %3891 }
 0x581   : > { %v4016_v27 = vsel %vm673_vm9, %v4008_v32, %v3892_v15 }
 0x582   : > { %v4024_v51 = vsel %vm1787_vm6, %v4016_v27, %v3912_v37 }
 0x583   : > { %v4032_v10 = vsel %vm682_vm10, %v4024_v51, %v3940_v14 }
 0x584   : > { %v3826_v17 = vpop.permute.xlu0 %3825  ;;  %v3960_v7 = vpop.permute.xlu1 %3959 }
 0x585   : > { %v3992_v21 = vsel %vm1749_vm3, %v4509_v55, %v3826_v17  ;;  %v4040_v8 = vsel %vm1804_vm7, %v4032_v10, %v3960_v7 }
 0x586   : > { %v4002_v60 = vsel %vm660_vm8, %v3992_v21, %v3846_v20  ;;  %v4048_v43 = vsel %vm723_vm11, %v4040_v8, %v3980_v2 }
 0x587   : > { %v4010_v22 = vsel %vm1770_vm4, %v4002_v60, %v3874_v11  ;;  %4681 = vmatprep.mubr.msk.bf16.mxu1 %vm1862_vm12, %v4048_v43 }
 0x588   : > { %v3918_v61 = vpop.permute.xlu0 %3917  ;;  %v3982_v12 = vpop.permute.xlu1 %3981  ;;  %v4018_v39 = vsel %vm673_vm9, %v4010_v22, %v3894_v48 }
 0x589   : > { %v4026_v1 = vsel %vm1787_vm6, %v4018_v39, %v3914_v29 }
 0x58a   : > { %v4034_v55 = vsel %vm682_vm10, %v4026_v1, %v3942_v26 }
 0x58c   : > { %v3850_v28 = vpop.permute.xlu0 %3849  ;;  %v3848_v57 = vpop.permute.xlu1 %3847 }
 0x590   : > { %v3962_v16 = vpop.permute.xlu0 %3961  ;;  %v3916_v58 = vpop.permute.xlu1 %3915 }
 0x591   : > { %v4042_v42 = vsel %vm1804_vm7, %v4034_v55, %v3962_v16 }
 0x592   : > { %v4050_v30 = vsel %vm723_vm11, %v4042_v42, %v3982_v12 }
 0x593   : > { %4682 = vmatmul.mubr.msk.bf16.vlgmr.msra.gmra.mrb[8].mxu1 %vm1862_vm12, %v4050_v30 }
 0x594   : > { %v3828_v59 = vpop.permute.xlu0 %3827  ;;  %v3896_v38 = vpop.permute.xlu1 %3895 }
 0x595   : > { %v3995_v46 = vsel %vm1749_vm3, %v4510_v9, %v3828_v59 }
 0x596   : > { %v4004_v34 = vsel %vm660_vm8, %v3995_v46, %v3848_v57 }
 0x597   : > { %v4012_v18 = vsel %vm1770_vm4, %v4004_v34, %v3876_v44 }
 0x598   : > { %v4020_v31 = vsel %vm673_vm9, %v4012_v18, %v3896_v38  ;;  %v3964_v62 = vpop.permute.xlu1 %3963  ;;  %v3898_v13 = vpop.permute.xlu0 %3897 }
 0x599   : > { %v4028_v45 = vsel %vm1787_vm6, %v4020_v31, %v3916_v58 }
 0x59a   : > { %v4036_v11 = vsel %vm682_vm10, %v4028_v45, %v3944_v36 }
 0x59b   : > { %v4044_v14 = vsel %vm1804_vm7, %v4036_v11, %v3964_v62 }
 0x59c   : > { %v3984_v29 = vpop.permute.xlu1 %3983 }
 0x59d   : > { %v4052_v3 = vsel %vm723_vm11, %v4044_v14, %v3984_v29 }
 0x59e   : > { %4685 = vmatprep.mubr.msk.bf16.mxu1 %vm1862_vm12, %v4052_v3 }
 0x59f   : > { %v3830_v63 = vpop.permute.xlu0 %3829 }
 0x5a0   : > { %v3998_v9 = vsel %vm1749_vm3, %v4511_v4, %v3830_v63 }
 0x5a1   : > { %v4006_v19 = vsel %vm660_vm8, %v3998_v9, %v3850_v28 }
 0x5a2   : > { %v4014_v20 = vsel %vm1770_vm4, %v4006_v19, %v3878_v0 }
 0x5a3   : > { %v4022_v37 = vsel %vm673_vm9, %v4014_v20, %v3898_v13  ;;  %v3966_v26 = vpop.permute.xlu0 %3965 }
 0x5a4   : > { %v4030_v2 = vsel %vm1787_vm6, %v4022_v37, %v3918_v61 }
 0x5a5   : > { %v4038_v23 = vsel %vm682_vm10, %v4030_v2, %v3946_v41 }
 0x5a6   : > { %v4046_v6 = vsel %vm1804_vm7, %v4038_v23, %v3966_v26 }
 0x5a7   : > { %v3986_v50 = vpop.permute.xlu0 %3985 }
 0x5a8   : > { %v4054_v44 = vsel %vm723_vm11, %v4046_v6, %v3986_v50 }
 0x5a9   : > { %4686 = vmatmul.mubr.msk.bf16.gmra.mrb[12].mxu1 %vm1862_vm12, %v4054_v44 }
 0x666   : > { %v4683_v53 = vpop.f32.mrb[8].mxu1 }
 0x667   : > { %v4150_v4 = vadd.f32 %v4683_v53, %v4544_v56  ;;  %v4141_v0 = vpop.f32.mrb[9].mxu1 }
 0x668   : > { %v4142_v47 = vadd.f32 %v4544_v56, %v4141_v0  ;;  %v4684_v36 = vpop.f32.mrb[10].mxu1 }
 0x669   : > { %v4174_v41 = vadd.f32 %v4150_v4, %v5722_v40  ;;  %v4153_v54 = vadd.f32 %v4684_v36, %v4544_v56  ;;  %v4144_v48 = vpop.f32.mrb[11].mxu1 }
 0x66a   : > { %v4172_v32 = vadd.f32 %v4142_v47, %v5725_v35  ;;  %v4145_v15 = vadd.f32 %v4544_v56, %v4144_v48 }
 0x66b   : > { %v4182_v27 = vmax.f32 %v4174_v41, 0.0  ;;  %v4175_v51 = vadd.f32 %v4153_v54, %v5730_v49 }
 0x66c   : > { %v4180_v10 = vmax.f32 %v4172_v32, 0.0  ;;  %v4173_v17 = vadd.f32 %v4145_v15, %v5734_v24 }
 0x66d   : > { %4190 = vst.msk [vmem:[%s244_s14 + $0x10] sm:$0xff] %vm1749_vm3, %v4182_v27  ;;  %v4183_v7 = vmax.f32 %v4175_v51, 0.0 }
 0x66e   : > { %4188 = vst.msk [vmem:[%s244_s14] sm:$0xff] %vm1749_vm3, %v4180_v10  ;;  %v4181_v21 = vmax.f32 %v4173_v17, 0.0 }
 0x66f   : > { %4191 = vst.msk [vmem:[%s244_s14 + $0x18] sm:$0xff] %vm1749_vm3, %v4183_v7 }
 0x670   : > { %4189 = vst.msk [vmem:[%s244_s14 + $0x8] sm:$0xff] %vm1749_vm3, %v4181_v21 }
 0x67c   : > { %v4687_v40 = vpop.f32.mrb[12].mxu1 }
 0x67d   : > { %v4166_v35 = vadd.f32 %v4687_v40, %v4544_v56  ;;  %v4157_v8 = vpop.f32.mrb[13].mxu1 }
 0x67e   : > { %v4158_v60 = vadd.f32 %v4544_v56, %v4157_v8  ;;  %v4688_v49 = vpop.f32.mrb[14].mxu1 }
 0x67f   : > { %v4178_v43 = vadd.f32 %v4166_v35, %v5869_v5  ;;  %v4169_v24 = vadd.f32 %v4688_v49, %v4544_v56  ;;  %v4160_v22 = vpop.f32.mrb[15].mxu1 }
 0x680   : > { %v4176_v61 = vadd.f32 %v4158_v60, %v5874_v33  ;;  %v4161_v12 = vadd.f32 %v4544_v56, %v4160_v22 }
 0x681   : > { %v4186_v39 = vmax.f32 %v4178_v43, 0.0  ;;  %v4179_v28 = vadd.f32 %v4169_v24, %v5881_v25 }
 0x682   : > { %v4184_v57 = vmax.f32 %v4176_v61, 0.0  ;;  %v4177_v1 = vadd.f32 %v4161_v12, %v5885_v52 }
 0x683   : > { %4194 = vst.msk [vmem:[%s244_s14 + $0x30] sm:$0xff] %vm1749_vm3, %v4186_v39  ;;  %v4187_v55 = vmax.f32 %v4179_v28, 0.0 }
 0x684   : > { %4192 = vst.msk [vmem:[%s244_s14 + $0x20] sm:$0xff] %vm1749_vm3, %v4184_v57  ;;  %v4185_v33 = vmax.f32 %v4177_v1, 0.0 }
 0x685   : > { %4195 = vst.msk [vmem:[%s244_s14 + $0x38] sm:$0xff] %vm1749_vm3, %v4187_v55 }
 0x686   : > { %4193 = vst.msk [vmem:[%s244_s14 + $0x28] sm:$0xff] %vm1749_vm3, %v4185_v33 }
 0x687   : > { %4824 = shalt.err (!%p4821_p3)
}
 0x688   : > { %s4825_s18 = scalar_lea.hbm %s6742_s19, 1024  ;;  %s4829_s16 = scalar_lea.hbm %s6799_s6, 2048 }
 0x689   : > { %p4826_p4 = scmp.ne.s32.totalorder %s6742_s19, %s4825_s18  ;;  %p4830_p9 = scmp.lt.u32.totalorder %s6742_s19, %s6799_s6 }
 0x68a   : > { %p4831_p10 = scmp.lt.u32.totalorder %s4829_s16, %s4825_s18  ;;  %p4833_p12 = scmp.lt.u32.totalorder %s4825_s18, %s6742_s19 }
 0x68b   : > { %p4827_p7 = pnand %p4826_p4, %p4960_p5 }
 0x68c   : > { %p4832_p11 = por %p4831_p10, %p4830_p9 }
 0x68d   : > { %p4828_p8 = pneg %p4827_p7 }
 0x68e   : > { %p4834_p13 = por %p4833_p12, %p4832_p11 }
 0x690   : > { %p4835_p0 = pnand %p4834_p13, %p4828_p8 }
 0x692   : > { %4838 = shalt.err (!%p4835_p0)
}
 0x693   : > { %s4886_s17 = smov 128  }
 0x694   : > { %4693 = dma.vmem_to_hbm [thread:$0]  (%p4960_p5), %s6745_s15, 1024, %s6742_s19, %s6751_s25, %s4886_s17, %s4886_s17, %s4882_s28  }
 0x695 PF: > { %p4699_p1 = scmp.ge.s32.totalorder %s4873_s24, 2  ;;  %s4225_s12 = sand.u32 1, %s4861_s21  }
 0x696   : > { %s4226_s20 = scalar_lea.sflag [#allocation4], %s4225_s12 }
 0x697   : > { %p4696_p2 = pnand %p4699_p1, %p4964_p6 }
 0x699   : > { %4856 = dma.done.wait (!%p4696_p2), %s4226_s20, 1024  }
 0x69a   : > { %4858 = vsyncadd (!%p4696_p2), %s4226_s20, 4294966272  ;;  %p16_p3 = scmp.ge.s32.totalorder %s4947_s27, 4   ;;  %s6836_s21 = smov %s4865_s22 }
 0x69b   : > { %s6837_s22 = smov %s4869_s23  ;;  %s6838_s23 = smov %s4958_s30 }
 0x69c   : > { %s6839_s24 = smov %s4947_s27  ;;  %18 = sbr.rel (!%p16_p3) target bundleno = 3 (0x3), region = 83 }
 0x6a3   :  { %4231 = vsyncpa [#allocation4], 1 }
 0x6a4   :  { %4233 = vsyncpa [#allocation4 + $0x1], 1 }

</bundles_post_ra>
